<compile_context>
chip_gen: v5e
topology: v5e:2x2
jax: 0.10.0
libtpu: 0.0.40
codegen_flags: <defaults>
</compile_context>

<pallas_src>
import math

import jax
import jax.numpy as jnp
from jax import lax
from jax.experimental import pallas as pl
from jax.experimental.pallas import tpu as pltpu

D_MODEL = 512
HEADS = 8
D_K = D_MODEL // HEADS
PAIRS = HEADS // 2
_SCALE = 1.0 / math.sqrt(D_K)
_LANE = 128


def _attn_kernel(q_ref, kT_ref, v_ref, bias_ref, wo_ref, bo_ref, out_ref, ctx_ref):
    """Attention + output projection for one (batch element, query tile).

    q_ref:    (H, TQ, d_k)  bf16, pre-scaled by 1/sqrt(d_k)
    kT_ref:   (H, d_k, S)   bf16  (keys pre-transposed -> lane-dense score matmul)
    v_ref:    (H, S, d_k)   bf16  (head-major -> leading-index views)
    bias_ref: (1, S)        f32   additive key mask (0 or -1e9), built in XLA
    wo_ref:   (D, D) bf16;  bo_ref: (1, D) f32
    out_ref:  (TQ, D) f32
    ctx_ref:  (PAIRS, TQ, 2*d_k) bf16 scratch (pair-major -> lane-aligned stores)
    """
    bias = bias_ref[...]                                    # (1, S) f32

    def one_head(h):
        s = jnp.dot(q_ref[h], kT_ref[h],
                    preferred_element_type=jnp.float32)     # (TQ, S) f32
        s = s + bias                                         # additive mask, no select
        m = jnp.max(s, axis=-1, keepdims=True)
        p = jnp.exp(s - m)
        denom = jnp.sum(p, axis=-1, keepdims=True)
        # Normalize AFTER the PV matmul: reciprocal multiply touches only (TQ, d_k).
        ctx = jnp.dot(p.astype(jnp.bfloat16), v_ref[h],
                      preferred_element_type=jnp.float32)    # (TQ, d_k) f32
        return (ctx * pl.reciprocal(denom, approx=True)).astype(jnp.bfloat16)

    def pair_body(pair, carry):
        h0 = 2 * pair
        # One 128-lane slab per head pair; stored via a leading (pair) index so all
        # lane offsets stay static and aligned (no masked partial stores).
        ctx_ref[pair] = jnp.concatenate([one_head(h0), one_head(h0 + 1)], axis=1)
        return carry

    # fori_loop (not a static unroll) bounds the live (TQ, S) f32 temporaries to a
    # single head pair, keeping vreg/VMEM pressure within the declared budget.
    lax.fori_loop(0, PAIRS, pair_body, 0)

    # Static 128-aligned lane concatenation of the four pair slabs (cheap), then a
    # single (TQ, 512) @ (512, 512) output GEMM.
    ctx = jnp.concatenate([ctx_ref[i] for i in range(PAIRS)], axis=1)   # (TQ, D) bf16
    out = jnp.dot(ctx, wo_ref[...], preferred_element_type=jnp.float32) + bo_ref[...]
    out_ref[...] = out.astype(out_ref.dtype)


def _vmem_capacity_bytes():
    try:
        return int(pltpu.get_tpu_info().vmem_capacity_bytes)
    except Exception:
        return 64 << 20   # conservative (v7x-sized) fallback


def _vmem_estimate(s_pad, tq):
    bf16, f32 = 2, 4
    q_blk = HEADS * tq * _LANE * bf16            # (H,TQ,64): 64-lane minor dim pads to 128
    kt_blk = HEADS * D_K * s_pad * bf16          # (H,64,S): lane-dense
    v_blk = HEADS * s_pad * _LANE * bf16         # (H,S,64): 64-lane minor dim pads to 128
    bias_blk = 8 * s_pad * f32
    out_blk = tq * D_MODEL * f32
    w_blk = D_MODEL * D_MODEL * bf16 + 8 * D_MODEL * f32
    blocks = 2 * (q_blk + kt_blk + v_blk + bias_blk + out_blk + w_blk)   # double-buffered
    scratch = PAIRS * tq * 2 * D_K * bf16
    temps = 5 * tq * s_pad * f32 + 4 * tq * D_MODEL * f32   # ~one head pair of f32 temps
    return blocks + scratch + temps


def _pick_tq(s_pad, vmem_cap):
    # Largest 128-multiple query tile that divides S_pad and fits the generation's
    # VMEM (v7x 64 MiB -> TQ drops to 256 around S_pad ~ 4k; v5e/v6e keep 512 longer).
    for tq in (512, 256, 128):
        if s_pad % tq == 0 and _vmem_estimate(s_pad, tq) <= int(0.70 * vmem_cap):
            return tq
    # TODO(synk): for sequences where even TQ=128 does not fit (very long S on v7x),
    # switch to flash-style key tiling with online softmax instead of full-S scores.
    return _LANE


def _vmem_limit(s_pad, tq, vmem_cap):
    est = _vmem_estimate(s_pad, tq)
    hi = int(0.85 * vmem_cap)                    # ~54 MiB on v7x, ~109 MiB on v5e/v6e
    return int(min(max(2 * est, 48 << 20), hi))


@jax.jit
def multi_head_attention(q, k, v, mask, params):
    """q, k, v: (B, S, 512) float32; mask: (B, 1, 1, S) int32 (0 = key masked out)."""
    B, S, D = q.shape
    assert D == D_MODEL
    wq, bq, wk, bk, wv, bv, wo, bo = params

    # Pad the sequence axis to a multiple of 128 lanes.  Padded keys are masked out
    # via the additive bias; padded query rows are sliced away at the end.
    S_pad = pl.cdiv(S, _LANE) * _LANE
    pad = S_pad - S
    mask2 = mask.reshape(B, 1, S)
    if pad:
        q = jnp.pad(q, ((0, 0), (0, pad), (0, 0)))
        k = jnp.pad(k, ((0, 0), (0, pad), (0, 0)))
        v = jnp.pad(v, ((0, 0), (0, pad), (0, 0)))
        mask2 = jnp.pad(mask2, ((0, 0), (0, 0), (0, pad)))   # padded keys -> mask == 0

    # Additive key-mask bias computed once in XLA (single compare total).
    bias = jnp.where(mask2 == 0, jnp.float32(-1e9), jnp.float32(0.0))   # (B, 1, S_pad)

    # Q/K/V projections decoupled from the attention kernel: plain XLA GEMMs with
    # bf16 MXU inputs and f32 accumulation.
    bf = jnp.bfloat16

    def proj(x, w, b):
        return jnp.dot(x.astype(bf), w.astype(bf),
                       preferred_element_type=jnp.float32) + b.astype(jnp.float32)

    qp = proj(q, wq, bq) * _SCALE            # fold 1/sqrt(d_k) once, in f32
    kp = proj(k, wk, bk)
    vp = proj(v, wv, bv)

    # Head-major layouts for the kernel.
    q_h = qp.reshape(B, S_pad, HEADS, D_K).transpose(0, 2, 1, 3).astype(bf)   # (B,H,S,dk)
    kT_h = kp.reshape(B, S_pad, HEADS, D_K).transpose(0, 2, 3, 1).astype(bf)  # (B,H,dk,S)
    v_h = vp.reshape(B, S_pad, HEADS, D_K).transpose(0, 2, 1, 3).astype(bf)   # (B,H,S,dk)

    wob = wo.astype(bf)
    bof = bo.reshape(1, D).astype(jnp.float32)

    vmem_cap = _vmem_capacity_bytes()
    TQ = _pick_tq(S_pad, vmem_cap)
    grid = (B, S_pad // TQ)

    out = pl.pallas_call(
        _attn_kernel,
        out_shape=jax.ShapeDtypeStruct((B, S_pad, D), jnp.float32),
        grid_spec=pltpu.PrefetchScalarGridSpec(
            num_scalar_prefetch=0,
            grid=grid,
            in_specs=[
                pl.BlockSpec((None, HEADS, TQ, D_K), lambda b, qi: (b, 0, qi, 0)),
                pl.BlockSpec((None, HEADS, D_K, S_pad), lambda b, qi: (b, 0, 0, 0)),
                pl.BlockSpec((None, HEADS, S_pad, D_K), lambda b, qi: (b, 0, 0, 0)),
                pl.BlockSpec((None, 1, S_pad), lambda b, qi: (b, 0, 0)),
                pl.BlockSpec((D_MODEL, D_MODEL), lambda b, qi: (0, 0)),
                pl.BlockSpec((1, D_MODEL), lambda b, qi: (0, 0)),
            ],
            out_specs=pl.BlockSpec((None, TQ, D_MODEL), lambda b, qi: (b, qi, 0)),
            scratch_shapes=[pltpu.VMEM((PAIRS, TQ, 2 * D_K), jnp.bfloat16)],
        ),
        compiler_params=pltpu.CompilerParams(
            # Projections are decoupled, so nothing carries across query tiles:
            # both grid axes are independent and megacore-shardable.
            dimension_semantics=("parallel", "parallel"),
            vmem_limit_bytes=_vmem_limit(S_pad, TQ, vmem_cap),
        ),
    )(q_h, kT_h, v_h, bias, wob, bof)
    return out[:, :S, :]


def _reference(q, k, v, mask, params):
    """Pure-JAX f32 reference mirroring the PyTorch forward (dropout = identity)."""
    wq, bq, wk, bk, wv, bv, wo, bo = params
    B, S, D = q.shape

    def split(x):  # (B, S, D) -> (B, H, S, d_k)
        return x.reshape(B, S, HEADS, D_K).transpose(0, 2, 1, 3)

    qp = split(q @ wq + bq)
    kp = split(k @ wk + bk)
    vp = split(v @ wv + bv)
    scores = jnp.einsum("bhqd,bhkd->bhqk", qp, kp) / math.sqrt(D_K)
    scores = jnp.where(mask == 0, -1e9, scores)          # mask (B,1,1,S) broadcasts
    weights = jax.nn.softmax(scores, axis=-1)
    ctx = jnp.einsum("bhqk,bhkd->bhqd", weights, vp)
    ctx = ctx.transpose(0, 2, 1, 3).reshape(B, S, D)
    return ctx @ wo + bo


if __name__ == "__main__":
    B, S = 2, 8
    key = jax.random.PRNGKey(0)
    keys = jax.random.split(key, 12)

    scale = 1.0 / math.sqrt(D_MODEL)
    # Deterministic synthetic parameters. Weights stored as (in, out): y = x @ W + b.
    wq = jax.random.normal(keys[0], (D_MODEL, D_MODEL), jnp.float32) * scale
    bq = jax.random.normal(keys[1], (D_MODEL,), jnp.float32) * 0.01
    wk = jax.random.normal(keys[2], (D_MODEL, D_MODEL), jnp.float32) * scale
    bk = jax.random.normal(keys[3], (D_MODEL,), jnp.float32) * 0.01
    wv = jax.random.normal(keys[4], (D_MODEL, D_MODEL), jnp.float32) * scale
    bv = jax.random.normal(keys[5], (D_MODEL,), jnp.float32) * 0.01
    wo = jax.random.normal(keys[6], (D_MODEL, D_MODEL), jnp.float32) * scale
    bo = jax.random.normal(keys[7], (D_MODEL,), jnp.float32) * 0.01
    params = (wq, bq, wk, bk, wv, bv, wo, bo)

    q = jax.random.normal(keys[8], (B, S, D_MODEL), jnp.float32)
    k = jax.random.normal(keys[9], (B, S, D_MODEL), jnp.float32)
    v = jax.random.normal(keys[10], (B, S, D_MODEL), jnp.float32)
    # Padding-style mask: last 2 key positions of batch element 1 are masked out.
    mask = jnp.ones((B, 1, 1, S), jnp.int32)
    mask = mask.at[1, 0, 0, S - 2:].set(0)

    out = multi_head_attention(q, k, v, mask, params)
    jax.block_until_ready(out)

    ref = _reference(q, k, v, mask, params)
    assert out.shape == (B, S, D_MODEL)
    # bf16 MXU inputs + approximate reciprocal -> looser tolerance than pure f32.
    err = float(jnp.max(jnp.abs(out - ref)))
    assert jnp.allclose(out, ref, atol=7e-2, rtol=7e-2), err

    print("KERNEL_OK")
</pallas_src>

<mosaic_0001>
module attributes {stable_mosaic.version = 11 : i64} {
  func.func @_attn_kernel(%arg0: i32, %arg1: i32, %arg2: memref<1x8x128x64xbf16, #tpu.memory_space<vmem>>, %arg3: memref<1x8x64x128xbf16, #tpu.memory_space<vmem>>, %arg4: memref<1x8x128x64xbf16, #tpu.memory_space<vmem>>, %arg5: memref<1x1x128xf32, #tpu.memory_space<vmem>>, %arg6: memref<512x512xbf16, #tpu.memory_space<vmem>>, %arg7: memref<1x512xf32, #tpu.memory_space<vmem>>, %arg8: memref<1x128x512xf32, #tpu.memory_space<vmem>>, %arg9: memref<4x128x128xbf16, #tpu.memory_space<vmem>>) attributes {dimension_semantics = [#tpu.dimension_semantics<parallel>, #tpu.dimension_semantics<parallel>], iteration_bounds = array<i64: 2, 1>, scalar_prefetch = 0 : i64, scratch_operands = 1 : i64, tpu.core_type = #tpu.core_type<tc>, window_params = [{transform_indices = @transform_0, window_bounds = array<i64: 1, 8, 128, 64>}, {transform_indices = @transform_1, window_bounds = array<i64: 1, 8, 64, 128>}, {transform_indices = @transform_2, window_bounds = array<i64: 1, 8, 128, 64>}, {transform_indices = @transform_3, window_bounds = array<i64: 1, 1, 128>}, {pipeline_mode = #tpu.pipeline_mode<synchronous>, transform_indices = @transform_4, window_bounds = array<i64: 512, 512>}, {pipeline_mode = #tpu.pipeline_mode<synchronous>, transform_indices = @transform_5, window_bounds = array<i64: 1, 512>}, {transform_indices = @transform_6, window_bounds = array<i64: 1, 128, 512>}]} {
    %c0 = arith.constant 0 : index
    %c0_0 = arith.constant 0 : index
    %c0_1 = arith.constant 0 : index
    %0 = vector.load %arg5[%c0, %c0_0, %c0_1] : memref<1x1x128xf32, #tpu.memory_space<vmem>>, vector<1x1x128xf32>
    %1 = vector.shape_cast %0 : vector<1x1x128xf32> to vector<1x128xf32>
    %c0_i32 = arith.constant 0 : i32
    %c4_i32 = arith.constant 4 : i32
    %2 = arith.addi %c0_i32, %c4_i32 : i32
    %c1_i32 = arith.constant 1 : i32
    scf.for %arg10 = %c0_i32 to %2 step %c1_i32  : i32 {
      %c2_i32 = arith.constant 2 : i32
      %20 = arith.muli %c2_i32, %arg10 : i32
      %c0_19 = arith.constant 0 : index
      %21 = arith.index_cast %20 : i32 to index
      %c0_20 = arith.constant 0 : index
      %c0_21 = arith.constant 0 : index
      %22 = vector.load %arg2[%c0_19, %21, %c0_20, %c0_21] : memref<1x8x128x64xbf16, #tpu.memory_space<vmem>>, vector<1x1x128x64xbf16>
      %23 = vector.shape_cast %22 : vector<1x1x128x64xbf16> to vector<128x64xbf16>
      %c0_22 = arith.constant 0 : index
      %24 = arith.index_cast %20 : i32 to index
      %c0_23 = arith.constant 0 : index
      %c0_24 = arith.constant 0 : index
      %25 = vector.load %arg3[%c0_22, %24, %c0_23, %c0_24] : memref<1x8x64x128xbf16, #tpu.memory_space<vmem>>, vector<1x1x64x128xbf16>
      %26 = vector.shape_cast %25 : vector<1x1x64x128xbf16> to vector<64x128xbf16>
      %cst_25 = arith.constant dense<0.000000e+00> : vector<128x128xf32>
      %27 = tpu.matmul %23, %26, %cst_25 {dimension_numbers = #tpu.dot_dimension_numbers<[1], [0], [0], [1], [0, 0, 1, 1], [], []>} : vector<128x64xbf16>, vector<64x128xbf16>, vector<128x128xf32> -> vector<128x128xf32>
      %28 = vector.broadcast %1 : vector<1x128xf32> to vector<128x128xf32>
      %29 = arith.addf %27, %28 : vector<128x128xf32>
      %cst_26 = arith.constant dense<0xFF800000> : vector<128xf32>
      %30 = vector.multi_reduction <maximumf>, %29, %cst_26 [1] : vector<128x128xf32> to vector<128xf32>
      %31 = vector.shape_cast %30 : vector<128xf32> to vector<128x1xf32>
      %32 = vector.broadcast %31 : vector<128x1xf32> to vector<128x128xf32>
      %33 = arith.subf %29, %32 : vector<128x128xf32>
      %34 = math.exp %33 : vector<128x128xf32>
      %cst_27 = arith.constant dense<0.000000e+00> : vector<128xf32>
      %35 = vector.multi_reduction <add>, %34, %cst_27 [1] : vector<128x128xf32> to vector<128xf32>
      %36 = vector.shape_cast %35 : vector<128xf32> to vector<128x1xf32>
      %37 = arith.truncf %34 : vector<128x128xf32> to vector<128x128xbf16>
      %c0_28 = arith.constant 0 : index
      %38 = arith.index_cast %20 : i32 to index
      %c0_29 = arith.constant 0 : index
      %c0_30 = arith.constant 0 : index
      %39 = vector.load %arg4[%c0_28, %38, %c0_29, %c0_30] : memref<1x8x128x64xbf16, #tpu.memory_space<vmem>>, vector<1x1x128x64xbf16>
      %40 = vector.shape_cast %39 : vector<1x1x128x64xbf16> to vector<128x64xbf16>
      %cst_31 = arith.constant dense<0.000000e+00> : vector<128x64xf32>
      %41 = tpu.matmul %37, %40, %cst_31 {dimension_numbers = #tpu.dot_dimension_numbers<[1], [0], [0], [1], [0, 0, 1, 1], [], []>} : vector<128x128xbf16>, vector<128x64xbf16>, vector<128x64xf32> -> vector<128x64xf32>
      %42 = tpu.reciprocal %36 {approx = true} : vector<128x1xf32> -> vector<128x1xf32>
      %43 = vector.broadcast %42 : vector<128x1xf32> to vector<128x64xf32>
      %44 = arith.mulf %41, %43 : vector<128x64xf32>
      %45 = arith.truncf %44 : vector<128x64xf32> to vector<128x64xbf16>
      %c1_i32_32 = arith.constant 1 : i32
      %46 = arith.addi %20, %c1_i32_32 : i32
      %c0_33 = arith.constant 0 : index
      %47 = arith.index_cast %46 : i32 to index
      %c0_34 = arith.constant 0 : index
      %c0_35 = arith.constant 0 : index
      %48 = vector.load %arg2[%c0_33, %47, %c0_34, %c0_35] : memref<1x8x128x64xbf16, #tpu.memory_space<vmem>>, vector<1x1x128x64xbf16>
      %49 = vector.shape_cast %48 : vector<1x1x128x64xbf16> to vector<128x64xbf16>
      %c0_36 = arith.constant 0 : index
      %50 = arith.index_cast %46 : i32 to index
      %c0_37 = arith.constant 0 : index
      %c0_38 = arith.constant 0 : index
      %51 = vector.load %arg3[%c0_36, %50, %c0_37, %c0_38] : memref<1x8x64x128xbf16, #tpu.memory_space<vmem>>, vector<1x1x64x128xbf16>
      %52 = vector.shape_cast %51 : vector<1x1x64x128xbf16> to vector<64x128xbf16>
      %cst_39 = arith.constant dense<0.000000e+00> : vector<128x128xf32>
      %53 = tpu.matmul %49, %52, %cst_39 {dimension_numbers = #tpu.dot_dimension_numbers<[1], [0], [0], [1], [0, 0, 1, 1], [], []>} : vector<128x64xbf16>, vector<64x128xbf16>, vector<128x128xf32> -> vector<128x128xf32>
      %54 = vector.broadcast %1 : vector<1x128xf32> to vector<128x128xf32>
      %55 = arith.addf %53, %54 : vector<128x128xf32>
      %cst_40 = arith.constant dense<0xFF800000> : vector<128xf32>
      %56 = vector.multi_reduction <maximumf>, %55, %cst_40 [1] : vector<128x128xf32> to vector<128xf32>
      %57 = vector.shape_cast %56 : vector<128xf32> to vector<128x1xf32>
      %58 = vector.broadcast %57 : vector<128x1xf32> to vector<128x128xf32>
      %59 = arith.subf %55, %58 : vector<128x128xf32>
      %60 = math.exp %59 : vector<128x128xf32>
      %cst_41 = arith.constant dense<0.000000e+00> : vector<128xf32>
      %61 = vector.multi_reduction <add>, %60, %cst_41 [1] : vector<128x128xf32> to vector<128xf32>
      %62 = vector.shape_cast %61 : vector<128xf32> to vector<128x1xf32>
      %63 = arith.truncf %60 : vector<128x128xf32> to vector<128x128xbf16>
      %c0_42 = arith.constant 0 : index
      %64 = arith.index_cast %46 : i32 to index
      %c0_43 = arith.constant 0 : index
      %c0_44 = arith.constant 0 : index
      %65 = vector.load %arg4[%c0_42, %64, %c0_43, %c0_44] : memref<1x8x128x64xbf16, #tpu.memory_space<vmem>>, vector<1x1x128x64xbf16>
      %66 = vector.shape_cast %65 : vector<1x1x128x64xbf16> to vector<128x64xbf16>
      %cst_45 = arith.constant dense<0.000000e+00> : vector<128x64xf32>
      %67 = tpu.matmul %63, %66, %cst_45 {dimension_numbers = #tpu.dot_dimension_numbers<[1], [0], [0], [1], [0, 0, 1, 1], [], []>} : vector<128x128xbf16>, vector<128x64xbf16>, vector<128x64xf32> -> vector<128x64xf32>
      %68 = tpu.reciprocal %62 {approx = true} : vector<128x1xf32> -> vector<128x1xf32>
      %69 = vector.broadcast %68 : vector<128x1xf32> to vector<128x64xf32>
      %70 = arith.mulf %67, %69 : vector<128x64xf32>
      %71 = arith.truncf %70 : vector<128x64xf32> to vector<128x64xbf16>
      %72 = tpu.concatenate %45, %71 in 1 : vector<128x64xbf16>, vector<128x64xbf16> -> vector<128x128xbf16>
      %73 = arith.index_cast %arg10 : i32 to index
      %c0_46 = arith.constant 0 : index
      %c0_47 = arith.constant 0 : index
      %74 = vector.load %arg9[%73, %c0_46, %c0_47] : memref<4x128x128xbf16, #tpu.memory_space<vmem>>, vector<1x128x128xbf16>
      %75 = vector.shape_cast %74 : vector<1x128x128xbf16> to vector<128x128xbf16>
      %76 = vector.shape_cast %72 : vector<128x128xbf16> to vector<1x128x128xbf16>
      tpu.vector_store %arg9[%73, %c0_46, %c0_47], %76 {strides = array<i32>} : memref<4x128x128xbf16, #tpu.memory_space<vmem>>, vector<1x128x128xbf16>,
    }
    %c4_i32_2 = arith.constant 4 : i32
    %c0_3 = arith.constant 0 : index
    %c0_4 = arith.constant 0 : index
    %c0_5 = arith.constant 0 : index
    %3 = vector.load %arg9[%c0_3, %c0_4, %c0_5] : memref<4x128x128xbf16, #tpu.memory_space<vmem>>, vector<1x128x128xbf16>
    %4 = vector.shape_cast %3 : vector<1x128x128xbf16> to vector<128x128xbf16>
    %c1 = arith.constant 1 : index
    %c0_6 = arith.constant 0 : index
    %c0_7 = arith.constant 0 : index
    %5 = vector.load %arg9[%c1, %c0_6, %c0_7] : memref<4x128x128xbf16, #tpu.memory_space<vmem>>, vector<1x128x128xbf16>
    %6 = vector.shape_cast %5 : vector<1x128x128xbf16> to vector<128x128xbf16>
    %c2 = arith.constant 2 : index
    %c0_8 = arith.constant 0 : index
    %c0_9 = arith.constant 0 : index
    %7 = vector.load %arg9[%c2, %c0_8, %c0_9] : memref<4x128x128xbf16, #tpu.memory_space<vmem>>, vector<1x128x128xbf16>
    %8 = vector.shape_cast %7 : vector<1x128x128xbf16> to vector<128x128xbf16>
    %c3 = arith.constant 3 : index
    %c0_10 = arith.constant 0 : index
    %c0_11 = arith.constant 0 : index
    %9 = vector.load %arg9[%c3, %c0_10, %c0_11] : memref<4x128x128xbf16, #tpu.memory_space<vmem>>, vector<1x128x128xbf16>
    %10 = vector.shape_cast %9 : vector<1x128x128xbf16> to vector<128x128xbf16>
    %11 = tpu.concatenate %4, %6, %8, %10 in 1 : vector<128x128xbf16>, vector<128x128xbf16>, vector<128x128xbf16>, vector<128x128xbf16> -> vector<128x512xbf16>
    %c0_12 = arith.constant 0 : index
    %c0_13 = arith.constant 0 : index
    %12 = vector.load %arg6[%c0_12, %c0_13] : memref<512x512xbf16, #tpu.memory_space<vmem>>, vector<512x512xbf16>
    %cst = arith.constant dense<0.000000e+00> : vector<128x512xf32>
    %13 = tpu.matmul %11, %12, %cst {dimension_numbers = #tpu.dot_dimension_numbers<[1], [0], [0], [1], [0, 0, 1, 1], [], []>} : vector<128x512xbf16>, vector<512x512xbf16>, vector<128x512xf32> -> vector<128x512xf32>
    %c0_14 = arith.constant 0 : index
    %c0_15 = arith.constant 0 : index
    %14 = vector.load %arg7[%c0_14, %c0_15] : memref<1x512xf32, #tpu.memory_space<vmem>>, vector<1x512xf32>
    %15 = vector.broadcast %14 : vector<1x512xf32> to vector<128x512xf32>
    %16 = arith.addf %13, %15 : vector<128x512xf32>
    %c0_16 = arith.constant 0 : index
    %c0_17 = arith.constant 0 : index
    %c0_18 = arith.constant 0 : index
    %17 = vector.load %arg8[%c0_16, %c0_17, %c0_18] : memref<1x128x512xf32, #tpu.memory_space<vmem>>, vector<1x128x512xf32>
    %18 = vector.shape_cast %17 : vector<1x128x512xf32> to vector<128x512xf32>
    %19 = vector.shape_cast %16 : vector<128x512xf32> to vector<1x128x512xf32>
    tpu.vector_store %arg8[%c0_16, %c0_17, %c0_18], %19 {strides = array<i32>} : memref<1x128x512xf32, #tpu.memory_space<vmem>>, vector<1x128x512xf32>,
    return
  }
  func.func @transform_0(%arg0: i32, %arg1: i32) -> (i32, i32, i32, i32) {
    %c0_i32 = arith.constant 0 : i32
    %c0_i32_0 = arith.constant 0 : i32
    %c0_i32_1 = arith.constant 0 : i32
    return %arg0, %c0_i32, %arg1, %c0_i32_0 : i32, i32, i32, i32
  }
  func.func @transform_1(%arg0: i32, %arg1: i32) -> (i32, i32, i32, i32) {
    %c0_i32 = arith.constant 0 : i32
    %c0_i32_0 = arith.constant 0 : i32
    %c0_i32_1 = arith.constant 0 : i32
    %c0_i32_2 = arith.constant 0 : i32
    return %arg0, %c0_i32, %c0_i32_0, %c0_i32_1 : i32, i32, i32, i32
  }
  func.func @transform_2(%arg0: i32, %arg1: i32) -> (i32, i32, i32, i32) {
    %c0_i32 = arith.constant 0 : i32
    %c0_i32_0 = arith.constant 0 : i32
    %c0_i32_1 = arith.constant 0 : i32
    %c0_i32_2 = arith.constant 0 : i32
    return %arg0, %c0_i32, %c0_i32_0, %c0_i32_1 : i32, i32, i32, i32
  }
  func.func @transform_3(%arg0: i32, %arg1: i32) -> (i32, i32, i32) {
    %c0_i32 = arith.constant 0 : i32
    %c0_i32_0 = arith.constant 0 : i32
    %c0_i32_1 = arith.constant 0 : i32
    return %arg0, %c0_i32, %c0_i32_0 : i32, i32, i32
  }
  func.func @transform_4(%arg0: i32, %arg1: i32) -> (i32, i32) {
    %c0_i32 = arith.constant 0 : i32
    %c0_i32_0 = arith.constant 0 : i32
    %c0_i32_1 = arith.constant 0 : i32
    return %c0_i32, %c0_i32_0 : i32, i32
  }
  func.func @transform_5(%arg0: i32, %arg1: i32) -> (i32, i32) {
    %c0_i32 = arith.constant 0 : i32
    %c0_i32_0 = arith.constant 0 : i32
    %c0_i32_1 = arith.constant 0 : i32
    return %c0_i32, %c0_i32_0 : i32, i32
  }
  func.func @transform_6(%arg0: i32, %arg1: i32) -> (i32, i32, i32) {
    %c0_i32 = arith.constant 0 : i32
    %c0_i32_0 = arith.constant 0 : i32
    return %arg0, %arg1, %c0_i32 : i32, i32, i32
  }
}

</mosaic_0001>

<bundles_post_ra>
// kernel: multi_head_attention.1
= control target key start
LH: loop header
LB: loop body
LE: loop exit
PB: predicated region body
PF: predicated region fallthrough
CT: control target
= control target key end

     0   :  { %s4852_s21 = smov 0   ;;  %s4854_s22 = smov 0   ;;  %s6434_s0 = inlined_call_operand.vmem [shape: bf16[2,8,128,64], index: 0, kind: input, shape index: {}]   ;;  %s6435_s1 = inlined_call_operand.vmem [shape: bf16[2,8,64,128], index: 1, kind: input, shape index: {}]   ;;  %s6436_s2 = inlined_call_operand.vmem [shape: bf16[2,8,128,64], index: 2, kind: input, shape index: {}]   ;;  %s6437_s3 = inlined_call_operand.vmem [shape: f32[2,1,128], index: 3, kind: input, shape index: {}]   ;;  %s6438_s4 = inlined_call_operand.vmem [shape: bf16[512,512], index: 4, kind: input, shape index: {}]   ;;  %s6439_s5 = inlined_call_operand.vmem [shape: f32[1,512], index: 5, kind: input, shape index: {}]   ;;  %s6440_s6 = inlined_call_operand.vmem [shape: f32[2,128,512], index: 6, kind: output, shape index: {}]  }
   0x1   :  { %s4856_s23 = smov 0  }
   0x2 LB: > { %s28_s24 = sadd.s32 1, %s4806_s22  ;;  %p3496_p0 = scmp.ge.s32.totalorder %s4810_s23, 1  ;;  %s4810_s23 = sphi %s4856_s23, %s16_s23   ;;  %s4806_s22 = sphi %s4854_s22, %s6442_s22   ;;  %s4802_s21 = sphi %s4852_s21, %s6441_s21  }
   0x3   : > { %p30_p1 = scmp.ge.s32.totalorder %s28_s24, 2  ;;  %p261_p2 = scmp.lt.s32.totalorder %s4810_s23, 3 }
   0x5   : > { %s6444_s24 = smov (%p30_p1, %s28_s24), 0  ;;  %p262_p3 = pnand %p3496_p0, %p261_p2 }
   0x6   : > { %p314_p4 = scmp.lt.s32.totalorder (!%p262_p3), %s4802_s21, 1  ;;  %s4896_s18 = smov (!%p262_p3), 0  }
   0x7   : > { %265 = sbr.rel (%p262_p3) target bundleno = 1349 (0x545), region = 44 }
   0xc   : > { %s6446_s21 = smov (!%p314_p4, %s4802_s21), 1 }
   0xd   : > { %s4870_s25 = sshll.u32 %s6446_s21, 9  ;;  %s4378_s26 = sshll.u32 %s6446_s21, 8 }
   0xe   : > { %s321_s29 = scalar_lea.vmem %s6434_s0, %s4870_s25  ;;  %s4879_s8 = scalar_lea.vmem %s6435_s1, %s4378_s26 }
   0xf   : > { %s332_s11 = scalar_lea.vmem %s6436_s2, %s4870_s25  ;;  %s335_s14 = scalar_lea.vmem %s6437_s3, %s6446_s21 }
  0x10   : > { %s4892_s17 = scalar_lea.vmem %s6440_s6, %s4870_s25  ;;  %v4894_v0 = vld [vmem:[%s335_s14] sm:$0x1] }
  0x11 LB: >> { %s4392_s19 = sshll.u32 %s4814_s18, 6  ;;  %s4382_s21 = sshll.u32 %s4814_s18, 7  ;;  %vm453_vm0 = vcmask 523264   ;;  %v4948_v26 = vperm.slane %v4894_v0, 0  ;;  %s4814_s18 = sphi %s4896_s18, %s354_s18  }
  0x12   : >> { %s377_s20 = scalar_lea.vmem %s4879_s8, %s4392_s19  ;;  %s4913_s28 = scalar_lea.vmem %s321_s29, %s4382_s21 }
  0x13   : >> { %v4419_v1 = vld [vmem:[%s377_s20 + $0x38] sm:$0xff]  ;;  %v4418_v3 = vld [vmem:[%s377_s20 + $0x30] sm:$0xff]  ;;  %v4417_v5 = vld [vmem:[%s377_s20 + $0x28] sm:$0xff]  ;;  %s5013_s9 = scalar_lea.vmem %s332_s11, %s4382_s21  ;;  %s4816_s10 = smov 64  }
  0x14   : >> { %v4396_v2 = vld [vmem:[%s377_s20 + $0x18] sm:$0xff]  ;;  %933 = vmatpush.bf16.msra.mxu2 %v4419_v1  ;;  %v4395_v4 = vld [vmem:[%s377_s20 + $0x10] sm:$0xff]  ;;  %v4394_v6 = vld [vmem:[%s377_s20 + $0x8] sm:$0xff]  ;;  %s5211_s12 = scalar_lea.vmem [#allocation2], %s4392_s19  ;;  %s354_s18 = sadd.s32 1, %s4814_s18  }
  0x15   : >> { %482 = vmatpush.bf16.msra.mxu0 %v4396_v2  ;;  %v4416_v7 = vld [vmem:[%s377_s20 + $0x20] sm:$0xff]  ;;  %v4408_v11 = vld [vmem:[%s4913_s28 + $0x48] sm:$0xff]  ;;  %v4409_v13 = vld [vmem:[%s4913_s28 + $0x50] sm:$0xff]  ;;  %p351_p5 = scmp.ge.s32.totalorder %s354_s18, 4  }
  0x16   : >> { %v4393_v8 = vld [vmem:[%s377_s20] sm:$0xff]  ;;  %v4384_v12 = vld [vmem:[%s4913_s28 + $0x8] sm:$0xff]  ;;  %v4385_v14 = vld [vmem:[%s4913_s28 + $0x10] sm:$0xff] }
  0x17   : >> { %v4407_v9 = vld [vmem:[%s4913_s28 + $0x40] sm:$0xff]  ;;  %v4410_v15 = vld [vmem:[%s4913_s28 + $0x58] sm:$0xff]  ;;  %v4412_v19 = vld [vmem:[%s4913_s28 + $0x68] sm:$0xff] }
  0x18   : >> { %934 = vmatpush.bf16.msra.mxu2 %v4418_v3  ;;  %v4383_v10 = vld [vmem:[%s4913_s28] sm:$0xff]  ;;  %v4386_v16 = vld [vmem:[%s4913_s28 + $0x18] sm:$0xff]  ;;  %v4388_v20 = vld [vmem:[%s4913_s28 + $0x28] sm:$0xff] }
  0x19   : >> { %483 = vmatpush.bf16.msra.mxu0 %v4395_v4  ;;  %v4411_v17 = vld [vmem:[%s4913_s28 + $0x60] sm:$0xff]  ;;  %v4413_v21 = vld [vmem:[%s4913_s28 + $0x70] sm:$0xff]  ;;  %v4414_v23 = vld [vmem:[%s4913_s28 + $0x78] sm:$0xff] }
  0x1a   : >> { %v4387_v18 = vld [vmem:[%s4913_s28 + $0x20] sm:$0xff]  ;;  %v4389_v22 = vld [vmem:[%s4913_s28 + $0x30] sm:$0xff]  ;;  %v4390_v24 = vld [vmem:[%s4913_s28 + $0x38] sm:$0xff] }
  0x1b   : >> { %v4428_v62 = vld [vmem:[%s5013_s9 + $0x78] sm:$0xff]  ;;  %v4427_v63 = vld [vmem:[%s5013_s9 + $0x70] sm:$0xff]  ;;  %v4233_v0 = vld [vmem:[%s6438_s4 + $0x2e0] sm:$0xf] (%p351_p5) }
  0x1c   : >> { %935 = vmatpush.bf16.msra.mxu2 %v4417_v5  ;;  %1164 = vmatpush.bf16.msra.mxu3 %v4428_v62  ;;  %v4426_v5 = vld [vmem:[%s5013_s9 + $0x68] sm:$0xff] }
  0x1d   : >> { %484 = vmatpush.bf16.msra.mxu0 %v4394_v6  ;;  %v4425_v6 = vld [vmem:[%s5013_s9 + $0x60] sm:$0xff] }
  0x20   : >> { %936 = vmatpush.bf16.msra.mxu2 %v4416_v7  ;;  %1165 = vmatpush.bf16.msra.mxu3 %v4427_v63 }
  0x21   : >> { %485 = vmatpush.bf16.msra.mxu0 %v4393_v8 }
  0x23   : >> { %3675 = vmatmul.msk.bf16.vlgmr.msra.gmra.mxu2 %vm453_vm0, %v4407_v9 }
  0x24   : >> { %3558 = vmatmul.msk.bf16.vlgmr.msra.gmra.mxu0 %vm453_vm0, %v4383_v10  ;;  %1166 = vmatpush.bf16.msra.mxu3 %v4426_v5 }
  0x28   : >> { %1167 = vmatpush.bf16.msra.mxu3 %v4425_v6 }
  0x33   : >> { %3676 = vmatmul.msk.bf16.gmra.mxu2 %vm453_vm0, %v4408_v11  ;;  %v4424_v11 = vld [vmem:[%s5013_s9 + $0x58] sm:$0xff] }
  0x34   : >> { %3559 = vmatmul.msk.bf16.gmra.mxu0 %vm453_vm0, %v4384_v12  ;;  %1168 = vmatpush.bf16.msra.mxu3 %v4424_v11 }
  0x43   : >> { %3677 = vmatmul.msk.bf16.gmra.mxu2 %vm453_vm0, %v4409_v13  ;;  %v4423_v13 = vld [vmem:[%s5013_s9 + $0x50] sm:$0xff] }
  0x44   : >> { %3560 = vmatmul.msk.bf16.gmra.mxu0 %vm453_vm0, %v4385_v14  ;;  %1169 = vmatpush.bf16.msra.mxu3 %v4423_v13 }
  0x53   : >> { %3678 = vmatmul.msk.bf16.gmra.mxu2 %vm453_vm0, %v4410_v15 }
  0x54   : >> { %3561 = vmatmul.msk.bf16.gmra.mxu0 %vm453_vm0, %v4386_v16  ;;  %v4405_v16 = vld [vmem:[%s5013_s9 + $0x38] sm:$0xff] }
  0x55   : >> { %713 = vmatpush.bf16.msra.mxu1 %v4405_v16 }
  0x63   : >> { %3679 = vmatmul.msk.bf16.gmra.mxu2 %vm453_vm0, %v4411_v17  ;;  %v4422_v17 = vld [vmem:[%s5013_s9 + $0x48] sm:$0xff] }
  0x64   : >> { %3562 = vmatmul.msk.bf16.gmra.mxu0 %vm453_vm0, %v4387_v18  ;;  %1170 = vmatpush.bf16.msra.mxu3 %v4422_v17 }
  0x73   : >> { %3680 = vmatmul.msk.bf16.gmra.mxu2 %vm453_vm0, %v4412_v19 }
  0x74   : >> { %3563 = vmatmul.msk.bf16.gmra.mxu0 %vm453_vm0, %v4388_v20  ;;  %v4404_v20 = vld [vmem:[%s5013_s9 + $0x30] sm:$0xff] }
  0x75   : >> { %714 = vmatpush.bf16.msra.mxu1 %v4404_v20 }
  0x83   : >> { %3681 = vmatmul.msk.bf16.gmra.mxu2 %vm453_vm0, %v4413_v21  ;;  %v4421_v21 = vld [vmem:[%s5013_s9 + $0x40] sm:$0xff] }
  0x84   : >> { %3564 = vmatmul.msk.bf16.gmra.mxu0 %vm453_vm0, %v4389_v22  ;;  %1171 = vmatpush.bf16.msra.mxu3 %v4421_v21 }
  0x93   : >> { %3682 = vmatmul.msk.bf16.gmra.mxu2 %vm453_vm0, %v4414_v23 }
  0x94   : >> { %3565 = vmatmul.msk.bf16.gmra.mxu0 %vm453_vm0, %v4390_v24  ;;  %v4403_v24 = vld [vmem:[%s5013_s9 + $0x28] sm:$0xff] }
  0x95   : >> { %715 = vmatpush.bf16.msra.mxu1 %v4403_v24 }
  0xa1   : >> { %v487_v25 = vpop.f32.mrf.mxu0 }
  0xa2   : >> { %v4959_v33 = vadd.f32 %v487_v25, %v4948_v26 }
  0xa6   : >> { %v938_v27 = vpop.f32.mrf.mxu2 }
  0xa7   : >> { %v4951_v28 = vadd.f32 %v938_v27, %v4948_v26 }
  0xa9   : >> { %978 = vmax.xlane.f32.xlu0 %v4951_v28  ;;  %v489_v29 = vpop.f32.mrf.mxu0 }
  0xaa   : >> { %v4971_v41 = vadd.f32 %v489_v29, %v4948_v26  ;;  %v4402_v29 = vld [vmem:[%s5013_s9 + $0x20] sm:$0xff] }
  0xab   : >> { %716 = vmatpush.bf16.msra.mxu1 %v4402_v29 }
  0xae   : >> { %v940_v30 = vpop.f32.mrf.mxu2 }
  0xaf   : >> { %v4955_v31 = vadd.f32 %v940_v30, %v4948_v26 }
  0xb1   : >> { %980 = vmax.xlane.f32.xlu0 %v4955_v31  ;;  %v492_v32 = vpop.f32.mrf.mxu0 }
  0xb2   : >> { %v4979_v44 = vadd.f32 %v492_v32, %v4948_v26 }
  0xb6   : >> { %v943_v34 = vpop.f32.mrf.mxu2 }
  0xb7   : >> { %v4962_v35 = vadd.f32 %v943_v34, %v4948_v26  ;;  %v4401_v34 = vld [vmem:[%s5013_s9 + $0x18] sm:$0xff] }
  0xb8   : >> { %717 = vmatpush.bf16.msra.mxu1 %v4401_v34 }
  0xb9   : >> { %982 = vmax.xlane.f32.xlu1 %v4962_v35  ;;  %527 = vmax.xlane.f32.xlu0 %v4959_v33  ;;  %v494_v36 = vpop.f32.mrf.mxu0 }
  0xba   : >> { %v4991_v52 = vadd.f32 %v494_v36, %v4948_v26 }
  0xbe   : >> { %v945_v37 = vpop.f32.mrf.mxu2 }
  0xbf   : >> { %v4967_v38 = vadd.f32 %v945_v37, %v4948_v26 }
  0xc1   : >> { %984 = vmax.xlane.f32.xlu1 %v4967_v38  ;;  %v497_v39 = vpop.f32.mrf.mxu0 }
  0xc2   : >> { %v4999_v56 = vadd.f32 %v497_v39, %v4948_v26 }
  0xc6   : >> { %v948_v40 = vpop.f32.mrf.mxu2 }
  0xc7   : >> { %v4974_v42 = vadd.f32 %v948_v40, %v4948_v26  ;;  %v4400_v40 = vld [vmem:[%s5013_s9 + $0x10] sm:$0xff] }
  0xc8   : >> { %718 = vmatpush.bf16.msra.mxu1 %v4400_v40 }
  0xc9   : >> { %986 = vmax.xlane.f32.xlu2 %v4974_v42  ;;  %529 = vmax.xlane.f32.xlu1 %v4971_v41  ;;  %v499_v43 = vpop.f32.mrf.mxu0 }
  0xca   : >> { %v5016_v60 = vadd.f32 %v499_v43, %v4948_v26 }
  0xce   : >> { %v950_v45 = vpop.f32.mrf.mxu2 }
  0xcf   : >> { %v4982_v46 = vadd.f32 %v950_v45, %v4948_v26 }
  0xd1   : >> { %988 = vmax.xlane.f32.xlu2 %v4982_v46  ;;  %531 = vmax.xlane.f32.xlu1 %v4979_v44  ;;  %v502_v47 = vpop.f32.mrf.mxu0 }
  0xd2   : >> { %v5026_v2 = vadd.f32 %v502_v47, %v4948_v26 }
  0xd6   : >> { %v953_v48 = vpop.f32.mrf.mxu2 }
  0xd7   : >> { %v4987_v49 = vadd.f32 %v953_v48, %v4948_v26 }
  0xd9   : >> { %990 = vmax.xlane.f32.xlu2 %v4987_v49  ;;  %v504_v50 = vpop.f32.mrf.mxu0 }
  0xda   : >> { %v5036_v8 = vadd.f32 %v504_v50, %v4948_v26  ;;  %v4399_v50 = vld [vmem:[%s5013_s9 + $0x8] sm:$0xff] }
  0xdb   : >> { %719 = vmatpush.bf16.msra.mxu1 %v4399_v50 }
  0xde   : >> { %v955_v51 = vpop.f32.mrf.mxu2 }
  0xdf   : >> { %v4994_v53 = vadd.f32 %v955_v51, %v4948_v26 }
  0xe1   : >> { %533 = vmax.xlane.f32.xlu2 %v4991_v52  ;;  %992 = vmax.xlane.f32.xlu0 %v4994_v53  ;;  %v507_v54 = vpop.f32.mrf.mxu0 }
  0xe2   : >> { %v5046_v14 = vadd.f32 %v507_v54, %v4948_v26 }
  0xe6   : >> { %v958_v55 = vpop.f32.mrf.mxu2 }
  0xe7   : >> { %v5002_v57 = vadd.f32 %v958_v55, %v4948_v26 }
  0xe9   : >> { %535 = vmax.xlane.f32.xlu2 %v4999_v56  ;;  %994 = vmax.xlane.f32.xlu0 %v5002_v57  ;;  %v509_v59 = vpop.f32.mrf.mxu0 }
  0xea   : >> { %v5058_v22 = vadd.f32 %v509_v59, %v4948_v26  ;;  %v4398_v59 = vld [vmem:[%s5013_s9] sm:$0xff] }
  0xeb   : >> { %720 = vmatpush.bf16.msra.mxu1 %v4398_v59 }
  0xee   : >> { %v960_v58 = vpop.f32.mrf.mxu2 }
  0xef   : >> { %v5019_v61 = vadd.f32 %v960_v58, %v4948_v26 }
  0xf1   : >> { %996 = vmax.xlane.f32.xlu1 %v5019_v61  ;;  %537 = vmax.xlane.f32.xlu0 %v5016_v60  ;;  %v512_v4 = vpop.f32.mrf.mxu0 }
  0xf2   : >> { %v5068_v30 = vadd.f32 %v512_v4, %v4948_v26 }
  0xf6   : >> { %v963_v1 = vpop.f32.mrf.mxu2 }
  0xf7   : >> { %v5029_v3 = vadd.f32 %v963_v1, %v4948_v26 }
  0xf9   : >> { %998 = vmax.xlane.f32.xlu1 %v5029_v3  ;;  %539 = vmax.xlane.f32.xlu0 %v5026_v2  ;;  %v514_v10 = vpop.f32.mrf.mxu0 }
  0xfa   : >> { %v5084_v45 = vadd.f32 %v514_v10, %v4948_v26 }
  0xfe   : >> { %v965_v7 = vpop.f32.mrf.mxu2 }
  0xff   : >> { %v5039_v9 = vadd.f32 %v965_v7, %v4948_v26 }
 0x101   : >> { %1000 = vmax.xlane.f32.xlu2 %v5039_v9  ;;  %541 = vmax.xlane.f32.xlu1 %v5036_v8  ;;  %v517_v18 = vpop.f32.mrf.mxu0 }
 0x106   : >> { %v968_v12 = vpop.f32.mrf.mxu2 }
 0x107   : >> { %v5049_v15 = vadd.f32 %v968_v12, %v4948_v26 }
 0x109   : >> { %1002 = vmax.xlane.f32.xlu2 %v5049_v15  ;;  %543 = vmax.xlane.f32.xlu1 %v5046_v14  ;;  %v519_v27 = vpop.f32.mrf.mxu0 }
 0x10a   : >> { %v5077_v37 = vadd.f32 %v519_v27, %v4948_v26 }
 0x10e   : >> { %v970_v19 = vpop.f32.mrf.mxu2 }
 0x10f   : >> { %v5061_v23 = vadd.f32 %v970_v19, %v4948_v26 }
 0x111   : >> { %545 = vmax.xlane.f32.xlu2 %v5058_v22  ;;  %1004 = vmax.xlane.f32.xlu0 %v5061_v23  ;;  %v522_v48 = vpop.f32.mrf.mxu0 }
 0x112   : >> { %v5093_v58 = vadd.f32 %v522_v48, %v4948_v26 }
 0x116   : >> { %v973_v25 = vpop.f32.mrf.mxu2 }
 0x117   : >> { %v5071_v32 = vadd.f32 %v973_v25, %v4948_v26 }
 0x119   : >> { %547 = vmax.xlane.f32.xlu2 %v5068_v30  ;;  %1006 = vmax.xlane.f32.xlu0 %v5071_v32  ;;  %v524_v63 = vpop.f32.mrf.mxu0 }
 0x11a   : >> { %v5103_v5 = vadd.f32 %v524_v63, %v4948_v26 }
 0x11c   : >> { %v979_v36 = vpop.xlane.xlu0 %978 }
 0x11d   : >> { %v1010_v47 = vsub.f32 %v4951_v28, %v979_v36  ;;  %v5097_v28 = vadd.f32 %v517_v18, %v4948_v26 }
 0x11e   : >> { %v975_v39 = vpop.f32.mrf.mxu2 }
 0x11f   : >> { %v5081_v43 = vadd.f32 %v975_v39, %v4948_v26  ;;  %v1026_v51 = vmul.f32 1.442695, %v1010_v47 }
 0x121   : >> { %553 = vmax.xlane.f32.xlu2 %v5077_v37  ;;  %1008 = vmax.xlane.f32.xlu1 %v5081_v43  ;;  %4623 = vpow2.f32 %v1026_v51 }
 0x122   : >> { %549 = vmax.xlane.f32.xlu0 %v5084_v45 }
 0x124   : >> { %v981_v54 = vpop.xlane.xlu0 %980 }
 0x125   : >> { %v1011_v55 = vsub.f32 %v4955_v31, %v981_v54 }
 0x127   : >> { %v1028_v62 = vmul.f32 1.442695, %v1011_v55  ;;  %v4624_v6 = vpop.eup %4623 }
 0x129   : >> { %4625 = vpow2.f32 %v1028_v62  ;;  %551 = vmax.xlane.f32.xlu1 %v5097_v28 }
 0x12a   : >> { %555 = vmax.xlane.f32.xlu0 %v5093_v58 }
 0x12c   : >> { %v983_v1 = vpop.xlane.xlu1 %982  ;;  %v528_v4 = vpop.xlane.xlu0 %527 }
 0x12d   : >> { %v559_v31 = vsub.f32 %v4959_v33, %v528_v4  ;;  %v1012_v11 = vsub.f32 %v4962_v35, %v983_v1 }
 0x12f   : >> { %v4626_v7 = vpop.eup %4625  ;;  %v575_v10 = vmul.f32 1.442695, %v559_v31  ;;  %v1030_v13 = vmul.f32 1.442695, %v1012_v11 }
 0x130   : >> { %v1090_v12 = vpack.c.bf16 %v4626_v7, %v4624_v6 }
 0x131   : >> { %557 = vmax.xlane.f32.xlu1 %v5103_v5  ;;  %4627 = vpow2.f32 %v575_v10 }
 0x132   : >> { %1172 = vmatmul.bf16.vlgmr.msra.gmra.mxu3 %v1090_v12  ;;  %4629 = vpow2.f32 %v1030_v13 }
 0x134   : >> { %v985_v16 = vpop.xlane.xlu1 %984 }
 0x135   : >> { %v1013_v17 = vsub.f32 %v4967_v38, %v985_v16 }
 0x137   : >> { %v1032_v18 = vmul.f32 1.442695, %v1013_v17  ;;  %v4628_v19 = vpop.eup %4627 }
 0x138   : >> { %607 = vadd.xlane.f32.xlu2 %v4628_v19  ;;  %v4630_v21 = vpop.eup %4629 }
 0x139   : >> { %4631 = vpow2.f32 %v1032_v18 }
 0x13c   : >> { %v987_v26 = vpop.xlane.xlu2 %986  ;;  %v530_v33 = vpop.xlane.xlu1 %529 }
 0x13d   : >> { %v560_v20 = vsub.f32 %v4971_v41, %v530_v33  ;;  %v1014_v25 = vsub.f32 %v4974_v42, %v987_v26 }
 0x13f   : >> { %v5109_v35 = vpop.eup %4631  ;;  %v577_v24 = vmul.f32 1.442695, %v560_v20  ;;  %v1034_v38 = vmul.f32 1.442695, %v1014_v25 }
 0x140   : >> { %v1091_v27 = vpack.c.bf16 %v5109_v35, %v4630_v21  ;;  %1058 = vadd.xlane.f32.xlu2 %v4624_v6 }
 0x141   : >> { %4633 = vpow2.f32 %v577_v24 }
 0x142   : >> { %1177 = vmatmul.bf16.gmra.mxu3 %v1091_v27  ;;  %4635 = vpow2.f32 %v1034_v38 }
 0x144   : >> { %v989_v29 = vpop.xlane.xlu2 %988  ;;  %v532_v34 = vpop.xlane.xlu1 %531 }
 0x145   : >> { %v1015_v36 = vsub.f32 %v4982_v46, %v989_v29  ;;  %v561_v39 = vsub.f32 %v4979_v44, %v532_v34 }
 0x147   : >> { %v1036_v40 = vmul.f32 1.442695, %v1015_v36  ;;  %v579_v41 = vmul.f32 1.442695, %v561_v39  ;;  %v4634_v47 = vpop.eup %4633 }
 0x148   : >> { %609 = vadd.xlane.f32.xlu0 %v4634_v47  ;;  %v639_v48 = vpack.c.bf16 %v4634_v47, %v4628_v19  ;;  %v4636_v50 = vpop.eup %4635 }
 0x149   : >> { %4637 = vpow2.f32 %v1036_v40 }
 0x14a   : >> { %4639 = vpow2.f32 %v579_v41  ;;  %721 = vmatmul.bf16.vlgmr.msra.gmra.mxu1 %v639_v48 }
 0x14c   : >> { %v991_v42 = vpop.xlane.xlu2 %990 }
 0x14d   : >> { %v1016_v55 = vsub.f32 %v4987_v49, %v991_v42 }
 0x14f   : >> { %v5115_v51 = vpop.eup %4637  ;;  %v1038_v44 = vmul.f32 1.442695, %v1016_v55 }
 0x150   : >> { %v4640_v54 = vpop.eup %4639  ;;  %v1092_v46 = vpack.c.bf16 %v5115_v51, %v4636_v50  ;;  %1060 = vadd.xlane.f32.xlu0 %v4626_v7 }
 0x151   : >> { %611 = vadd.xlane.f32.xlu1 %v4640_v54  ;;  %4641 = vpow2.f32 %v1038_v44 }
 0x152   : >> { %1182 = vmatmul.bf16.gmra.mxu3 %v1092_v46 }
 0x154   : >> { %v534_v59 = vpop.xlane.xlu2 %533  ;;  %v993_v62 = vpop.xlane.xlu0 %992 }
 0x155   : >> { %v562_v63 = vsub.f32 %v4991_v52, %v534_v59  ;;  %v1017_v1 = vsub.f32 %v4994_v53, %v993_v62 }
 0x157   : >> { %v581_v4 = vmul.f32 1.442695, %v562_v63  ;;  %v1040_v31 = vmul.f32 1.442695, %v1017_v1  ;;  %v4642_v11 = vpop.eup %4641 }
 0x159   : >> { %4643 = vpow2.f32 %v581_v4  ;;  %1062 = vadd.xlane.f32.xlu1 %v4630_v21 }
 0x15a   : >> { %4645 = vpow2.f32 %v1040_v31 }
 0x15c   : >> { %v536_v6 = vpop.xlane.xlu2 %535  ;;  %v995_v49 = vpop.xlane.xlu0 %994 }
 0x15d   : >> { %v563_v10 = vsub.f32 %v4999_v56, %v536_v6  ;;  %v1018_v16 = vsub.f32 %v5002_v57, %v995_v49 }
 0x15f   : >> { %v4644_v7 = vpop.eup %4643  ;;  %v583_v12 = vmul.f32 1.442695, %v563_v10  ;;  %v1042_v17 = vmul.f32 1.442695, %v1018_v16 }
 0x160   : >> { %v5122_v13 = vpop.eup %4645  ;;  %613 = vadd.xlane.f32.xlu2 %v4644_v7  ;;  %v640_v52 = vpack.c.bf16 %v4644_v7, %v4640_v54 }
 0x161   : >> { %4647 = vpow2.f32 %v583_v12  ;;  %v1093_v53 = vpack.c.bf16 %v5122_v13, %v4642_v11 }
 0x162   : >> { %726 = vmatmul.bf16.gmra.mxu1 %v640_v52  ;;  %4649 = vpow2.f32 %v1042_v17 }
 0x163   : >> { %1187 = vmatmul.bf16.gmra.mxu3 %v1093_v53 }
 0x164   : >> { %v997_v18 = vpop.xlane.xlu1 %996  ;;  %v538_v19 = vpop.xlane.xlu0 %537 }
 0x165   : >> { %v1019_v26 = vsub.f32 %v5019_v61, %v997_v18  ;;  %v564_v56 = vsub.f32 %v5016_v60, %v538_v19 }
 0x167   : >> { %v4648_v33 = vpop.eup %4647  ;;  %v1044_v20 = vmul.f32 1.442695, %v1019_v26  ;;  %v585_v21 = vmul.f32 1.442695, %v564_v56 }
 0x168   : >> { %615 = vadd.xlane.f32.xlu0 %v4648_v33  ;;  %1064 = vadd.xlane.f32.xlu2 %v5109_v35  ;;  %v5130_v27 = vpop.eup %4649 }
 0x169   : >> { %4651 = vpow2.f32 %v1044_v20 }
 0x16a   : >> { %4653 = vpow2.f32 %v585_v21 }
 0x16c   : >> { %v999_v57 = vpop.xlane.xlu1 %998  ;;  %v540_v24 = vpop.xlane.xlu0 %539 }
 0x16d   : >> { %v565_v25 = vsub.f32 %v5026_v2, %v540_v24  ;;  %v1020_v60 = vsub.f32 %v5029_v3, %v999_v57 }
 0x16f   : >> { %v4652_v38 = vpop.eup %4651  ;;  %v587_v29 = vmul.f32 1.442695, %v565_v25  ;;  %v1046_v35 = vmul.f32 1.442695, %v1020_v60 }
 0x170   : >> { %v4654_v61 = vpop.eup %4653  ;;  %1066 = vadd.xlane.f32.xlu0 %v4636_v50  ;;  %v1094_v34 = vpack.c.bf16 %v4652_v38, %v5130_v27 }
 0x171   : >> { %617 = vadd.xlane.f32.xlu1 %v4654_v61  ;;  %v641_v36 = vpack.c.bf16 %v4654_v61, %v4648_v33  ;;  %4655 = vpow2.f32 %v587_v29 }
 0x172   : >> { %4657 = vpow2.f32 %v1046_v35 }
 0x173   : >> { %731 = vmatmul.bf16.gmra.mxu1 %v641_v36  ;;  %1192 = vmatmul.bf16.gmra.mxu3 %v1094_v34 }
 0x174   : >> { %v1001_v39 = vpop.xlane.xlu2 %1000  ;;  %v542_v40 = vpop.xlane.xlu1 %541 }
 0x175   : >> { %v1021_v2 = vsub.f32 %v5039_v9, %v1001_v39  ;;  %v566_v41 = vsub.f32 %v5036_v8, %v542_v40 }
 0x177   : >> { %v1048_v47 = vmul.f32 1.442695, %v1021_v2  ;;  %v589_v48 = vmul.f32 1.442695, %v566_v41  ;;  %v4656_v42 = vpop.eup %4655 }
 0x178   : >> { %619 = vadd.xlane.f32.xlu2 %v4656_v42  ;;  %v4658_v55 = vpop.eup %4657 }
 0x179   : >> { %4659 = vpow2.f32 %v1048_v47  ;;  %1068 = vadd.xlane.f32.xlu1 %v5115_v51 }
 0x17a   : >> { %4661 = vpow2.f32 %v589_v48 }
 0x17c   : >> { %v1003_v3 = vpop.xlane.xlu2 %1002  ;;  %v544_v50 = vpop.xlane.xlu1 %543 }
 0x17d   : >> { %v567_v54 = vsub.f32 %v5046_v14, %v544_v50  ;;  %v1022_v8 = vsub.f32 %v5049_v15, %v1003_v3 }
 0x17f   : >> { %v5138_v46 = vpop.eup %4659  ;;  %v591_v44 = vmul.f32 1.442695, %v567_v54  ;;  %v1050_v51 = vmul.f32 1.442695, %v1022_v8 }
 0x180   : >> { %v4662_v9 = vpop.eup %4661  ;;  %v1095_v59 = vpack.c.bf16 %v5138_v46, %v4658_v55  ;;  %1070 = vadd.xlane.f32.xlu2 %v4642_v11 }
 0x181   : >> { %621 = vadd.xlane.f32.xlu0 %v4662_v9  ;;  %v642_v62 = vpack.c.bf16 %v4662_v9, %v4656_v42  ;;  %4663 = vpow2.f32 %v591_v44 }
 0x182   : >> { %4665 = vpow2.f32 %v1050_v51 }
 0x183   : >> { %736 = vmatmul.bf16.gmra.mxu1 %v642_v62  ;;  %1197 = vmatmul.bf16.gmra.mxu3 %v1095_v59 }
 0x184   : >> { %v546_v63 = vpop.xlane.xlu2 %545  ;;  %v1005_v1 = vpop.xlane.xlu0 %1004 }
 0x185   : >> { %v568_v14 = vsub.f32 %v5058_v22, %v546_v63  ;;  %v1023_v4 = vsub.f32 %v5061_v23, %v1005_v1 }
 0x187   : >> { %v593_v31 = vmul.f32 1.442695, %v568_v14  ;;  %v1052_v6 = vmul.f32 1.442695, %v1023_v4  ;;  %v4664_v49 = vpop.eup %4663 }
 0x188   : >> { %623 = vadd.xlane.f32.xlu1 %v4664_v49  ;;  %1076 = vadd.xlane.f32.xlu2 %v4652_v38  ;;  %v4666_v7 = vpop.eup %4665 }
 0x189   : >> { %4667 = vpow2.f32 %v593_v31  ;;  %1072 = vadd.xlane.f32.xlu0 %v5122_v13 }
 0x18a   : >> { %4669 = vpow2.f32 %v1052_v6 }
 0x18c   : >> { %v548_v15 = vpop.xlane.xlu2 %547  ;;  %v1007_v10 = vpop.xlane.xlu0 %1006 }
 0x18d   : >> { %v569_v11 = vsub.f32 %v5068_v30, %v548_v15  ;;  %v1024_v23 = vsub.f32 %v5071_v32, %v1007_v10 }
 0x18f   : >> { %v4668_v12 = vpop.eup %4667  ;;  %v595_v16 = vmul.f32 1.442695, %v569_v11  ;;  %v1054_v17 = vmul.f32 1.442695, %v1024_v23 }
 0x190   : >> { %v4670_v22 = vpop.eup %4669  ;;  %v643_v52 = vpack.c.bf16 %v4668_v12, %v4664_v49  ;;  %1074 = vadd.xlane.f32.xlu1 %v5130_v27 }
 0x191   : >> { %4671 = vpow2.f32 %v595_v16  ;;  %625 = vadd.xlane.f32.xlu0 %v4668_v12  ;;  %v1096_v53 = vpack.c.bf16 %v4670_v22, %v4666_v7 }
 0x192   : >> { %4673 = vpow2.f32 %v1054_v17 }
 0x193   : >> { %741 = vmatmul.bf16.gmra.mxu1 %v643_v52  ;;  %1202 = vmatmul.bf16.gmra.mxu3 %v1096_v53 }
 0x194   : >> { %v1009_v13 = vpop.xlane.xlu1 %1008  ;;  %v554_v56 = vpop.xlane.xlu2 %553 }
 0x195   : >> { %v1025_v18 = vsub.f32 %v5081_v43, %v1009_v13  ;;  %v550_v19 = vpop.xlane.xlu0 %549  ;;  %v572_v32 = vsub.f32 %v5077_v37, %v554_v56 }
 0x196   : >> { %v570_v30 = vsub.f32 %v5084_v45, %v550_v19 }
 0x197   : >> { %v4672_v26 = vpop.eup %4671  ;;  %v1056_v33 = vmul.f32 1.442695, %v1025_v18  ;;  %v601_v24 = vmul.f32 1.442695, %v572_v32 }
 0x198   : >> { %v597_v20 = vmul.f32 1.442695, %v570_v30  ;;  %627 = vadd.xlane.f32.xlu1 %v4672_v26  ;;  %v4674_v25 = vpop.eup %4673 }
 0x199   : >> { %1078 = vadd.xlane.f32.xlu0 %v4658_v55  ;;  %4675 = vpow2.f32 %v1056_v33 }
 0x19a   : >> { %4677 = vpow2.f32 %v597_v20 }
 0x19c   : >> { %v552_v21 = vpop.xlane.xlu1 %551 }
 0x19d   : >> { %v571_v57 = vsub.f32 %v5097_v28, %v552_v21  ;;  %v556_v38 = vpop.xlane.xlu0 %555 }
 0x19e   : >> { %v573_v37 = vsub.f32 %v5093_v58, %v556_v38 }
 0x19f   : >> { %v599_v43 = vmul.f32 1.442695, %v571_v57  ;;  %v4676_v27 = vpop.eup %4675 }
 0x1a0   : >> { %v4678_v45 = vpop.eup %4677  ;;  %1080 = vadd.xlane.f32.xlu1 %v5138_v46  ;;  %v1097_v29 = vpack.c.bf16 %v4676_v27, %v4674_v25  ;;  %v603_v28 = vmul.f32 1.442695, %v573_v37 }
 0x1a1   : >> { %4679 = vpow2.f32 %v599_v43  ;;  %629 = vadd.xlane.f32.xlu2 %v4678_v45  ;;  %v644_v61 = vpack.c.bf16 %v4678_v45, %v4672_v26 }
 0x1a2   : >> { %4681 = vpow2.f32 %v601_v24 }
 0x1a3   : >> { %1207 = vmatmul.bf16.gmra.mxu3 %v1097_v29  ;;  %746 = vmatmul.bf16.gmra.mxu1 %v644_v61  ;;  %4683 = vpow2.f32 %v603_v28 }
 0x1a4   : >> { %v558_v60 = vpop.xlane.xlu1 %557 }
 0x1a5   : >> { %v574_v35 = vsub.f32 %v5103_v5, %v558_v60 }
 0x1a7   : >> { %v4680_v34 = vpop.eup %4679  ;;  %v605_v39 = vmul.f32 1.442695, %v574_v35 }
 0x1a8   : >> { %v4682_v36 = vpop.eup %4681  ;;  %631 = vadd.xlane.f32.xlu0 %v4680_v34 }
 0x1a9   : >> { %633 = vadd.xlane.f32.xlu1 %v4682_v36  ;;  %1082 = vadd.xlane.f32.xlu2 %v4666_v7  ;;  %v4684_v40 = vpop.eup %4683  ;;  %4685 = vpow2.f32 %v605_v39  ;;  %v645_v2 = vpack.c.bf16 %v4682_v36, %v4680_v34 }
 0x1ab   : >> { %v608_v58 = vpop.xlane.xlu2 %607 }
 0x1af   : >> { %v4686_v47 = vpop.eup %4685 }
 0x1b0   : >> { %1084 = vadd.xlane.f32.xlu0 %v4670_v22  ;;  %v646_v5 = vpack.c.bf16 %v4686_v47, %v4684_v40 }
 0x1b1   : >> { %1086 = vadd.xlane.f32.xlu1 %v4674_v25  ;;  %635 = vadd.xlane.f32.xlu2 %v4684_v40 }
 0x1b3   : >> { %751 = vmatmul.bf16.gmra.mxu1 %v645_v2  ;;  %v1059_v42 = vpop.xlane.xlu2 %1058 }
 0x1b4   : >> { %4687 = vrcp.f32 %v1059_v42 }
 0x1b5   : >> { %v1173_v41 = vpop.f32.mrf.mxu3  ;;  %4689 = vrcp.f32 %v608_v58 }
 0x1b8   : >> { %637 = vadd.xlane.f32.xlu0 %v4686_v47 }
 0x1b9   : >> { %1088 = vadd.xlane.f32.xlu2 %v4676_v27 }
 0x1ba   : >> { %v4688_v55 = vpop.eup %4687 }
 0x1bb   : >> { %v610_v48 = vpop.xlane.xlu0 %609  ;;  %v1229_v44 = vmul.f32 %v4688_v55, %v1173_v41  ;;  %v4690_v8 = vpop.eup %4689 }
 0x1bd   : >> { %v1175_v3 = vpop.f32.mrf.mxu3  ;;  %v1245_v62 = vpack.c.bf16 %v1229_v44, %v1229_v44 }
 0x1bf   : >> { %v1317_v6 = vunpack.c.l.b16 %v1245_v62 }
 0x1c3   : >> { %756 = vmatmul.bf16.gmra.mxu1 %v646_v5  ;;  %v1061_v50 = vpop.xlane.xlu0 %1060 }
 0x1c4   : >> { %4691 = vrcp.f32 %v1061_v50  ;;  %v612_v9 = vpop.xlane.xlu1 %611 }
 0x1c5   : >> { %v1178_v54 = vpop.f32.mrf.mxu3  ;;  %4693 = vrcp.f32 %v610_v48 }
 0x1c7   : >> { %v722_v46 = vpop.f32.mrf.mxu1 }
 0x1c8   : >> { %v778_v51 = vmul.f32 %v4690_v8, %v722_v46 }
 0x1ca   : >> { %v4692_v59 = vpop.eup %4691  ;;  %v794_v49 = vpack.c.bf16 %v778_v51, %v778_v51 }
 0x1cb   : >> { %v1230_v1 = vmul.f32 %v4692_v59, %v1175_v3  ;;  %v4694_v4 = vpop.eup %4693 }
 0x1cc   : >> { %v1063_v11 = vpop.xlane.xlu1 %1062  ;;  %v5155_v22 = vunpack.c.l.b16 %v794_v49 }
 0x1cd   : >> { %v1180_v63 = vpop.f32.mrf.mxu3  ;;  %v1246_v14 = vpack.c.bf16 %v1230_v1, %v1230_v1  ;;  %4695 = vrcp.f32 %v1063_v11 }
 0x1cf   : >> { %v724_v31 = vpop.f32.mrf.mxu1  ;;  %v1318_v10 = vunpack.c.l.b16 %v1246_v14 }
 0x1d0   : >> { %v779_v15 = vmul.f32 %v4694_v4, %v724_v31 }
 0x1d1   : >> { %v1333_v16 = vpack.c.b16 %v1318_v10, %v1317_v6 }
 0x1d2   : >> { %v795_v7 = vpack.c.bf16 %v779_v15, %v779_v15 }
 0x1d3   : >> { %v614_v12 = vpop.xlane.xlu2 %613  ;;  %1341 = vrot.lane.b32.xlu1 %v1333_v16, %s4816_s10  ;;  %v4696_v18 = vpop.eup %4695 }
 0x1d4   : >> { %v5157_v52 = vunpack.c.l.b16 %v795_v7  ;;  %v1231_v26 = vmul.f32 %v4696_v18, %v1178_v54 }
 0x1d5   : >> { %v1183_v23 = vpop.f32.mrf.mxu3 }
 0x1d6   : >> { %v1293_v53 = vpack.c.b16 %v5157_v52, %v5155_v22  ;;  %v1247_v32 = vpack.c.bf16 %v1231_v26, %v1231_v26 }
 0x1d8   : >> { %v1319_v45 = vunpack.c.l.b16 %v1247_v32 }
 0x1db   : >> { %v1065_v13 = vpop.xlane.xlu2 %1064  ;;  %v616_v17 = vpop.xlane.xlu0 %615 }
 0x1dc   : >> { %4697 = vrcp.f32 %v1065_v13 }
 0x1dd   : >> { %4699 = vrcp.f32 %v612_v9  ;;  %v1185_v19 = vpop.f32.mrf.mxu3 }
 0x1de   : >> { %4701 = vrcp.f32 %v614_v12 }
 0x1df   : >> { %v727_v30 = vpop.f32.mrf.mxu1 }
 0x1e2   : >> { %v4698_v56 = vpop.eup %4697 }
 0x1e3   : >> { %v4700_v33 = vpop.eup %4699  ;;  %v1232_v20 = vmul.f32 %v4698_v56, %v1180_v63  ;;  %v1067_v24 = vpop.xlane.xlu0 %1066 }
 0x1e4   : >> { %v780_v21 = vmul.f32 %v4700_v33, %v727_v30  ;;  %v618_v57 = vpop.xlane.xlu1 %617  ;;  %v4702_v27 = vpop.eup %4701  ;;  %4703 = vrcp.f32 %v1067_v24 }
 0x1e5   : >> { %v1248_v25 = vpack.c.bf16 %v1232_v20, %v1232_v20 }
 0x1e6   : >> { %v1188_v43 = vpop.f32.mrf.mxu3  ;;  %v796_v61 = vpack.c.bf16 %v780_v21, %v780_v21 }
 0x1e7   : >> { %v729_v38 = vpop.f32.mrf.mxu1  ;;  %v1320_v29 = vunpack.c.l.b16 %v1248_v25 }
 0x1e8   : >> { %v781_v37 = vmul.f32 %v4702_v27, %v729_v38  ;;  %v5163_v28 = vunpack.c.l.b16 %v796_v61 }
 0x1e9   : >> { %v1334_v60 = vpack.c.b16 %v1320_v29, %v1319_v45 }
 0x1ea   : >> { %v797_v34 = vpack.c.bf16 %v781_v37, %v781_v37  ;;  %v4704_v40 = vpop.eup %4703 }
 0x1eb   : >> { %1343 = vrot.lane.b32.xlu2 %v1334_v60, %s4816_s10  ;;  %v620_v39 = vpop.xlane.xlu2 %619  ;;  %v1233_v47 = vmul.f32 %v4704_v40, %v1183_v23 }
 0x1ec   : >> { %v5165_v36 = vunpack.c.l.b16 %v797_v34  ;;  %v1069_v35 = vpop.xlane.xlu1 %1068 }
 0x1ed   : >> { %4705 = vrcp.f32 %v1069_v35  ;;  %v1249_v54 = vpack.c.bf16 %v1233_v47, %v1233_v47 }
 0x1ee   : >> { %4707 = vrcp.f32 %v616_v17  ;;  %v1294_v2 = vpack.c.b16 %v5165_v36, %v5163_v28  ;;  %v1190_v58 = vpop.f32.mrf.mxu3 }
 0x1ef   : >> { %4709 = vrcp.f32 %v618_v57  ;;  %v1321_v59 = vunpack.c.l.b16 %v1249_v54 }
 0x1f0   : >> { %v732_v41 = vpop.f32.mrf.mxu1 }
 0x1f3   : >> { %v4706_v48 = vpop.eup %4705  ;;  %v1071_v3 = vpop.xlane.xlu2 %1070 }
 0x1f4   : >> { %v4708_v42 = vpop.eup %4707  ;;  %v622_v5 = vpop.xlane.xlu0 %621  ;;  %v1234_v50 = vmul.f32 %v4706_v48, %v1185_v19  ;;  %4711 = vrcp.f32 %v1071_v3 }
 0x1f5   : >> { %v782_v55 = vmul.f32 %v4708_v42, %v732_v41  ;;  %v4710_v9 = vpop.eup %4709  ;;  %4713 = vrcp.f32 %v620_v39 }
 0x1f6   : >> { %v1193_v46 = vpop.f32.mrf.mxu3  ;;  %v1250_v44 = vpack.c.bf16 %v1234_v50, %v1234_v50 }
 0x1f7   : >> { %v798_v51 = vpack.c.bf16 %v782_v55, %v782_v55 }
 0x1f8   : >> { %v734_v8 = vpop.f32.mrf.mxu1  ;;  %v1322_v62 = vunpack.c.l.b16 %v1250_v44 }
 0x1f9   : >> { %v783_v63 = vmul.f32 %v4710_v9, %v734_v8  ;;  %v5170_v6 = vunpack.c.l.b16 %v798_v51 }
 0x1fa   : >> { %v1335_v1 = vpack.c.b16 %v1322_v62, %v1321_v59  ;;  %v4712_v11 = vpop.eup %4711 }
 0x1fb   : >> { %v799_v14 = vpack.c.bf16 %v783_v63, %v783_v63  ;;  %v624_v4 = vpop.xlane.xlu1 %623  ;;  %v1077_v15 = vpop.xlane.xlu2 %1076  ;;  %v1235_v16 = vmul.f32 %v4712_v11, %v1188_v43 }
 0x1fc   : >> { %1345 = vrot.lane.b32.xlu0 %v1335_v1, %s4816_s10  ;;  %v1073_v31 = vpop.xlane.xlu0 %1072  ;;  %4715 = vrcp.f32 %v1077_v15  ;;  %v4714_v23 = vpop.eup %4713 }
 0x1fd   : >> { %v5172_v49 = vunpack.c.l.b16 %v799_v14  ;;  %4717 = vrcp.f32 %v1073_v31  ;;  %v1251_v33 = vpack.c.bf16 %v1235_v16, %v1235_v16 }
 0x1fe   : >> { %v1195_v10 = vpop.f32.mrf.mxu3  ;;  %4719 = vrcp.f32 %v622_v5 }
 0x1ff   : >> { %v1295_v7 = vpack.c.b16 %v5172_v49, %v5170_v6  ;;  %v1323_v27 = vunpack.c.l.b16 %v1251_v33 }
 0x200   : >> { %v737_v12 = vpop.f32.mrf.mxu1 }
 0x201   : >> { %v784_v30 = vmul.f32 %v4714_v23, %v737_v12 }
 0x202   : >> { %v4716_v13 = vpop.eup %4715 }
 0x203   : >> { %v1075_v17 = vpop.xlane.xlu1 %1074  ;;  %v4718_v19 = vpop.eup %4717  ;;  %v1238_v32 = vmul.f32 %v4716_v13, %v1195_v10  ;;  %v800_v24 = vpack.c.bf16 %v784_v30, %v784_v30 }
 0x204   : >> { %v626_v18 = vpop.xlane.xlu0 %625  ;;  %4721 = vrcp.f32 %v1075_v17  ;;  %v1236_v56 = vmul.f32 %v4718_v19, %v1190_v58  ;;  %v4720_v20 = vpop.eup %4719 }
 0x205   : >> { %v1254_v29 = vpack.c.bf16 %v1238_v32, %v1238_v32  ;;  %v5176_v35 = vunpack.c.l.b16 %v800_v24  ;;  %4723 = vrcp.f32 %v624_v4 }
 0x206   : >> { %v1198_v26 = vpop.f32.mrf.mxu3  ;;  %v1252_v57 = vpack.c.bf16 %v1236_v56, %v1236_v56 }
 0x207   : >> { %v1326_v47 = vunpack.c.l.b16 %v1254_v29 }
 0x208   : >> { %v739_v21 = vpop.f32.mrf.mxu1  ;;  %v1324_v38 = vunpack.c.l.b16 %v1252_v57 }
 0x209   : >> { %v785_v25 = vmul.f32 %v4720_v20, %v739_v21 }
 0x20a   : >> { %v4722_v45 = vpop.eup %4721  ;;  %v1336_v37 = vpack.c.b16 %v1324_v38, %v1323_v27 }
 0x20b   : >> { %v801_v43 = vpack.c.bf16 %v785_v25, %v785_v25  ;;  %v628_v61 = vpop.xlane.xlu1 %627  ;;  %v1237_v34 = vmul.f32 %v4722_v45, %v1193_v46  ;;  %v4724_v5 = vpop.eup %4723 }
 0x20c   : >> { %v1079_v60 = vpop.xlane.xlu0 %1078  ;;  %1347 = vrot.lane.b32.xlu2 %v1336_v37, %s4816_s10 }
 0x20d   : >> { %v5178_v39 = vunpack.c.l.b16 %v801_v43  ;;  %v1253_v58 = vpack.c.bf16 %v1237_v34, %v1237_v34  ;;  %4725 = vrcp.f32 %v1079_v60 }
 0x20e   : >> { %v1200_v40 = vpop.f32.mrf.mxu3  ;;  %4727 = vrcp.f32 %v626_v18 }
 0x20f   : >> { %v1296_v41 = vpack.c.b16 %v5178_v39, %v5176_v35  ;;  %v1325_v42 = vunpack.c.l.b16 %v1253_v58 }
 0x210   : >> { %v742_v48 = vpop.f32.mrf.mxu1 }
 0x211   : >> { %v1337_v3 = vpack.c.b16 %v1326_v47, %v1325_v42  ;;  %v786_v55 = vmul.f32 %v4724_v5, %v742_v48 }
 0x213   : >> { %v1081_v50 = vpop.xlane.xlu1 %1080  ;;  %1349 = vrot.lane.b32.xlu1 %v1337_v3, %s4816_s10  ;;  %v4726_v54 = vpop.eup %4725  ;;  %v802_v62 = vpack.c.bf16 %v786_v55, %v786_v55 }
 0x214   : >> { %4729 = vrcp.f32 %v1081_v50  ;;  %v630_v46 = vpop.xlane.xlu2 %629  ;;  %v4728_v9 = vpop.eup %4727  ;;  %v1239_v59 = vmul.f32 %v4726_v54, %v1198_v26 }
 0x215   : >> { %v5184_v10 = vunpack.c.l.b16 %v802_v62 }
 0x216   : >> { %v1203_v44 = vpop.f32.mrf.mxu3  ;;  %v1255_v15 = vpack.c.bf16 %v1239_v59, %v1239_v59 }
 0x218   : >> { %v744_v8 = vpop.f32.mrf.mxu1  ;;  %v1327_v17 = vunpack.c.l.b16 %v1255_v15 }
 0x219   : >> { %v787_v51 = vmul.f32 %v4728_v9, %v744_v8 }
 0x21a   : >> { %v4730_v63 = vpop.eup %4729 }
 0x21b   : >> { %v803_v1 = vpack.c.bf16 %v787_v51, %v787_v51  ;;  %v632_v14 = vpop.xlane.xlu0 %631  ;;  %v1240_v31 = vmul.f32 %v4730_v63, %v1200_v40 }
 0x21c   : >> { %v634_v4 = vpop.xlane.xlu1 %633  ;;  %v1083_v12 = vpop.xlane.xlu2 %1082 }
 0x21d   : >> { %v5186_v11 = vunpack.c.l.b16 %v803_v1  ;;  %4731 = vrcp.f32 %v1083_v12  ;;  %v1256_v16 = vpack.c.bf16 %v1240_v31, %v1240_v31 }
 0x21e   : >> { %4733 = vrcp.f32 %v628_v61  ;;  %v1205_v13 = vpop.f32.mrf.mxu3 }
 0x21f   : >> { %v1297_v23 = vpack.c.b16 %v5186_v11, %v5184_v10  ;;  %v1328_v18 = vunpack.c.l.b16 %v1256_v16  ;;  %4735 = vrcp.f32 %v630_v46 }
 0x220   : >> { %v747_v19 = vpop.f32.mrf.mxu1 }
 0x221   : >> { %v1338_v30 = vpack.c.b16 %v1328_v18, %v1327_v17 }
 0x223   : >> { %v1085_v26 = vpop.xlane.xlu0 %1084  ;;  %v4732_v56 = vpop.eup %4731  ;;  %1351 = vrot.lane.b32.xlu0 %v1338_v30, %s4816_s10 }
 0x224   : >> { %4737 = vrcp.f32 %v1085_v26  ;;  %v4734_v33 = vpop.eup %4733  ;;  %v1087_v20 = vpop.xlane.xlu1 %1086  ;;  %v1241_v57 = vmul.f32 %v4732_v56, %v1203_v44 }
 0x225   : >> { %v5191_v32 = vpop.xlane.xlu2 %635  ;;  %v788_v21 = vmul.f32 %v4734_v33, %v747_v19  ;;  %4739 = vrcp.f32 %v1087_v20  ;;  %v4736_v24 = vpop.eup %4735 }
 0x226   : >> { %v1208_v45 = vpop.f32.mrf.mxu3  ;;  %v1257_v61 = vpack.c.bf16 %v1241_v57, %v1241_v57 }
 0x227   : >> { %v804_v38 = vpack.c.bf16 %v788_v21, %v788_v21 }
 0x228   : >> { %v749_v25 = vpop.f32.mrf.mxu1  ;;  %v1329_v48 = vunpack.c.l.b16 %v1257_v61 }
 0x229   : >> { %v789_v43 = vmul.f32 %v4736_v24, %v749_v25  ;;  %v5193_v58 = vunpack.c.l.b16 %v804_v38 }
 0x22a   : >> { %v4738_v27 = vpop.eup %4737 }
 0x22b   : >> { %v1242_v29 = vmul.f32 %v4738_v27, %v1205_v13  ;;  %v805_v37 = vpack.c.bf16 %v789_v43, %v789_v43  ;;  %v4740_v40 = vpop.eup %4739  ;;  %v638_v22 = vpop.xlane.xlu0 %637 }
 0x22c   : >> { %v1243_v5 = vmul.f32 %v4740_v40, %v1208_v45 }
 0x22d   : >> { %v1089_v60 = vpop.xlane.xlu2 %1088  ;;  %v1258_v34 = vpack.c.bf16 %v1242_v29, %v1242_v29  ;;  %v5195_v47 = vunpack.c.l.b16 %v805_v37 }
 0x22e   : >> { %4741 = vrcp.f32 %v1089_v60  ;;  %v1210_v46 = vpop.f32.mrf.mxu3  ;;  %v1259_v9 = vpack.c.bf16 %v1243_v5, %v1243_v5 }
 0x22f   : >> { %4743 = vrcp.f32 %v632_v14  ;;  %v1330_v42 = vunpack.c.l.b16 %v1258_v34  ;;  %v1298_v3 = vpack.c.b16 %v5195_v47, %v5193_v58 }
 0x230   : >> { %v752_v50 = vpop.f32.mrf.mxu1  ;;  %4745 = vrcp.f32 %v634_v4  ;;  %v1331_v63 = vunpack.c.l.b16 %v1259_v9 }
 0x231   : >> { %v1339_v54 = vpack.c.b16 %v1330_v42, %v1329_v48  ;;  %4747 = vrcp.f32 %v638_v22 }
 0x232   : >> { %4749 = vrcp.f32 %v5191_v32 }
 0x233   : >> { %1353 = vrot.lane.b32.xlu2 %v1339_v54, %s4816_s10 }
 0x234   : >> { %v4742_v55 = vpop.eup %4741 }
 0x235   : >> { %v4744_v44 = vpop.eup %4743  ;;  %v1244_v8 = vmul.f32 %v4742_v55, %v1210_v46 }
 0x236   : >> { %v790_v59 = vmul.f32 %v4744_v44, %v752_v50  ;;  %v4746_v51 = vpop.eup %4745 }
 0x237   : >> { %v1260_v62 = vpack.c.bf16 %v1244_v8, %v1244_v8  ;;  %v4748_v8 = vpop.eup %4747 }
 0x238   : >> { %v754_v14 = vpop.f32.mrf.mxu1  ;;  %v806_v31 = vpack.c.bf16 %v790_v59, %v790_v59 }
 0x239   : >> { %v1332_v1 = vunpack.c.l.b16 %v1260_v62  ;;  %v791_v15 = vmul.f32 %v4746_v51, %v754_v14  ;;  %v4750_v62 = vpop.eup %4749 }
 0x23a   : >> { %v1289_v4 = vunpack.c.l.b16 %v806_v31 }
 0x23b   : >> { %v1340_v12 = vpack.c.b16 %v1332_v1, %v1331_v63  ;;  %v807_v16 = vpack.c.bf16 %v791_v15, %v791_v15 }
 0x23d   : >> { %1355 = vrot.lane.b32.xlu1 %v1340_v12, %s4816_s10  ;;  %v1290_v13 = vunpack.c.l.b16 %v807_v16 }
 0x23f   : >> { %v1299_v17 = vpack.c.b16 %v1290_v13, %v1289_v4  ;;  %v3977_v4 = vld [vmem:[%s6438_s4 + $0xe0] sm:$0xf] (%p351_p5)  ;;  %v4492_v13 = vld [vmem:[%s6438_s4 + $0xec] sm:$0xf0] (%p351_p5) }
 0x240   : >> { %v757_v10 = vpop.f32.mrf.mxu1 }
 0x241   : >> { %v792_v51 = vmul.f32 %v4750_v62, %v757_v10  ;;  %v4544_v10 = vld [vmem:[%s6438_s4 + $0x28c] sm:$0xf0] (%p351_p5) }
 0x242   : > { %v4508_v62 = vld [vmem:[%s6438_s4 + $0x16c] sm:$0xf0] (%p351_p5) }
 0x243   : >> { %v808_v58 = vpack.c.bf16 %v792_v51, %v792_v51  ;;  %v4169_v51 = vld [vmem:[%s6438_s4 + $0x260] sm:$0xf] (%p351_p5) }
 0x245   : >> { %v1344_v18 = vpop.permute.xlu2 %1343  ;;  %v1342_v56 = vpop.permute.xlu1 %1341 }
 0x246   : >> { %v1362_v19 = vsel %vm453_vm0, %v1294_v2, %v1344_v18  ;;  %v1359_v33 = vsel %vm453_vm0, %v1293_v53, %v1342_v56  ;;  %v3978_v18 = vor.u32 (%p351_p5), %v4492_v13, %v3977_v4  ;;  %v4153_v4 = vld [vmem:[%s6438_s4 + $0x240] sm:$0xf] (%p351_p5)  ;;  %v4536_v13 = vld [vmem:[%s6438_s4 + $0x24c] sm:$0xf0] (%p351_p5) }
 0x247   : >> { %v1391_v30 = vunpack.c.l.b16 %v1362_v19  ;;  %v1392_v26 = vunpack.c.h.b16 %v1362_v19  ;;  %v1389_v57 = vunpack.c.l.b16 %v1359_v33  ;;  %v1390_v24 = vunpack.c.h.b16 %v1359_v33  ;;  %v4524_v19 = vld [vmem:[%s6438_s4 + $0x1ec] sm:$0xf0] (%p351_p5)  ;;  %v4361_v33 = vld [vmem:[%s6438_s4 + $0x3e0] sm:$0xf] (%p351_p5) }
 0x248   : >> { %v759_v9 = vpop.f32.mrf.mxu1  ;;  %2493 = vmatpush.bf16.msra.mxu0 (%p351_p5), %v3978_v18  ;;  %v4568_v18 = vld [vmem:[%s6438_s4 + $0x34c] sm:$0xf0] (%p351_p5) }
 0x249   : >> { %v1407_v20 = vpack.c.b16 %v1391_v30, %v1391_v30  ;;  %v1408_v21 = vpack.c.b16 %v1392_v26, %v1392_v26  ;;  %v1405_v28 = vpack.c.b16 %v1389_v57, %v1389_v57  ;;  %v1406_v36 = vpack.c.b16 %v1390_v24, %v1390_v24  ;;  %v4556_v30 = vld [vmem:[%s6438_s4 + $0x2ec] sm:$0xf0] (%p351_p5) }
 0x24a   : >> { %v793_v59 = vmul.f32 %v4748_v8, %v759_v9  ;;  %v4234_v56 = vor.u32 (%p351_p5), %v4556_v30, %v4233_v0  ;;  %v4488_v24 = vld [vmem:[%s6438_s4 + $0xcc] sm:$0xf0] (%p351_p5)  ;;  %v4041_v8 = vld [vmem:[%s6438_s4 + $0x160] sm:$0xf] (%p351_p5)  ;;  %v4154_v30 = vor.u32 (%p351_p5), %v4536_v13, %v4153_v4  ;;  %v3947_v4 = vld [vmem:[%s6438_s4 + $0xb0] sm:$0xf0] (%p351_p5) }
 0x24b   : >> { %1442 = vst [vmem:[%s5211_s12 + $0x8] sm:$0xf] %v1407_v20  ;;  %v4588_v20 = vld [vmem:[%s6438_s4 + $0x3ec] sm:$0xf0] (%p351_p5)  ;;  %v4578_v13 = vld [vmem:[%s6438_s4 + $0x3a4] sm:$0xf] (%p351_p5) }
 0x24c   : >> { %1443 = vst [vmem:[%s5211_s12 + $0xc] sm:$0xf] %v1408_v21  ;;  %v809_v63 = vpack.c.bf16 %v793_v59, %v793_v59  ;;  %v3961_v21 = vld [vmem:[%s6438_s4 + $0xc0] sm:$0xf] (%p351_p5)  ;;  %v4362_v57 = vor.u32 (%p351_p5), %v4588_v20, %v4361_v33  ;;  %2591 = vmatpush.bf16.msra.mxu2 (%p351_p5), %v4234_v56  ;;  %v4476_v9 = vld [vmem:[%s6438_s4 + $0x6c] sm:$0xf0] (%p351_p5) }
 0x24d   : >> { %1440 = vst [vmem:[%s5211_s12] sm:$0xf] %v1405_v28  ;;  %v4089_v28 = vld [vmem:[%s6438_s4 + $0x1c0] sm:$0xf] (%p351_p5)  ;;  %v3962_v22 = vor.u32 (%p351_p5), %v4488_v24, %v3961_v21  ;;  %v4468_v56 = vld [vmem:[%s6438_s4 + $0x2c] sm:$0xf0] (%p351_p5) }
 0x24e   : >> { %1441 = vst [vmem:[%s5211_s12 + $0x4] sm:$0xf] %v1406_v36  ;;  %v1292_v47 = vunpack.c.l.b16 %v809_v63  ;;  %v4520_v36 = vld [vmem:[%s6438_s4 + $0x1cc] sm:$0xf0] (%p351_p5)  ;;  %2640 = vmatpush.bf16.msra.mxu3 (%p351_p5), %v4362_v57  ;;  %v4009_v33 = vld [vmem:[%s6438_s4 + $0x120] sm:$0xf] (%p351_p5) }
 0x24f   : > { %2494 = vmatpush.bf16.msra.mxu0 (%p351_p5), %v3962_v22  ;;  %v4540_v63 = vld [vmem:[%s6438_s4 + $0x26c] sm:$0xf0] (%p351_p5)  ;;  %v4137_v57 = vld [vmem:[%s6438_s4 + $0x220] sm:$0xf] (%p351_p5) }
 0x250   : > { %v4500_v21 = vld [vmem:[%s6438_s4 + $0x12c] sm:$0xf0] (%p351_p5) }
 0x251   : > { %v4532_v24 = vld [vmem:[%s6438_s4 + $0x22c] sm:$0xf0] (%p351_p5) }
 0x266   : >> { %v1348_v52 = vpop.permute.xlu2 %1347 }
 0x267   : >> { %v1368_v53 = vsel %vm453_vm0, %v1296_v41, %v1348_v52  ;;  %v4090_v52 = vor.u32 (%p351_p5), %v4520_v36, %v4089_v28  ;;  %v4265_v28 = vld [vmem:[%s6438_s4 + $0x320] sm:$0xf] (%p351_p5)  ;;  %v4564_v36 = vld [vmem:[%s6438_s4 + $0x32c] sm:$0xf0] (%p351_p5) }
 0x268   : >> { %v1395_v2 = vunpack.c.l.b16 %v1368_v53  ;;  %v1396_v25 = vunpack.c.h.b16 %v1368_v53  ;;  %v4217_v53 = vld [vmem:[%s6438_s4 + $0x2c0] sm:$0xf] (%p351_p5) }
 0x26a   : >> { %v1411_v27 = vpack.c.b16 %v1395_v2, %v1395_v2  ;;  %v1412_v38 = vpack.c.b16 %v1396_v25, %v1396_v25  ;;  %v4552_v2 = vld [vmem:[%s6438_s4 + $0x2cc] sm:$0xf0] (%p351_p5)  ;;  %v4345_v25 = vld [vmem:[%s6438_s4 + $0x3c0] sm:$0xf] (%p351_p5) }
 0x26c   : >> { %1446 = vst [vmem:[%s5211_s12 + $0x18] sm:$0xf] %v1411_v27  ;;  %v4218_v27 = vor.u32 (%p351_p5), %v4552_v2, %v4217_v53  ;;  %v4010_v53 = vor.u32 (%p351_p5), %v4500_v21, %v4009_v33  ;;  %v4138_v2 = vor.u32 (%p351_p5), %v4532_v24, %v4137_v57  ;;  %v4542_v57 = vld [vmem:[%s6438_s4 + $0x284] sm:$0xf] (%p351_p5)  ;;  %v4187_v24 = vld [vmem:[%s6438_s4 + $0x290] sm:$0xf0] (%p351_p5) }
 0x26d   : >> { %1447 = vst [vmem:[%s5211_s12 + $0x1c] sm:$0xf] %v1412_v38  ;;  %v4584_v38 = vld [vmem:[%s6438_s4 + $0x3cc] sm:$0xf0] (%p351_p5) }
 0x26e   : >> { %v1346_v45 = vpop.permute.xlu0 %1345  ;;  %2592 = vmatpush.bf16.msra.mxu2 (%p351_p5), %v4218_v27  ;;  %v3993_v27 = vld [vmem:[%s6438_s4 + $0x100] sm:$0xf] (%p351_p5) }
 0x26f   : >> { %v1365_v43 = vsel %vm453_vm0, %v1295_v7, %v1346_v45  ;;  %v3945_v45 = vld [vmem:[%s6438_s4 + $0xa0] sm:$0xf] (%p351_p5) }
 0x270   : >> { %v1393_v29 = vunpack.c.l.b16 %v1365_v43  ;;  %v1394_v61 = vunpack.c.h.b16 %v1365_v43  ;;  %v4484_v43 = vld [vmem:[%s6438_s4 + $0xac] sm:$0xf0] (%p351_p5) }
 0x272   : >> { %v1409_v37 = vpack.c.b16 %v1393_v29, %v1393_v29  ;;  %v1410_v35 = vpack.c.b16 %v1394_v61, %v1394_v61  ;;  %v4346_v29 = vor.u32 (%p351_p5), %v4584_v38, %v4345_v25  ;;  %v4073_v61 = vld [vmem:[%s6438_s4 + $0x1a0] sm:$0xf] (%p351_p5)  ;;  %v4464_v25 = vld [vmem:[%s6438_s4 + $0xc] sm:$0xf0] (%p351_p5) }
 0x273   : > { %v4496_v38 = vld [vmem:[%s6438_s4 + $0x10c] sm:$0xf0] (%p351_p5) }
 0x274   : >> { %1444 = vst [vmem:[%s5211_s12 + $0x10] sm:$0xf] %v1409_v37  ;;  %v4516_v37 = vld [vmem:[%s6438_s4 + $0x1ac] sm:$0xf0] (%p351_p5)  ;;  %2641 = vmatpush.bf16.msra.mxu3 (%p351_p5), %v4346_v29 }
 0x275   : >> { %1445 = vst [vmem:[%s5211_s12 + $0x14] sm:$0xf] %v1410_v35  ;;  %v4201_v35 = vld [vmem:[%s6438_s4 + $0x2a0] sm:$0xf] (%p351_p5)  ;;  %v4528_v29 = vld [vmem:[%s6438_s4 + $0x20c] sm:$0xf0] (%p351_p5) }
 0x285   : >> { %v1350_v39 = vpop.permute.xlu1 %1349 }
 0x286   : >> { %v1371_v41 = vsel %vm453_vm0, %v1297_v23, %v1350_v39  ;;  %v3946_v39 = vor.u32 (%p351_p5), %v4484_v43, %v3945_v45  ;;  %v4266_v45 = vor.u32 (%p351_p5), %v4564_v36, %v4265_v28  ;;  %v4121_v43 = vld [vmem:[%s6438_s4 + $0x200] sm:$0xf] (%p351_p5)  ;;  %v4478_v28 = vld [vmem:[%s6438_s4 + $0x84] sm:$0xf] (%p351_p5)  ;;  %v4190_v36 = vor.u32 (%p351_p5), %v4542_v57, %v4187_v24 }
 0x287   : >> { %v1397_v60 = vunpack.c.l.b16 %v1371_v41  ;;  %v1398_v34 = vunpack.c.h.b16 %v1371_v41  ;;  %v4548_v41 = vld [vmem:[%s6438_s4 + $0x2ac] sm:$0xf0] (%p351_p5)  ;;  %v4498_v24 = vld [vmem:[%s6438_s4 + $0x124] sm:$0xf] (%p351_p5) }
 0x288   : > { %2495 = vmatpush.bf16.msra.mxu0 (%p351_p5), %v3946_v39  ;;  %v4235_v39 = vld [vmem:[%s6438_s4 + $0x2f0] sm:$0xf0] (%p351_p5) }
 0x289   : >> { %v1413_v40 = vpack.c.b16 %v1397_v60, %v1397_v60  ;;  %v1414_v6 = vpack.c.b16 %v1398_v34, %v1398_v34  ;;  %v4329_v60 = vld [vmem:[%s6438_s4 + $0x3a0] sm:$0xf] (%p351_p5)  ;;  %v4580_v34 = vld [vmem:[%s6438_s4 + $0x3ac] sm:$0xf0] (%p351_p5) }
 0x28b   : >> { %1448 = vst [vmem:[%s5211_s12 + $0x20] sm:$0xf] %v1413_v40  ;;  %v4074_v40 = vor.u32 (%p351_p5), %v4516_v37, %v4073_v61  ;;  %v4249_v61 = vld [vmem:[%s6438_s4 + $0x300] sm:$0xf] (%p351_p5)  ;;  %v4560_v37 = vld [vmem:[%s6438_s4 + $0x30c] sm:$0xf0] (%p351_p5) }
 0x28c   : >> { %1449 = vst [vmem:[%s5211_s12 + $0x24] sm:$0xf] %v1414_v6  ;;  %v4202_v6 = vor.u32 (%p351_p5), %v4548_v41, %v4201_v35  ;;  %v4554_v35 = vld [vmem:[%s6438_s4 + $0x2e4] sm:$0xf] (%p351_p5) }
 0x28d   : >> { %v1354_v49 = vpop.permute.xlu2 %1353 }
 0x28e   : >> { %v1377_v7 = vsel %vm453_vm0, %v1299_v17, %v1354_v49  ;;  %v4105_v17 = vld [vmem:[%s6438_s4 + $0x1e0] sm:$0xf] (%p351_p5)  ;;  %2593 = vmatpush.bf16.msra.mxu2 (%p351_p5), %v4202_v6  ;;  %v4122_v6 = vor.u32 (%p351_p5), %v4528_v29, %v4121_v43 }
 0x28f   : >> { %v1401_v48 = vunpack.c.l.b16 %v1377_v7  ;;  %v1402_v42 = vunpack.c.h.b16 %v1377_v7  ;;  %v4106_v26 = vor.u32 (%p351_p5), %v4524_v19, %v4105_v17  ;;  %v3929_v49 = vld [vmem:[%s6438_s4 + $0x80] sm:$0xf] (%p351_p5)  ;;  %v4480_v7 = vld [vmem:[%s6438_s4 + $0x8c] sm:$0xf0] (%p351_p5) }
 0x290   : > { %v4281_v17 = vld [vmem:[%s6438_s4 + $0x340] sm:$0xf] (%p351_p5) }
 0x291   : >> { %v1417_v5 = vpack.c.b16 %v1401_v48, %v1401_v48  ;;  %v1418_v50 = vpack.c.b16 %v1402_v42, %v1402_v42  ;;  %2542 = vmatpush.bf16.msra.mxu1 (%p351_p5), %v4106_v26  ;;  %v4057_v48 = vld [vmem:[%s6438_s4 + $0x180] sm:$0xf] (%p351_p5)  ;;  %v4330_v42 = vor.u32 (%p351_p5), %v4580_v34, %v4329_v60  ;;  %v4282_v20 = vor.u32 (%p351_p5), %v4568_v18, %v4281_v17  ;;  %v4586_v60 = vld [vmem:[%s6438_s4 + $0x3e4] sm:$0xf] (%p351_p5)  ;;  %v4363_v34 = vld [vmem:[%s6438_s4 + $0x3f0] sm:$0xf0] (%p351_p5) }
 0x292   : > { %v3881_v26 = vld [vmem:[%s6438_s4 + $0x20] sm:$0xf] (%p351_p5)  ;;  %v4331_v17 = vld [vmem:[%s6438_s4 + $0x3b0] sm:$0xf0] (%p351_p5) }
 0x293   : >> { %1452 = vst [vmem:[%s5211_s12 + $0x30] sm:$0xf] %v1417_v5  ;;  %v4512_v5 = vld [vmem:[%s6438_s4 + $0x18c] sm:$0xf0] (%p351_p5)  ;;  %2642 = vmatpush.bf16.msra.mxu3 (%p351_p5), %v4330_v42  ;;  %v3882_v22 = vor.u32 (%p351_p5), %v4468_v56, %v3881_v26  ;;  %v4238_v42 = vor.u32 (%p351_p5), %v4554_v35, %v4235_v39  ;;  %v4334_v18 = vor.u32 (%p351_p5), %v4578_v13, %v4331_v17  ;;  %v4538_v35 = vld [vmem:[%s6438_s4 + $0x264] sm:$0xf] (%p351_p5) }
 0x294   : >> { %1453 = vst [vmem:[%s5211_s12 + $0x34] sm:$0xf] %v1418_v50  ;;  %v4185_v50 = vld [vmem:[%s6438_s4 + $0x280] sm:$0xf] (%p351_p5)  ;;  %v4171_v39 = vld [vmem:[%s6438_s4 + $0x270] sm:$0xf0] (%p351_p5) }
 0x295   : >> { %v1352_v11 = vpop.permute.xlu0 %1351  ;;  %2543 = vmatpush.bf16.msra.mxu1 (%p351_p5), %v4090_v52  ;;  %v3865_v52 = vld [vmem:[%s6438_s4] sm:$0xf] (%p351_p5)  ;;  %v4139_v13 = vld [vmem:[%s6438_s4 + $0x230] sm:$0xf0] (%p351_p5)  ;;  %v4466_v17 = vld [vmem:[%s6438_s4 + $0x24] sm:$0xf] (%p351_p5) }
 0x296   : >> { %v1374_v23 = vsel %vm453_vm0, %v1298_v3, %v1352_v11  ;;  %v1291_v3 = vunpack.c.l.b16 %v808_v58  ;;  %v4313_v11 = vld [vmem:[%s6438_s4 + $0x380] sm:$0xf] (%p351_p5)  ;;  %v3866_v41 = vor.u32 (%p351_p5), %v4464_v25, %v3865_v52  ;;  %v4574_v52 = vld [vmem:[%s6438_s4 + $0x384] sm:$0xf] (%p351_p5) }
 0x297   : >> { %v1399_v54 = vunpack.c.l.b16 %v1374_v23  ;;  %v1400_v55 = vunpack.c.h.b16 %v1374_v23  ;;  %v4576_v23 = vld [vmem:[%s6438_s4 + $0x38c] sm:$0xf0] (%p351_p5)  ;;  %v4297_v58 = vld [vmem:[%s6438_s4 + $0x360] sm:$0xf] (%p351_p5) }
 0x298   : >> { %v1300_v1 = vpack.c.b16 %v1292_v47, %v1291_v3  ;;  %v4314_v59 = vor.u32 (%p351_p5), %v4576_v23, %v4313_v11  ;;  %v4572_v47 = vld [vmem:[%s6438_s4 + $0x36c] sm:$0xf0] (%p351_p5)  ;;  %v4366_v11 = vor.u32 (%p351_p5), %v4586_v60, %v4363_v34  ;;  %v4107_v23 = vld [vmem:[%s6438_s4 + $0x1f0] sm:$0xf0] (%p351_p5)  ;;  %v4174_v60 = vor.u32 (%p351_p5), %v4538_v35, %v4171_v39  ;;  %v4558_v39 = vld [vmem:[%s6438_s4 + $0x304] sm:$0xf] (%p351_p5) }
 0x299   : >> { %v1415_v46 = vpack.c.b16 %v1399_v54, %v1399_v54  ;;  %v1416_v44 = vpack.c.b16 %v1400_v55, %v1400_v55  ;;  %v3930_v54 = vor.u32 (%p351_p5), %v4480_v7, %v3929_v49  ;;  %2544 = vmatpush.bf16.msra.mxu1 (%p351_p5), %v4074_v40  ;;  %v4058_v55 = vor.u32 (%p351_p5), %v4512_v5, %v4057_v48  ;;  %v4490_v5 = vld [vmem:[%s6438_s4 + $0xe4] sm:$0xf] (%p351_p5)  ;;  %v3915_v34 = vld [vmem:[%s6438_s4 + $0x70] sm:$0xf0] (%p351_p5) }
 0x29a   : > { %2643 = vmatpush.bf16.msra.mxu3 (%p351_p5), %v4314_v59  ;;  %v3994_v40 = vor.u32 (%p351_p5), %v4496_v38, %v3993_v27  ;;  %v4250_v7 = vor.u32 (%p351_p5), %v4560_v37, %v4249_v61  ;;  %v4510_v27 = vld [vmem:[%s6438_s4 + $0x184] sm:$0xf] (%p351_p5)  ;;  %v4059_v38 = vld [vmem:[%s6438_s4 + $0x190] sm:$0xf0] (%p351_p5) }
 0x29b   : >> { %1450 = vst [vmem:[%s5211_s12 + $0x28] sm:$0xf] %v1415_v46  ;;  %v4186_v46 = vor.u32 (%p351_p5), %v4544_v10, %v4185_v50  ;;  %2496 = vmatpush.bf16.msra.mxu0 (%p351_p5), %v3930_v54  ;;  %v3979_v50 = vld [vmem:[%s6438_s4 + $0xf0] sm:$0xf0] (%p351_p5)  ;;  %v4522_v10 = vld [vmem:[%s6438_s4 + $0x1e4] sm:$0xf] (%p351_p5) }
 0x29c   : >> { %1451 = vst [vmem:[%s5211_s12 + $0x2c] sm:$0xf] %v1416_v44  ;;  %v3913_v44 = vld [vmem:[%s6438_s4 + $0x60] sm:$0xf] (%p351_p5)  ;;  %v4550_v54 = vld [vmem:[%s6438_s4 + $0x2c4] sm:$0xf] (%p351_p5)  ;;  %v3982_v59 = vor.u32 (%p351_p5), %v4490_v5, %v3979_v50 }
 0x29d   : > { %v3914_v3 = vor.u32 (%p351_p5), %v4476_v9, %v3913_v44  ;;  %2545 = vmatpush.bf16.msra.mxu1 (%p351_p5), %v4058_v55  ;;  %2594 = vmatpush.bf16.msra.mxu2 (%p351_p5), %v4186_v46  ;;  %v4219_v55 = vld [vmem:[%s6438_s4 + $0x2d0] sm:$0xf0] (%p351_p5)  ;;  %v4582_v44 = vld [vmem:[%s6438_s4 + $0x3c4] sm:$0xf] (%p351_p5) }
 0x29e   : > { %v4347_v9 = vld [vmem:[%s6438_s4 + $0x3d0] sm:$0xf0] (%p351_p5)  ;;  %v4506_v5 = vld [vmem:[%s6438_s4 + $0x164] sm:$0xf] (%p351_p5) }
 0x29f   : > { %2497 = vmatpush.bf16.msra.mxu0 (%p351_p5), %v3914_v3  ;;  %v4518_v3 = vld [vmem:[%s6438_s4 + $0x1c4] sm:$0xf] (%p351_p5)  ;;  %v4043_v50 = vld [vmem:[%s6438_s4 + $0x170] sm:$0xf0] (%p351_p5) }
 0x2a0   : > { %v3867_v35 = vld [vmem:[%s6438_s4 + $0x10] sm:$0xf0] (%p351_p5) }
 0x2af   : >> { %v1356_v14 = vpop.permute.xlu1 %1355 }
 0x2b0   : >> { %v1380_v31 = vsel %vm453_vm0, %v1300_v1, %v1356_v14  ;;  %v4042_v1 = vor.u32 (%p351_p5), %v4508_v62, %v4041_v8  ;;  %v4170_v14 = vor.u32 (%p351_p5), %v4540_v63, %v4169_v51  ;;  %v4110_v62 = vor.u32 (%p351_p5), %v4522_v10, %v4107_v23  ;;  %v4486_v63 = vld [vmem:[%s6438_s4 + $0xc4] sm:$0xf] (%p351_p5) }
 0x2b1   : >> { %v1403_v15 = vunpack.c.l.b16 %v1380_v31  ;;  %v1404_v12 = vunpack.c.h.b16 %v1380_v31  ;;  %v3897_v31 = vld [vmem:[%s6438_s4 + $0x40] sm:$0xf] (%p351_p5)  ;;  %v4222_v51 = vor.u32 (%p351_p5), %v4550_v54, %v4219_v55  ;;  %v4046_v10 = vor.u32 (%p351_p5), %v4506_v5, %v4043_v50 }
 0x2b2   : > { %353 = sbr.rel (!%p351_p5) target bundleno = 17 (0x11), region = 100  ;;  %2546 = vmatpush.bf16.msra.mxu1 (%p351_p5), %v4042_v1  ;;  %2595 = vmatpush.bf16.msra.mxu2 (%p351_p5), %v4170_v14  ;;  %v4091_v1 = vld [vmem:[%s6438_s4 + $0x1d0] sm:$0xf0] (%p351_p5) }
 0x2b3   : >> { %v1419_v16 = vpack.c.b16 %v1403_v15, %v1403_v15  ;;  %v1420_v32 = vpack.c.b16 %v1404_v12, %v1404_v12  ;;  %v4472_v15 = vld [vmem:[%s6438_s4 + $0x4c] sm:$0xf0] (%p351_p5)  ;;  %v4025_v12 = vld [vmem:[%s6438_s4 + $0x140] sm:$0xf] (%p351_p5) }
 0x2b4   : > { %v3898_v19 = vor.u32 (%p351_p5), %v4472_v15, %v3897_v31  ;;  %v4546_v31 = vld [vmem:[%s6438_s4 + $0x2a4] sm:$0xf] (%p351_p5)  ;;  %v4203_v15 = vld [vmem:[%s6438_s4 + $0x2b0] sm:$0xf0] (%p351_p5) }
 0x2b5   : >> { %1454 = vst [vmem:[%s5211_s12 + $0x38] sm:$0xf] %v1419_v16  ;;  %v4298_v16 = vor.u32 (%p351_p5), %v4572_v47, %v4297_v58  ;;  %v3963_v58 = vld [vmem:[%s6438_s4 + $0xd0] sm:$0xf0] (%p351_p5)  ;;  %v4350_v47 = vor.u32 (%p351_p5), %v4582_v44, %v4347_v9  ;;  %v4534_v44 = vld [vmem:[%s6438_s4 + $0x244] sm:$0xf] (%p351_p5) }
 0x2b6   : >> { %1455 = vst [vmem:[%s5211_s12 + $0x3c] sm:$0xf] %v1420_v32  ;;  %v4504_v32 = vld [vmem:[%s6438_s4 + $0x14c] sm:$0xf0] (%p351_p5)  ;;  %2498 = vmatpush.bf16.msra.mxu0 (%p351_p5), %v3898_v19  ;;  %2596 = vmatpush.bf16.msra.mxu2 (%p351_p5), %v4154_v30  ;;  %v3966_v14 = vor.u32 (%p351_p5), %v4486_v63, %v3963_v58  ;;  %v4514_v19 = vld [vmem:[%s6438_s4 + $0x1a4] sm:$0xf] (%p351_p5) }
 0x2b7   : > { %v4026_v0 = vor.u32 %v4504_v32, %v4025_v12  ;;  %2644 = vmatpush.bf16.msra.mxu3 %v4298_v16  ;;  %v4482_v12 = vld [vmem:[%s6438_s4 + $0xa4] sm:$0xf]  ;;  %v4094_v16 = vor.u32 %v4518_v3, %v4091_v1  ;;  %v4206_v32 = vor.u32 %v4546_v31, %v4203_v15  ;;  %v4155_v9 = vld [vmem:[%s6438_s4 + $0x250] sm:$0xf0] }
 0x2b8   : > { %v3950_v30 = vor.u32 %v4482_v12, %v3947_v4  ;;  %v4566_v63 = vld [vmem:[%s6438_s4 + $0x344] sm:$0xf]  ;;  %v4283_v58 = vld [vmem:[%s6438_s4 + $0x350] sm:$0xf0] }
 0x2b9   : > { %2547 = vmatpush.bf16.msra.mxu1 %v4026_v0  ;;  %v4075_v0 = vld [vmem:[%s6438_s4 + $0x1b0] sm:$0xf0]  ;;  %v4286_v3 = vor.u32 %v4566_v63, %v4283_v58  ;;  %v4502_v1 = vld [vmem:[%s6438_s4 + $0x144] sm:$0xf]  ;;  %v4369_v63 = vld [vmem:[%s6438_s4 + $0x3e8] sm:$0xf] }
 0x2ba   : > { %2499 = vmatpush.bf16.msra.mxu0 %v3882_v22  ;;  %2597 = vmatpush.bf16.msra.mxu2 %v4138_v2  ;;  %v4078_v26 = vor.u32 %v4514_v19, %v4075_v0  ;;  %v3931_v22 = vld [vmem:[%s6438_s4 + $0x90] sm:$0xf0]  ;;  %v4530_v4 = vld [vmem:[%s6438_s4 + $0x224] sm:$0xf]  ;;  %v4589_v58 = vld [vmem:[%s6438_s4 + $0x3f4] sm:$0xf0] }
 0x2bb   : > { %2645 = vmatpush.bf16.msra.mxu3 %v4282_v20  ;;  %v3934_v2 = vor.u32 %v4478_v28, %v3931_v22  ;;  %v3883_v19 = vld [vmem:[%s6438_s4 + $0x30] sm:$0xf0]  ;;  %v4562_v0 = vld [vmem:[%s6438_s4 + $0x324] sm:$0xf] }
 0x2bc   : > { %v4011_v28 = vld [vmem:[%s6438_s4 + $0x130] sm:$0xf0] }
 0x2bd   : > { %2548 = vmatpush.bf16.msra.mxu1 %v4010_v53  ;;  %v5455_v49 = vld [vmem:[#allocation2] sm:$0xff]  ;;  %v5527_v56 = vld [vmem:[#allocation2 + $0x8] sm:$0xff]  ;;  %v4315_v53 = vld [vmem:[%s6438_s4 + $0x390] sm:$0xf0] }
 0x2be   : > { %v5457_v48 = vld [vmem:[#allocation2 + $0x40] sm:$0xff]  ;;  %2500 = vmatpush.bf16.msra.mxu0 %v3866_v41  ;;  %2598 = vmatpush.bf16.msra.mxu2 %v4122_v6  ;;  %v5529_v33 = vld [vmem:[#allocation2 + $0x48] sm:$0xff]  ;;  %v4318_v25 = vor.u32 %v4574_v52, %v4315_v53  ;;  %v5563_v43 = vld [vmem:[#allocation2 + $0x10] sm:$0xff] }
 0x2bf   : > { %2646 = vmatpush.bf16.msra.mxu3 %v4266_v45  ;;  %v5477_v46 = vld [vmem:[#allocation2 + $0x80] sm:$0xff]  ;;  %v5531_v20 = vld [vmem:[#allocation2 + $0x88] sm:$0xff]  ;;  %v4062_v45 = vor.u32 %v4510_v27, %v4059_v38  ;;  %v5565_v29 = vld [vmem:[#allocation2 + $0x50] sm:$0xff] }
 0x2c0   : > { %v5485_v8 = vld [vmem:[#allocation2 + $0xc0] sm:$0xff]  ;;  %v5533_v21 = vld [vmem:[#allocation2 + $0xc8] sm:$0xff]  ;;  %v5567_v61 = vld [vmem:[#allocation2 + $0x90] sm:$0xff] }
 0x2c1   : > { %2549 = vmatpush.bf16.msra.mxu1 %v3994_v40  ;;  %2501 = vmatmul.bf16.vlgmr.msra.gmra.mxu0 %v5455_v49  ;;  %v5569_v37 = vld [vmem:[#allocation2 + $0xd0] sm:$0xff]  ;;  %v4474_v41 = vld [vmem:[%s6438_s4 + $0x64] sm:$0xf]  ;;  %v5601_v23 = vld [vmem:[#allocation2 + $0x58] sm:$0xff] }
 0x2c2   : > { %2787 = vmatpush.bf16.msrb.mxu2 %v4238_v42  ;;  %2689 = vmatpush.bf16.msrb.mxu0 %v3982_v59  ;;  %v4570_v40 = vld [vmem:[%s6438_s4 + $0x364] sm:$0xf]  ;;  %v4299_v6 = vld [vmem:[%s6438_s4 + $0x370] sm:$0xf0]  ;;  %v5603_v54 = vld [vmem:[#allocation2 + $0x98] sm:$0xff] }
 0x2c3   : > { %2647 = vmatpush.bf16.msra.mxu3 %v4250_v7  ;;  %2599 = vmatmul.bf16.vlgmr.msra.gmra.mxu2 %v5477_v46  ;;  %v3918_v7 = vor.u32 %v4474_v41, %v3915_v34  ;;  %v4302_v42 = vor.u32 %v4570_v40, %v4299_v6  ;;  %v5605_v55 = vld [vmem:[#allocation2 + $0xd8] sm:$0xff]  ;;  %v4470_v59 = vld [vmem:[%s6438_s4 + $0x44] sm:$0xf]  ;;  %v5671_v22 = vld [vmem:[#allocation2 + $0x28] sm:$0xff] }
 0x2c4   : > { %2550 = vmatmul.bf16.vlgmr.msra.gmra.mxu1 %v5457_v48  ;;  %v5635_v15 = vld [vmem:[#allocation2 + $0x20] sm:$0xff]  ;;  %v5673_v52 = vld [vmem:[#allocation2 + $0x68] sm:$0xff]  ;;  %v4123_v27 = vld [vmem:[%s6438_s4 + $0x210] sm:$0xf0] }
 0x2c5   : > { %2738 = vmatpush.bf16.msrb.mxu1 %v4110_v62  ;;  %v4158_v62 = vor.u32 %v4534_v44, %v4155_v9  ;;  %v5637_v12 = vld [vmem:[#allocation2 + $0x60] sm:$0xff]  ;;  %v5675_v53 = vld [vmem:[#allocation2 + $0xa8] sm:$0xff]  ;;  %v4251_v41 = vld [vmem:[%s6438_s4 + $0x310] sm:$0xf0] }
 0x2c6   : > { %2648 = vmatmul.bf16.vlgmr.msra.gmra.mxu3 %v5485_v8  ;;  %2788 = vmatpush.bf16.msrb.mxu2 %v4222_v51  ;;  %v3899_v51 = vld [vmem:[%s6438_s4 + $0x50] sm:$0xf0]  ;;  %v4462_v38 = vld [vmem:[%s6438_s4 + $0x4] sm:$0xf]  ;;  %v4254_v34 = vor.u32 %v4558_v39, %v4251_v41  ;;  %v4241_v44 = vld [vmem:[%s6438_s4 + $0x2e8] sm:$0xf] }
 0x2c7   : > { %2836 = vmatpush.bf16.msrb.mxu3 %v4366_v11  ;;  %2690 = vmatpush.bf16.msrb.mxu0 %v3966_v14  ;;  %v5599_v11 = vld [vmem:[#allocation2 + $0x18] sm:$0xff]  ;;  %v4027_v14 = vld [vmem:[%s6438_s4 + $0x150] sm:$0xf0]  ;;  %v4494_v40 = vld [vmem:[%s6438_s4 + $0x104] sm:$0xf] }
 0x2c8   : > { %v4030_v31 = vor.u32 %v4502_v1, %v4027_v14  ;;  %v3995_v6 = vld [vmem:[%s6438_s4 + $0x110] sm:$0xf0]  ;;  %v4557_v9 = vld [vmem:[%s6438_s4 + $0x2f4] sm:$0xf0]  ;;  %v4113_v1 = vld [vmem:[%s6438_s4 + $0x1e8] sm:$0xf] }
 0x2c9   : > { %2739 = vmatpush.bf16.msrb.mxu1 %v4094_v16  ;;  %v5639_v16 = vld [vmem:[#allocation2 + $0xa0] sm:$0xff]  ;;  %v5709_v5 = vld [vmem:[#allocation2 + $0x70] sm:$0xff]  ;;  %v4525_v14 = vld [vmem:[%s6438_s4 + $0x1f4] sm:$0xf0] }
 0x2ca   : > { %2789 = vmatpush.bf16.msrb.mxu2 %v4206_v32  ;;  %v5641_v32 = vld [vmem:[#allocation2 + $0xe0] sm:$0xff]  ;;  %v5711_v50 = vld [vmem:[#allocation2 + $0xb0] sm:$0xff] }
 0x2cb   : > { %2837 = vmatpush.bf16.msrb.mxu3 %v4350_v47  ;;  %2691 = vmatpush.bf16.msrb.mxu0 %v3950_v30  ;;  %v3902_v47 = vor.u32 %v4470_v59, %v3899_v51  ;;  %v4267_v30 = vld [vmem:[%s6438_s4 + $0x330] sm:$0xf0]  ;;  %v3985_v59 = vld [vmem:[%s6438_s4 + $0xe8] sm:$0xf]  ;;  %v4493_v51 = vld [vmem:[%s6438_s4 + $0xf4] sm:$0xf0] }
 0x2cc   : > { %v4270_v57 = vor.u32 %v4562_v0, %v4267_v30  ;;  %v4553_v0 = vld [vmem:[%s6438_s4 + $0x2d4] sm:$0xf0]  ;;  %v3969_v30 = vld [vmem:[%s6438_s4 + $0xc8] sm:$0xf] }
 0x2cd   : > { %2740 = vmatpush.bf16.msrb.mxu1 %v4078_v26  ;;  %v3886_v26 = vor.u32 %v4466_v17, %v3883_v19  ;;  %v5747_v17 = vld [vmem:[#allocation2 + $0xb8] sm:$0xff]  ;;  %v4225_v19 = vld [vmem:[%s6438_s4 + $0x2c8] sm:$0xf] }
 0x2ce   : > { %2790 = vmatpush.bf16.msrb.mxu2 %v4190_v36  ;;  %v4014_v36 = vor.u32 %v4498_v24, %v4011_v28  ;;  %v4353_v24 = vld [vmem:[%s6438_s4 + $0x3c8] sm:$0xf]  ;;  %v4585_v28 = vld [vmem:[%s6438_s4 + $0x3d4] sm:$0xf0] }
 0x2cf   : > { %2838 = vmatpush.bf16.msrb.mxu3 %v4334_v18  ;;  %2692 = vmatpush.bf16.msrb.mxu0 %v3934_v2  ;;  %v4142_v18 = vor.u32 %v4530_v4, %v4139_v13  ;;  %v5677_v2 = vld [vmem:[#allocation2 + $0xe8] sm:$0xff]  ;;  %v5743_v4 = vld [vmem:[#allocation2 + $0x38] sm:$0xff] }
 0x2d0   : > { %v5745_v13 = vld [vmem:[#allocation2 + $0x78] sm:$0xff] }
 0x2d1   : > { %2506 = vmatmul.bf16.gmra.mxu0 %v5527_v56  ;;  %2741 = vmatpush.bf16.msrb.mxu1 %v4062_v45 }
 0x2d2   : > { %2791 = vmatpush.bf16.msrb.mxu2 %v4174_v60  ;;  %v3870_v60 = vor.u32 %v4462_v38, %v3867_v35  ;;  %v4097_v38 = vld [vmem:[%s6438_s4 + $0x1c8] sm:$0xf] }
 0x2d3   : > { %2604 = vmatmul.bf16.gmra.mxu2 %v5531_v20  ;;  %2839 = vmatpush.bf16.msrb.mxu3 %v4318_v25  ;;  %v4526_v25 = vld [vmem:[%s6438_s4 + $0x204] sm:$0xf] }
 0x2d4   : > { %2555 = vmatmul.bf16.gmra.mxu1 %v5529_v33  ;;  %2693 = vmatpush.bf16.msrb.mxu0 %v3918_v7  ;;  %v4126_v45 = vor.u32 %v4526_v25, %v4123_v27  ;;  %v3998_v7 = vor.u32 %v4494_v40, %v3995_v6  ;;  %v4354_v25 = vor.u32 %v4585_v28, %v4353_v24  ;;  %v5776_v27 = vld [vmem:[%s6439_s5] sm:$0xf]  ;;  %v4209_v6 = vld [vmem:[%s6438_s4 + $0x2a8] sm:$0xf] }
 0x2d5   : > { %2742 = vmatpush.bf16.msrb.mxu1 %v4046_v10  ;;  %v5713_v10 = vld [vmem:[#allocation2 + $0xf0] sm:$0xff]  ;;  %v5785_v35 = vperm.slane %v5776_v27, 0 }
 0x2d6   : > { %2653 = vmatmul.bf16.gmra.mxu3 %v5533_v21  ;;  %2792 = vmatpush.bf16.msrb.mxu2 %v4158_v62  ;;  %v4242_v62 = vor.u32 %v4557_v9, %v4241_v44  ;;  %v3953_v44 = vld [vmem:[%s6438_s4 + $0xa8] sm:$0xf] }
 0x2d7   : > { %2840 = vmatpush.bf16.msrb.mxu3 %v4302_v42  ;;  %v5707_v42 = vld [vmem:[#allocation2 + $0x30] sm:$0xff] }
 0x2d8   : > { %2694 = vmatpush.bf16.msrb.mxu0 %v3902_v47  ;;  %v3986_v47 = vor.u32 %v4493_v51, %v3985_v59 }
 0x2d9   : > { %2743 = vmatpush.bf16.msrb.mxu1 %v4030_v31  ;;  %v4114_v31 = vor.u32 %v4525_v14, %v4113_v1  ;;  %v4081_v14 = vld [vmem:[%s6438_s4 + $0x1a8] sm:$0xf] }
 0x2da   : > { %2793 = vmatpush.bf16.msrb.mxu2 %v4142_v18  ;;  %v5749_v18 = vld [vmem:[#allocation2 + $0xf8] sm:$0xff] }
 0x2db   : > { %2841 = vmatpush.bf16.msrb.mxu3 %v4286_v3  ;;  %v4370_v3 = vor.u32 %v4589_v58, %v4369_v63 }
 0x2dc   : > { %2695 = vmatpush.bf16.msrb.mxu0 %v3886_v26  ;;  %v4226_v26 = vor.u32 %v4553_v0, %v4225_v19 }
 0x2dd   : > { %2744 = vmatpush.bf16.msrb.mxu1 %v4014_v36 }
 0x2de   : > { %2794 = vmatpush.bf16.msrb.mxu2 %v4126_v45  ;;  %v4521_v45 = vld [vmem:[%s6438_s4 + $0x1d4] sm:$0xf0] }
 0x2df   : > { %2842 = vmatpush.bf16.msrb.mxu3 %v4270_v57  ;;  %v4489_v57 = vld [vmem:[%s6438_s4 + $0xd4] sm:$0xf0]  ;;  %v4098_v39 = vor.u32 %v4521_v45, %v4097_v38  ;;  %v4193_v45 = vld [vmem:[%s6438_s4 + $0x288] sm:$0xf] }
 0x2e0   : > { %2696 = vmatpush.bf16.msrb.mxu0 %v3870_v60  ;;  %v3970_v36 = vor.u32 %v4489_v57, %v3969_v30 }
 0x2e1   : > { %2511 = vmatmul.bf16.gmra.mxu0 %v5563_v43  ;;  %2745 = vmatpush.bf16.msrb.mxu1 %v3998_v7  ;;  %v4549_v7 = vld [vmem:[%s6438_s4 + $0x2b4] sm:$0xf0] }
 0x2e2   : > { %2983 = vmatpush.bf16.msra.mxu2 %v4242_v62 }
 0x2e3   : > { %2609 = vmatmul.bf16.gmra.mxu2 %v5567_v61  ;;  %2843 = vmatpush.bf16.msrb.mxu3 %v4254_v34 }
 0x2e4   : > { %2560 = vmatmul.bf16.gmra.mxu1 %v5565_v29  ;;  %2885 = vmatpush.bf16.msra.mxu0 %v3986_v47 }
 0x2e5   : > { %2934 = vmatpush.bf16.msra.mxu1 %v4114_v31  ;;  %v4517_v31 = vld [vmem:[%s6438_s4 + $0x1b4] sm:$0xf0] }
 0x2e6   : > { %2658 = vmatmul.bf16.gmra.mxu3 %v5569_v37  ;;  %2984 = vmatpush.bf16.msra.mxu2 %v4226_v26  ;;  %v4082_v19 = vor.u32 %v4517_v31, %v4081_v14 }
 0x2e7   : > { %3032 = vmatpush.bf16.msra.mxu3 %v4370_v3 }
 0x2e8   : > { %2886 = vmatpush.bf16.msra.mxu0 %v3970_v36 }
 0x2e9   : > { %2935 = vmatpush.bf16.msra.mxu1 %v4098_v39  ;;  %v4545_v39 = vld [vmem:[%s6438_s4 + $0x294] sm:$0xf0] }
 0x2eb   : > { %3033 = vmatpush.bf16.msra.mxu3 %v4354_v25 }
 0x2ed   : > { %2936 = vmatpush.bf16.msra.mxu1 %v4082_v19  ;;  %v4177_v19 = vld [vmem:[%s6438_s4 + $0x268] sm:$0xf] }
 0x2f1   : > { %2516 = vmatmul.bf16.gmra.mxu0 %v5599_v11 }
 0x2f3   : > { %2614 = vmatmul.bf16.gmra.mxu2 %v5603_v54 }
 0x2f4   : > { %2565 = vmatmul.bf16.gmra.mxu1 %v5601_v23 }
 0x2f6   : > { %2663 = vmatmul.bf16.gmra.mxu3 %v5605_v55 }
 0x301   : > { %2521 = vmatmul.bf16.gmra.mxu0 %v5635_v15 }
 0x303   : > { %2619 = vmatmul.bf16.gmra.mxu2 %v5639_v16 }
 0x304   : > { %2570 = vmatmul.bf16.gmra.mxu1 %v5637_v12 }
 0x306   : > { %2668 = vmatmul.bf16.gmra.mxu3 %v5641_v32 }
 0x311   : > { %2526 = vmatmul.bf16.gmra.mxu0 %v5671_v22 }
 0x313   : > { %2624 = vmatmul.bf16.gmra.mxu2 %v5675_v53 }
 0x314   : > { %2575 = vmatmul.bf16.gmra.mxu1 %v5673_v52 }
 0x316   : > { %2673 = vmatmul.bf16.gmra.mxu3 %v5677_v2 }
 0x321   : > { %2531 = vmatmul.bf16.gmra.mxu0 %v5707_v42 }
 0x323   : > { %2629 = vmatmul.bf16.gmra.mxu2 %v5711_v50 }
 0x324   : > { %2580 = vmatmul.bf16.gmra.mxu1 %v5709_v5 }
 0x326   : > { %2678 = vmatmul.bf16.gmra.mxu3 %v5713_v10 }
 0x331   : > { %2536 = vmatmul.bf16.gmra.mxu0 %v5743_v4 }
 0x333   : > { %2634 = vmatmul.bf16.gmra.mxu2 %v5747_v17 }
 0x334   : > { %2585 = vmatmul.bf16.gmra.mxu1 %v5745_v13 }
 0x336   : > { %2683 = vmatmul.bf16.gmra.mxu3 %v5749_v18 }
 0x33e   : > { %v2502_v41 = vpop.f32.mrf.mxu0 }
 0x33f   : > { %v2503_v60 = vadd.f32 %v2502_v41, %v5785_v35  ;;  %v4194_v41 = vor.u32 %v4545_v39, %v4193_v45 }
 0x341   : > { %v2551_v34 = vpop.f32.mrf.mxu1  ;;  %2697 = vmatmul.bf16.vlgmr.msrb.gmra.mxu0 %v5455_v49  ;;  %v4210_v49 = vor.u32 %v4549_v7, %v4209_v6 }
 0x342   : > { %v2552_v40 = vadd.f32 %v2551_v34, %v2503_v60 }
 0x343   : > { %2795 = vmatmul.bf16.vlgmr.msrb.gmra.mxu2 %v5477_v46  ;;  %v4337_v46 = vld [vmem:[%s6438_s4 + $0x3a8] sm:$0xf] }
 0x344   : > { %2746 = vmatmul.bf16.vlgmr.msrb.gmra.mxu1 %v5457_v48  ;;  %v4485_v48 = vld [vmem:[%s6438_s4 + $0xb4] sm:$0xf0]  ;;  %2985 = vmatpush.bf16.msra.mxu2 %v4210_v49 }
 0x345   : > { %v3954_v59 = vor.u32 %v4485_v48, %v3953_v44 }
 0x346   : > { %2844 = vmatmul.bf16.vlgmr.msrb.gmra.mxu3 %v5485_v8  ;;  %v4581_v8 = vld [vmem:[%s6438_s4 + $0x3b4] sm:$0xf0]  ;;  %v2600_v9 = vpop.f32.mrf.mxu2  ;;  %v2504_v58 = vpop.f32.mrf.mxu0 }
 0x347   : > { %v4338_v62 = vor.u32 %v4581_v8, %v4337_v46  ;;  %v2601_v51 = vadd.f32 %v2600_v9, %v2552_v40  ;;  %2887 = vmatpush.bf16.msra.mxu0 %v3954_v59  ;;  %v2505_v1 = vadd.f32 %v2504_v58, %v5785_v35  ;;  %v4065_v8 = vld [vmem:[%s6438_s4 + $0x188] sm:$0xf]  ;;  %v4513_v9 = vld [vmem:[%s6438_s4 + $0x194] sm:$0xf0] }
 0x348   : > { %2986 = vmatpush.bf16.msra.mxu2 %v4194_v41  ;;  %v4066_v59 = vor.u32 %v4513_v9, %v4065_v8  ;;  %v4509_v41 = vld [vmem:[%s6438_s4 + $0x174] sm:$0xf0] }
 0x349   : > { %v2649_v63 = vpop.f32.mrf.mxu3  ;;  %v2553_v47 = vpop.f32.mrf.mxu1  ;;  %3034 = vmatpush.bf16.msra.mxu3 %v4338_v62 }
 0x34a   : > { %v2650_v3 = vadd.f32 %v2649_v63, %v2601_v51  ;;  %v2554_v0 = vadd.f32 %v2553_v47, %v2505_v1  ;;  %2937 = vmatpush.bf16.msra.mxu1 %v4066_v59 }
 0x34c   : > { %3277 = vst [vmem:[%s4892_s17] sm:$0xff] %v2650_v3 }
 0x34e   : > { %v2602_v30 = vpop.f32.mrf.mxu2  ;;  %v2507_v24 = vpop.f32.mrf.mxu0 }
 0x34f   : > { %v2603_v26 = vadd.f32 %v2602_v30, %v2554_v0  ;;  %v2508_v28 = vadd.f32 %v2507_v24, %v5785_v35  ;;  %v4541_v0 = vld [vmem:[%s6438_s4 + $0x274] sm:$0xf0] }
 0x350   : > { %v4178_v30 = vor.u32 %v4541_v0, %v4177_v19 }
 0x351   : > { %v2651_v57 = vpop.f32.mrf.mxu3  ;;  %v2556_v36 = vpop.f32.mrf.mxu1  ;;  %2702 = vmatmul.bf16.gmra.mxu0 %v5527_v56  ;;  %v3937_v56 = vld [vmem:[%s6438_s4 + $0x88] sm:$0xf] }
 0x352   : > { %v2652_v25 = vadd.f32 %v2651_v57, %v2603_v26  ;;  %v2557_v38 = vadd.f32 %v2556_v36, %v2508_v28  ;;  %2987 = vmatpush.bf16.msra.mxu2 %v4178_v30 }
 0x353   : > { %2800 = vmatmul.bf16.gmra.mxu2 %v5531_v20  ;;  %v4321_v20 = vld [vmem:[%s6438_s4 + $0x388] sm:$0xf] }
 0x354   : > { %3281 = vst [vmem:[%s4892_s17 + $0x20] sm:$0xff] %v2652_v25  ;;  %2751 = vmatmul.bf16.gmra.mxu1 %v5529_v33  ;;  %v4481_v33 = vld [vmem:[%s6438_s4 + $0x94] sm:$0xf0] }
 0x355   : > { %v3938_v34 = vor.u32 %v4481_v33, %v3937_v56  ;;  %v4049_v56 = vld [vmem:[%s6438_s4 + $0x168] sm:$0xf] }
 0x356   : > { %2849 = vmatmul.bf16.gmra.mxu3 %v5533_v21  ;;  %v4577_v21 = vld [vmem:[%s6438_s4 + $0x394] sm:$0xf0]  ;;  %v2605_v60 = vpop.f32.mrf.mxu2  ;;  %v2509_v44 = vpop.f32.mrf.mxu0  ;;  %v4050_v33 = vor.u32 %v4509_v41, %v4049_v56 }
 0x357   : > { %v4322_v40 = vor.u32 %v4577_v21, %v4321_v20  ;;  %v2606_v6 = vadd.f32 %v2605_v60, %v2557_v38  ;;  %2888 = vmatpush.bf16.msra.mxu0 %v3938_v34  ;;  %v2510_v46 = vadd.f32 %v2509_v44, %v5785_v35 }
 0x358   : > { %2938 = vmatpush.bf16.msra.mxu1 %v4050_v33 }
 0x359   : > { %v2654_v7 = vpop.f32.mrf.mxu3  ;;  %v2558_v49 = vpop.f32.mrf.mxu1  ;;  %3035 = vmatpush.bf16.msra.mxu3 %v4322_v40 }
 0x35a   : > { %v2655_v48 = vadd.f32 %v2654_v7, %v2606_v6  ;;  %v2559_v62 = vadd.f32 %v2558_v49, %v2510_v46  ;;  %v4537_v46 = vld [vmem:[%s6438_s4 + $0x254] sm:$0xf0] }
 0x35c   : > { %3285 = vst [vmem:[%s4892_s17 + $0x40] sm:$0xff] %v2655_v48  ;;  %v4161_v48 = vld [vmem:[%s6438_s4 + $0x248] sm:$0xf] }
 0x35d   : > { %v4162_v8 = vor.u32 %v4537_v46, %v4161_v48 }
 0x35e   : > { %v2607_v51 = vpop.f32.mrf.mxu2  ;;  %v2512_v47 = vpop.f32.mrf.mxu0 }
 0x35f   : > { %v2608_v63 = vadd.f32 %v2607_v51, %v2559_v62  ;;  %v2513_v3 = vadd.f32 %v2512_v47, %v5785_v35  ;;  %2988 = vmatpush.bf16.msra.mxu2 %v4162_v8 }
 0x361   : > { %v2656_v58 = vpop.f32.mrf.mxu3  ;;  %v2561_v1 = vpop.f32.mrf.mxu1  ;;  %2707 = vmatmul.bf16.gmra.mxu0 %v5563_v43  ;;  %v3921_v43 = vld [vmem:[%s6438_s4 + $0x68] sm:$0xf] }
 0x362   : > { %v2657_v14 = vadd.f32 %v2656_v58, %v2608_v63  ;;  %v2562_v31 = vadd.f32 %v2561_v1, %v2513_v3 }
 0x363   : > { %2805 = vmatmul.bf16.gmra.mxu2 %v5567_v61  ;;  %v4305_v61 = vld [vmem:[%s6438_s4 + $0x368] sm:$0xf] }
 0x364   : > { %3289 = vst [vmem:[%s4892_s17 + $0x60] sm:$0xff] %v2657_v14  ;;  %2756 = vmatmul.bf16.gmra.mxu1 %v5565_v29  ;;  %v4477_v29 = vld [vmem:[%s6438_s4 + $0x74] sm:$0xf0]  ;;  %v4033_v14 = vld [vmem:[%s6438_s4 + $0x148] sm:$0xf] }
 0x365   : > { %v3922_v57 = vor.u32 %v4477_v29, %v3921_v43 }
 0x366   : > { %2854 = vmatmul.bf16.gmra.mxu3 %v5569_v37  ;;  %v4573_v37 = vld [vmem:[%s6438_s4 + $0x374] sm:$0xf0]  ;;  %v2610_v26 = vpop.f32.mrf.mxu2  ;;  %v2514_v25 = vpop.f32.mrf.mxu0 }
 0x367   : > { %v4306_v24 = vor.u32 %v4573_v37, %v4305_v61  ;;  %v2611_v28 = vadd.f32 %v2610_v26, %v2562_v31  ;;  %2889 = vmatpush.bf16.msra.mxu0 %v3922_v57  ;;  %v2515_v39 = vadd.f32 %v2514_v25, %v5785_v35  ;;  %v4505_v31 = vld [vmem:[%s6438_s4 + $0x154] sm:$0xf0] }
 0x368   : > { %v4034_v19 = vor.u32 %v4505_v31, %v4033_v14 }
 0x369   : > { %v2659_v36 = vpop.f32.mrf.mxu3  ;;  %v2563_v38 = vpop.f32.mrf.mxu1  ;;  %3036 = vmatpush.bf16.msra.mxu3 %v4306_v24 }
 0x36a   : > { %v2660_v45 = vadd.f32 %v2659_v36, %v2611_v28  ;;  %v2564_v20 = vadd.f32 %v2563_v38, %v2515_v39  ;;  %2939 = vmatpush.bf16.msra.mxu1 %v4034_v19  ;;  %v4145_v28 = vld [vmem:[%s6438_s4 + $0x228] sm:$0xf]  ;;  %v4533_v36 = vld [vmem:[%s6438_s4 + $0x234] sm:$0xf0] }
 0x36b   : > { %v4146_v25 = vor.u32 %v4533_v36, %v4145_v28  ;;  %v4001_v19 = vld [vmem:[%s6438_s4 + $0x108] sm:$0xf] }
 0x36c   : > { %3293 = vst [vmem:[%s4892_s17 + $0x80] sm:$0xff] %v2660_v45 }
 0x36d   : > { %2989 = vmatpush.bf16.msra.mxu2 %v4146_v25  ;;  %v4243_v25 = vld [vmem:[%s6438_s4 + $0x2f8] sm:$0xf0] }
 0x36e   : > { %v2612_v21 = vpop.f32.mrf.mxu2  ;;  %v2517_v40 = vpop.f32.mrf.mxu0 }
 0x36f   : > { %v2613_v60 = vadd.f32 %v2612_v21, %v2564_v20  ;;  %v2518_v6 = vadd.f32 %v2517_v40, %v5785_v35  ;;  %v4501_v40 = vld [vmem:[%s6438_s4 + $0x134] sm:$0xf0] }
 0x371   : > { %v2661_v34 = vpop.f32.mrf.mxu3  ;;  %v2566_v7 = vpop.f32.mrf.mxu1  ;;  %2712 = vmatmul.bf16.gmra.mxu0 %v5599_v11  ;;  %v3905_v11 = vld [vmem:[%s6438_s4 + $0x48] sm:$0xf] }
 0x372   : > { %v2662_v44 = vadd.f32 %v2661_v34, %v2613_v60  ;;  %v2567_v49 = vadd.f32 %v2566_v7, %v2518_v6  ;;  %v4017_v34 = vld [vmem:[%s6438_s4 + $0x128] sm:$0xf] }
 0x373   : > { %2810 = vmatmul.bf16.gmra.mxu2 %v5603_v54  ;;  %v4289_v54 = vld [vmem:[%s6438_s4 + $0x348] sm:$0xf]  ;;  %v4018_v6 = vor.u32 %v4501_v40, %v4017_v34 }
 0x374   : > { %3297 = vst [vmem:[%s4892_s17 + $0xa0] sm:$0xff] %v2662_v44  ;;  %2761 = vmatmul.bf16.gmra.mxu1 %v5601_v23  ;;  %v4473_v23 = vld [vmem:[%s6438_s4 + $0x54] sm:$0xf0] }
 0x375   : > { %v3906_v59 = vor.u32 %v4473_v23, %v3905_v11  ;;  %2940 = vmatpush.bf16.msra.mxu1 %v4018_v6 }
 0x376   : > { %2859 = vmatmul.bf16.gmra.mxu3 %v5605_v55  ;;  %v4569_v55 = vld [vmem:[%s6438_s4 + $0x354] sm:$0xf0]  ;;  %v2615_v9 = vpop.f32.mrf.mxu2  ;;  %v2519_v58 = vpop.f32.mrf.mxu0 }
 0x377   : > { %v4290_v62 = vor.u32 %v4569_v55, %v4289_v54  ;;  %v2616_v51 = vadd.f32 %v2615_v9, %v2567_v49  ;;  %2890 = vmatpush.bf16.msra.mxu0 %v3906_v59  ;;  %v2520_v1 = vadd.f32 %v2519_v58, %v5785_v35  ;;  %v4129_v55 = vld [vmem:[%s6438_s4 + $0x208] sm:$0xf]  ;;  %v4529_v9 = vld [vmem:[%s6438_s4 + $0x214] sm:$0xf0] }
 0x378   : > { %v4130_v59 = vor.u32 %v4529_v9, %v4129_v55 }
 0x379   : > { %v2664_v63 = vpop.f32.mrf.mxu3  ;;  %v2568_v47 = vpop.f32.mrf.mxu1  ;;  %3037 = vmatpush.bf16.msra.mxu3 %v4290_v62 }
 0x37a   : > { %v2665_v3 = vadd.f32 %v2664_v63, %v2616_v51  ;;  %v2569_v0 = vadd.f32 %v2568_v47, %v2520_v1  ;;  %2990 = vmatpush.bf16.msra.mxu2 %v4130_v59 }
 0x37c   : > { %3301 = vst [vmem:[%s4892_s17 + $0xc0] sm:$0xff] %v2665_v3 }
 0x37e   : > { %v2617_v43 = vpop.f32.mrf.mxu2  ;;  %v2522_v61 = vpop.f32.mrf.mxu0 }
 0x37f   : > { %v2618_v30 = vadd.f32 %v2617_v43, %v2569_v0  ;;  %v2523_v37 = vadd.f32 %v2522_v61, %v5785_v35  ;;  %v4497_v0 = vld [vmem:[%s6438_s4 + $0x114] sm:$0xf0] }
 0x380   : > { %v4002_v43 = vor.u32 %v4497_v0, %v4001_v19 }
 0x381   : > { %v2666_v29 = vpop.f32.mrf.mxu3  ;;  %v2571_v26 = vpop.f32.mrf.mxu1  ;;  %2717 = vmatmul.bf16.gmra.mxu0 %v5635_v15  ;;  %v3889_v15 = vld [vmem:[%s6438_s4 + $0x28] sm:$0xf] }
 0x382   : > { %v2667_v57 = vadd.f32 %v2666_v29, %v2618_v30  ;;  %v2572_v24 = vadd.f32 %v2571_v26, %v2523_v37  ;;  %2941 = vmatpush.bf16.msra.mxu1 %v4002_v43 }
 0x383   : > { %2815 = vmatmul.bf16.gmra.mxu2 %v5639_v16  ;;  %v4273_v16 = vld [vmem:[%s6438_s4 + $0x328] sm:$0xf] }
 0x384   : > { %3305 = vst [vmem:[%s4892_s17 + $0xe0] sm:$0xff] %v2667_v57  ;;  %2766 = vmatmul.bf16.gmra.mxu1 %v5637_v12  ;;  %v4469_v12 = vld [vmem:[%s6438_s4 + $0x34] sm:$0xf0] }
 0x385   : > { %v3890_v45 = vor.u32 %v4469_v12, %v3889_v15  ;;  %v4555_v15 = vld [vmem:[%s6438_s4 + $0x2ec] sm:$0xf] }
 0x386   : > { %2864 = vmatmul.bf16.gmra.mxu3 %v5641_v32  ;;  %v4565_v32 = vld [vmem:[%s6438_s4 + $0x334] sm:$0xf0]  ;;  %v2620_v38 = vpop.f32.mrf.mxu2  ;;  %v2524_v33 = vpop.f32.mrf.mxu0  ;;  %v4246_v12 = vor.u32 %v4555_v15, %v4243_v25  ;;  %v3955_v25 = vld [vmem:[%s6438_s4 + $0xb8] sm:$0xf0] }
 0x387   : > { %v4274_v39 = vor.u32 %v4565_v32, %v4273_v16  ;;  %v2621_v56 = vadd.f32 %v2620_v38, %v2572_v24  ;;  %2891 = vmatpush.bf16.msra.mxu0 %v3890_v45  ;;  %v2525_v60 = vadd.f32 %v2524_v33, %v5785_v35 }
 0x388   : > { %3179 = vmatpush.bf16.msrb.mxu2 %v4246_v12  ;;  %v4339_v12 = vld [vmem:[%s6438_s4 + $0x3b8] sm:$0xf0] }
 0x389   : > { %v2669_v41 = vpop.f32.mrf.mxu3  ;;  %v2573_v20 = vpop.f32.mrf.mxu1  ;;  %3038 = vmatpush.bf16.msra.mxu3 %v4274_v39 }
 0x38a   : > { %v2670_v21 = vadd.f32 %v2669_v41, %v2621_v56  ;;  %v2574_v7 = vadd.f32 %v2573_v20, %v2525_v60  ;;  %v4115_v60 = vld [vmem:[%s6438_s4 + $0x1f8] sm:$0xf0] }
 0x38c   : > { %3309 = vst [vmem:[%s4892_s17 + $0x100] sm:$0xff] %v2670_v21  ;;  %v4523_v21 = vld [vmem:[%s6438_s4 + $0x1ec] sm:$0xf] }
 0x38d   : > { %v4118_v34 = vor.u32 %v4523_v21, %v4115_v60 }
 0x38e   : > { %v2622_v44 = vpop.f32.mrf.mxu2  ;;  %v2527_v46 = vpop.f32.mrf.mxu0 }
 0x38f   : > { %v2623_v49 = vadd.f32 %v2622_v44, %v2574_v7  ;;  %v2528_v11 = vadd.f32 %v2527_v46, %v5785_v35  ;;  %3130 = vmatpush.bf16.msrb.mxu1 %v4118_v34 }
 0x391   : > { %v2671_v48 = vpop.f32.mrf.mxu3  ;;  %v2576_v8 = vpop.f32.mrf.mxu1  ;;  %2722 = vmatmul.bf16.gmra.mxu0 %v5671_v22  ;;  %v3873_v22 = vld [vmem:[%s6438_s4 + $0x8] sm:$0xf] }
 0x392   : > { %v2672_v23 = vadd.f32 %v2671_v48, %v2623_v49  ;;  %v2577_v54 = vadd.f32 %v2576_v8, %v2528_v11 }
 0x393   : > { %2820 = vmatmul.bf16.gmra.mxu2 %v5675_v53  ;;  %v4257_v53 = vld [vmem:[%s6438_s4 + $0x308] sm:$0xf] }
 0x394   : > { %3313 = vst [vmem:[%s4892_s17 + $0x120] sm:$0xff] %v2672_v23  ;;  %2771 = vmatmul.bf16.gmra.mxu1 %v5673_v52  ;;  %v4465_v52 = vld [vmem:[%s6438_s4 + $0x14] sm:$0xf0]  ;;  %v4551_v23 = vld [vmem:[%s6438_s4 + $0x2cc] sm:$0xf] }
 0x395   : > { %v3874_v51 = vor.u32 %v4465_v52, %v3873_v22 }
 0x396   : > { %2869 = vmatmul.bf16.gmra.mxu3 %v5677_v2  ;;  %v4561_v2 = vld [vmem:[%s6438_s4 + $0x314] sm:$0xf0]  ;;  %v2625_v62 = vpop.f32.mrf.mxu2  ;;  %v2529_v3 = vpop.f32.mrf.mxu0 }
 0x397   : > { %v4258_v63 = vor.u32 %v4561_v2, %v4257_v53  ;;  %v2626_v58 = vadd.f32 %v2625_v62, %v2577_v54  ;;  %2892 = vmatpush.bf16.msra.mxu0 %v3874_v51  ;;  %v2530_v31 = vadd.f32 %v2529_v3, %v5785_v35  ;;  %v4227_v54 = vld [vmem:[%s6438_s4 + $0x2d8] sm:$0xf0]  ;;  %v6043_v3 = vperm.slane %v5776_v27, 1  ;;  %v6053_v27 = vld [vmem:[#allocation2 + $0x80] sm:$0xff] }
 0x398   : > { %v4230_v55 = vor.u32 %v4551_v23, %v4227_v54  ;;  %v6096_v23 = vld [vmem:[#allocation2 + $0xc8] sm:$0xff] }
 0x399   : > { %v2674_v47 = vpop.f32.mrf.mxu3  ;;  %v2578_v1 = vpop.f32.mrf.mxu1  ;;  %3039 = vmatpush.bf16.msra.mxu3 %v4258_v63  ;;  %v4543_v54 = vld [vmem:[%s6438_s4 + $0x28c] sm:$0xf] }
 0x39a   : > { %v2675_v14 = vadd.f32 %v2674_v47, %v2626_v58  ;;  %v2579_v30 = vadd.f32 %v2578_v1, %v2530_v31  ;;  %3180 = vmatpush.bf16.msrb.mxu2 %v4230_v55  ;;  %v4519_v58 = vld [vmem:[%s6438_s4 + $0x1cc] sm:$0xf]  ;;  %v4099_v47 = vld [vmem:[%s6438_s4 + $0x1d8] sm:$0xf0] }
 0x39b   : > { %v4102_v1 = vor.u32 %v4519_v58, %v4099_v47  ;;  %v4479_v55 = vld [vmem:[%s6438_s4 + $0x8c] sm:$0xf] }
 0x39c   : > { %3317 = vst [vmem:[%s4892_s17 + $0x140] sm:$0xff] %v2675_v14  ;;  %v4511_v47 = vld [vmem:[%s6438_s4 + $0x18c] sm:$0xf] }
 0x39d   : > { %3131 = vmatpush.bf16.msrb.mxu1 %v4102_v1  ;;  %v4067_v1 = vld [vmem:[%s6438_s4 + $0x198] sm:$0xf0] }
 0x39e   : > { %v2627_v29 = vpop.f32.mrf.mxu2  ;;  %v2532_v26 = vpop.f32.mrf.mxu0 }
 0x39f   : > { %v2628_v61 = vadd.f32 %v2627_v29, %v2579_v30  ;;  %v2533_v57 = vadd.f32 %v2532_v26, %v5785_v35  ;;  %v6050_v26 = vld [vmem:[#allocation2 + $0x40] sm:$0xff] }
 0x3a1   : > { %v2676_v37 = vpop.f32.mrf.mxu3  ;;  %v2581_v24 = vpop.f32.mrf.mxu1  ;;  %2727 = vmatmul.bf16.gmra.mxu0 %v5707_v42  ;;  %v4491_v42 = vld [vmem:[%s6438_s4 + $0xec] sm:$0xf] }
 0x3a2   : > { %v2677_v28 = vadd.f32 %v2676_v37, %v2628_v61  ;;  %v2582_v36 = vadd.f32 %v2581_v24, %v2533_v57  ;;  %v6046_v61 = vld [vmem:[#allocation2] sm:$0xff]  ;;  %v4547_v24 = vld [vmem:[%s6438_s4 + $0x2ac] sm:$0xf] }
 0x3a3   : > { %2825 = vmatmul.bf16.gmra.mxu2 %v5711_v50  ;;  %v4587_v50 = vld [vmem:[%s6438_s4 + $0x3ec] sm:$0xf]  ;;  %v6056_v57 = vld [vmem:[#allocation2 + $0xc0] sm:$0xff] }
 0x3a4   : > { %3321 = vst [vmem:[%s4892_s17 + $0x160] sm:$0xff] %v2677_v28  ;;  %2776 = vmatmul.bf16.gmra.mxu1 %v5709_v5  ;;  %v3987_v5 = vld [vmem:[%s6438_s4 + $0xf8] sm:$0xf0] }
 0x3a5   : > { %v3990_v32 = vor.u32 %v4491_v42, %v3987_v5  ;;  %v4211_v28 = vld [vmem:[%s6438_s4 + $0x2b8] sm:$0xf0]  ;;  %v4579_v42 = vld [vmem:[%s6438_s4 + $0x3ac] sm:$0xf] }
 0x3a6   : > { %2874 = vmatmul.bf16.gmra.mxu3 %v5713_v10  ;;  %v4371_v10 = vld [vmem:[%s6438_s4 + $0x3f8] sm:$0xf0]  ;;  %v2630_v16 = vpop.f32.mrf.mxu2  ;;  %v2534_v56 = vpop.f32.mrf.mxu0  ;;  %v4214_v15 = vor.u32 %v4547_v24, %v4211_v28  ;;  %v6126_v24 = vld [vmem:[#allocation2 + $0x10] sm:$0xff] }
 0x3a7   : > { %v4374_v38 = vor.u32 %v4587_v50, %v4371_v10  ;;  %v2631_v45 = vadd.f32 %v2630_v16, %v2582_v36  ;;  %3081 = vmatpush.bf16.msrb.mxu0 %v3990_v32  ;;  %v2535_v20 = vadd.f32 %v2534_v56, %v5785_v35  ;;  %v4483_v36 = vld [vmem:[%s6438_s4 + $0xac] sm:$0xf]  ;;  %v4342_v10 = vor.u32 %v4579_v42, %v4339_v12  ;;  %v4179_v12 = vld [vmem:[%s6438_s4 + $0x278] sm:$0xf0] }
 0x3a8   : > { %v3958_v50 = vor.u32 %v4483_v36, %v3955_v25  ;;  %3181 = vmatpush.bf16.msrb.mxu2 %v4214_v15  ;;  %v6130_v36 = vld [vmem:[#allocation2 + $0x50] sm:$0xff]  ;;  %v4539_v42 = vld [vmem:[%s6438_s4 + $0x26c] sm:$0xf] }
 0x3a9   : > { %v2679_v39 = vpop.f32.mrf.mxu3  ;;  %v2583_v41 = vpop.f32.mrf.mxu1  ;;  %3228 = vmatpush.bf16.msrb.mxu3 %v4374_v38  ;;  %v6133_v15 = vld [vmem:[#allocation2 + $0x90] sm:$0xff] }
 0x3aa   : > { %v2680_v33 = vadd.f32 %v2679_v39, %v2631_v45  ;;  %v2584_v40 = vadd.f32 %v2583_v41, %v2535_v20  ;;  %v4515_v41 = vld [vmem:[%s6438_s4 + $0x1ac] sm:$0xf]  ;;  %v6136_v25 = vld [vmem:[#allocation2 + $0xd0] sm:$0xff] }
 0x3ac   : > { %3325 = vst [vmem:[%s4892_s17 + $0x180] sm:$0xff] %v2680_v33  ;;  %v4083_v33 = vld [vmem:[%s6438_s4 + $0x1b8] sm:$0xf0] }
 0x3ad   : > { %v4086_v20 = vor.u32 %v4515_v41, %v4083_v33 }
 0x3ae   : > { %v2632_v6 = vpop.f32.mrf.mxu2  ;;  %v2537_v49 = vpop.f32.mrf.mxu0 }
 0x3af   : > { %v2633_v7 = vadd.f32 %v2632_v6, %v2584_v40  ;;  %v2538_v48 = vadd.f32 %v2537_v49, %v5785_v35  ;;  %3132 = vmatpush.bf16.msrb.mxu1 %v4086_v20 }
 0x3b1   : > { %v2681_v44 = vpop.f32.mrf.mxu3  ;;  %v2586_v46 = vpop.f32.mrf.mxu1  ;;  %2732 = vmatmul.bf16.gmra.mxu0 %v5743_v4  ;;  %v4487_v4 = vld [vmem:[%s6438_s4 + $0xcc] sm:$0xf] }
 0x3b2   : > { %v2682_v11 = vadd.f32 %v2681_v44, %v2633_v7  ;;  %v2587_v8 = vadd.f32 %v2586_v46, %v2538_v48  ;;  %v6086_v48 = vld [vmem:[#allocation2 + $0x8] sm:$0xff] }
 0x3b3   : > { %2830 = vmatmul.bf16.gmra.mxu2 %v5747_v17  ;;  %v4583_v17 = vld [vmem:[%s6438_s4 + $0x3cc] sm:$0xf] }
 0x3b4   : > { %3329 = vst [vmem:[%s4892_s17 + $0x1a0] sm:$0xff] %v2682_v11  ;;  %2781 = vmatmul.bf16.gmra.mxu1 %v5745_v13  ;;  %v3971_v13 = vld [vmem:[%s6438_s4 + $0xd8] sm:$0xf0]  ;;  %v6090_v11 = vld [vmem:[#allocation2 + $0x48] sm:$0xff] }
 0x3b5   : > { %v3974_v22 = vor.u32 %v4487_v4, %v3971_v13  ;;  %v4195_v4 = vld [vmem:[%s6438_s4 + $0x298] sm:$0xf0] }
 0x3b6   : > { %2879 = vmatmul.bf16.gmra.mxu3 %v5749_v18  ;;  %v4355_v18 = vld [vmem:[%s6438_s4 + $0x3d8] sm:$0xf0]  ;;  %v2635_v9 = vpop.f32.mrf.mxu2  ;;  %v2539_v2 = vpop.f32.mrf.mxu0  ;;  %v4198_v13 = vor.u32 %v4543_v54, %v4195_v4 }
 0x3b7   : > { %v4358_v59 = vor.u32 %v4583_v17, %v4355_v18  ;;  %v2636_v52 = vadd.f32 %v2635_v9, %v2587_v8  ;;  %3082 = vmatpush.bf16.msrb.mxu0 %v3974_v22  ;;  %v2540_v63 = vadd.f32 %v2539_v2, %v5785_v35  ;;  %v6093_v8 = vld [vmem:[#allocation2 + $0x88] sm:$0xff]  ;;  %v3939_v17 = vld [vmem:[%s6438_s4 + $0x98] sm:$0xf0] }
 0x3b8   : > { %v4575_v18 = vld [vmem:[%s6438_s4 + $0x38c] sm:$0xf]  ;;  %v4323_v9 = vld [vmem:[%s6438_s4 + $0x398] sm:$0xf0]  ;;  %3182 = vmatpush.bf16.msrb.mxu2 %v4198_v13 }
 0x3b9   : > { %v2684_v53 = vpop.f32.mrf.mxu3  ;;  %v2588_v62 = vpop.f32.mrf.mxu1  ;;  %3229 = vmatpush.bf16.msrb.mxu3 %v4358_v59  ;;  %v3942_v59 = vor.u32 %v4479_v55, %v3939_v17  ;;  %v6166_v17 = vld [vmem:[#allocation2 + $0x18] sm:$0xff] }
 0x3ba   : > { %v2685_v51 = vadd.f32 %v2684_v53, %v2636_v52  ;;  %v2589_v14 = vadd.f32 %v2588_v62, %v2540_v63  ;;  %v4326_v52 = vor.u32 %v4575_v18, %v4323_v9  ;;  %v6170_v9 = vld [vmem:[#allocation2 + $0x58] sm:$0xff] }
 0x3bb   : > { %3083 = vmatpush.bf16.msrb.mxu0 %v3958_v50  ;;  %v4182_v50 = vor.u32 %v4539_v42, %v4179_v12 }
 0x3bc   : > { %3333 = vst [vmem:[%s4892_s17 + $0x1c0] sm:$0xff] %v2685_v51 }
 0x3bd   : > { %3230 = vmatpush.bf16.msrb.mxu3 %v4342_v10  ;;  %v3923_v10 = vld [vmem:[%s6438_s4 + $0x78] sm:$0xf0]  ;;  %3183 = vmatpush.bf16.msrb.mxu2 %v4182_v50 }
 0x3be   : > { %v2637_v31 = vpop.f32.mrf.mxu2  ;;  %v2698_v35 = vpop.f32.mrf.mxu0 }
 0x3bf   : > { %v2638_v19 = vadd.f32 %v2637_v31, %v2589_v14  ;;  %v2699_v43 = vadd.f32 %v2698_v35, %v6043_v3  ;;  %3084 = vmatpush.bf16.msrb.mxu0 %v3942_v59  ;;  %v4070_v14 = vor.u32 %v4511_v47, %v4067_v1  ;;  %v6176_v59 = vld [vmem:[#allocation2 + $0xd8] sm:$0xff] }
 0x3c1   : > { %v2686_v0 = vpop.f32.mrf.mxu3  ;;  %v2747_v30 = vpop.f32.mrf.mxu1  ;;  %2893 = vmatmul.bf16.vlgmr.msra.gmra.mxu0 %v6046_v61  ;;  %3231 = vmatpush.bf16.msrb.mxu3 %v4326_v52  ;;  %v4535_v52 = vld [vmem:[%s6438_s4 + $0x24c] sm:$0xf] }
 0x3c2   : > { %v2687_v29 = vadd.f32 %v2686_v0, %v2638_v19  ;;  %v2748_v37 = vadd.f32 %v2747_v30, %v2699_v43  ;;  %3133 = vmatpush.bf16.msrb.mxu1 %v4070_v14 }
 0x3c3   : > { %2991 = vmatmul.bf16.vlgmr.msra.gmra.mxu2 %v6053_v27 }
 0x3c4   : > { %3337 = vst [vmem:[%s4892_s17 + $0x1e0] sm:$0xff] %v2687_v29  ;;  %2942 = vmatmul.bf16.vlgmr.msra.gmra.mxu1 %v6050_v26 }
 0x3c6   : > { %3040 = vmatmul.bf16.vlgmr.msra.gmra.mxu3 %v6056_v57  ;;  %v2796_v5 = vpop.f32.mrf.mxu2  ;;  %v2700_v38 = vpop.f32.mrf.mxu0 }
 0x3c7   : > { %v2797_v16 = vadd.f32 %v2796_v5, %v2748_v37  ;;  %v2701_v56 = vadd.f32 %v2700_v38, %v6043_v3  ;;  %v4475_v5 = vld [vmem:[%s6438_s4 + $0x6c] sm:$0xf] }
 0x3c9   : > { %v2845_v32 = vpop.f32.mrf.mxu3  ;;  %v2749_v45 = vpop.f32.mrf.mxu1 }
 0x3ca   : > { %v2846_v39 = vadd.f32 %v2845_v32, %v2797_v16  ;;  %v2750_v21 = vadd.f32 %v2749_v45, %v2701_v56  ;;  %v4571_v16 = vld [vmem:[%s6438_s4 + $0x36c] sm:$0xf]  ;;  %v4307_v32 = vld [vmem:[%s6438_s4 + $0x378] sm:$0xf0]  ;;  %v3926_v45 = vor.u32 %v4475_v5, %v3923_v10 }
 0x3cc   : > { %3278 = vst [vmem:[%s4892_s17 + $0x8] sm:$0xff] %v2846_v39  ;;  %v4310_v39 = vor.u32 %v4571_v16, %v4307_v32  ;;  %3085 = vmatpush.bf16.msrb.mxu0 %v3926_v45  ;;  %v6206_v45 = vld [vmem:[#allocation2 + $0x20] sm:$0xff] }
 0x3ce   : > { %v2798_v60 = vpop.f32.mrf.mxu2  ;;  %v2703_v6 = vpop.f32.mrf.mxu0  ;;  %3232 = vmatpush.bf16.msrb.mxu3 %v4310_v39 }
 0x3cf   : > { %v2799_v34 = vadd.f32 %v2798_v60, %v2750_v21  ;;  %v2704_v7 = vadd.f32 %v2703_v6, %v6043_v3 }
 0x3d1   : > { %v2847_v40 = vpop.f32.mrf.mxu3  ;;  %v2752_v44 = vpop.f32.mrf.mxu1  ;;  %2898 = vmatmul.bf16.gmra.mxu0 %v6086_v48 }
 0x3d2   : > { %v2848_v49 = vadd.f32 %v2847_v40, %v2799_v34  ;;  %v2753_v46 = vadd.f32 %v2752_v44, %v2704_v7  ;;  %v4507_v34 = vld [vmem:[%s6438_s4 + $0x16c] sm:$0xf]  ;;  %v4051_v40 = vld [vmem:[%s6438_s4 + $0x178] sm:$0xf0] }
 0x3d3   : > { %2996 = vmatmul.bf16.gmra.mxu2 %v6093_v8  ;;  %v4054_v6 = vor.u32 %v4507_v34, %v4051_v40  ;;  %v3891_v40 = vld [vmem:[%s6438_s4 + $0x38] sm:$0xf0] }
 0x3d4   : > { %3282 = vst [vmem:[%s4892_s17 + $0x28] sm:$0xff] %v2848_v49  ;;  %2947 = vmatmul.bf16.gmra.mxu1 %v6090_v11 }
 0x3d5   : > { %3134 = vmatpush.bf16.msrb.mxu1 %v4054_v6  ;;  %v4563_v6 = vld [vmem:[%s6438_s4 + $0x32c] sm:$0xf] }
 0x3d6   : > { %3045 = vmatmul.bf16.gmra.mxu3 %v6096_v23  ;;  %v2801_v22 = vpop.f32.mrf.mxu2  ;;  %v2705_v62 = vpop.f32.mrf.mxu0 }
 0x3d7   : > { %v2802_v53 = vadd.f32 %v2801_v22, %v2753_v46  ;;  %v2706_v58 = vadd.f32 %v2705_v62, %v6043_v3  ;;  %v6173_v22 = vld [vmem:[#allocation2 + $0x98] sm:$0xff] }
 0x3d9   : > { %v2850_v2 = vpop.f32.mrf.mxu3  ;;  %v2754_v51 = vpop.f32.mrf.mxu1 }
 0x3da   : > { %v2851_v63 = vadd.f32 %v2850_v2, %v2802_v53  ;;  %v2755_v31 = vadd.f32 %v2754_v51, %v2706_v58  ;;  %v4163_v53 = vld [vmem:[%s6438_s4 + $0x258] sm:$0xf0]  ;;  %v4471_v2 = vld [vmem:[%s6438_s4 + $0x4c] sm:$0xf] }
 0x3db   : > { %v4166_v62 = vor.u32 %v4535_v52, %v4163_v53  ;;  %v3907_v51 = vld [vmem:[%s6438_s4 + $0x58] sm:$0xf0]  ;;  %v4499_v53 = vld [vmem:[%s6438_s4 + $0x12c] sm:$0xf] }
 0x3dc   : > { %3286 = vst [vmem:[%s4892_s17 + $0x48] sm:$0xff] %v2851_v63  ;;  %v4567_v63 = vld [vmem:[%s6438_s4 + $0x34c] sm:$0xf]  ;;  %v4291_v58 = vld [vmem:[%s6438_s4 + $0x358] sm:$0xf0]  ;;  %v3910_v1 = vor.u32 %v4471_v2, %v3907_v51 }
 0x3dd   : > { %v4294_v14 = vor.u32 %v4567_v63, %v4291_v58  ;;  %3184 = vmatpush.bf16.msrb.mxu2 %v4166_v62  ;;  %v4019_v2 = vld [vmem:[%s6438_s4 + $0x138] sm:$0xf0] }
 0x3de   : > { %v2803_v19 = vpop.f32.mrf.mxu2  ;;  %v2708_v43 = vpop.f32.mrf.mxu0  ;;  %3086 = vmatpush.bf16.msrb.mxu0 %v3910_v1  ;;  %v4022_v62 = vor.u32 %v4499_v53, %v4019_v2  ;;  %v6286_v53 = vld [vmem:[#allocation2 + $0x30] sm:$0xff] }
 0x3df   : > { %v2804_v0 = vadd.f32 %v2803_v19, %v2755_v31  ;;  %v2709_v30 = vadd.f32 %v2708_v43, %v6043_v3  ;;  %3233 = vmatpush.bf16.msrb.mxu3 %v4294_v14 }
 0x3e1   : > { %v2852_v35 = vpop.f32.mrf.mxu3  ;;  %v2757_v29 = vpop.f32.mrf.mxu1  ;;  %2903 = vmatmul.bf16.gmra.mxu0 %v6126_v24 }
 0x3e2   : > { %v2853_v37 = vadd.f32 %v2852_v35, %v2804_v0  ;;  %v2758_v28 = vadd.f32 %v2757_v29, %v2709_v30  ;;  %v4503_v29 = vld [vmem:[%s6438_s4 + $0x14c] sm:$0xf] }
 0x3e3   : > { %3001 = vmatmul.bf16.gmra.mxu2 %v6133_v15 }
 0x3e4   : > { %3290 = vst [vmem:[%s4892_s17 + $0x68] sm:$0xff] %v2853_v37  ;;  %2952 = vmatmul.bf16.gmra.mxu1 %v6130_v36  ;;  %v4035_v37 = vld [vmem:[%s6438_s4 + $0x158] sm:$0xf0] }
 0x3e6   : > { %3050 = vmatmul.bf16.gmra.mxu3 %v6136_v25  ;;  %v2806_v38 = vpop.f32.mrf.mxu2  ;;  %v2710_v33 = vpop.f32.mrf.mxu0 }
 0x3e7   : > { %v2807_v56 = vadd.f32 %v2806_v38, %v2758_v28  ;;  %v2711_v60 = vadd.f32 %v2710_v33, %v6043_v3  ;;  %v4038_v28 = vor.u32 %v4503_v29, %v4035_v37  ;;  %v6216_v33 = vld [vmem:[#allocation2 + $0xe0] sm:$0xff]  ;;  %v6256_v29 = vld [vmem:[#allocation2 + $0xe8] sm:$0xff] }
 0x3e8   : > { %v4527_v37 = vld [vmem:[%s6438_s4 + $0x20c] sm:$0xf] }
 0x3e9   : > { %v2855_v41 = vpop.f32.mrf.mxu3  ;;  %v2759_v20 = vpop.f32.mrf.mxu1  ;;  %3135 = vmatpush.bf16.msrb.mxu1 %v4038_v28  ;;  %v4131_v28 = vld [vmem:[%s6438_s4 + $0x218] sm:$0xf0] }
 0x3ea   : > { %v2856_v21 = vadd.f32 %v2855_v41, %v2807_v56  ;;  %v2760_v7 = vadd.f32 %v2759_v20, %v2711_v60  ;;  %v6210_v56 = vld [vmem:[#allocation2 + $0x60] sm:$0xff]  ;;  %v4531_v20 = vld [vmem:[%s6438_s4 + $0x22c] sm:$0xf] }
 0x3eb   : > { %v6213_v41 = vld [vmem:[#allocation2 + $0xa0] sm:$0xff]  ;;  %v4467_v60 = vld [vmem:[%s6438_s4 + $0x2c] sm:$0xf] }
 0x3ec   : > { %3294 = vst [vmem:[%s4892_s17 + $0x88] sm:$0xff] %v2856_v21  ;;  %v4147_v21 = vld [vmem:[%s6438_s4 + $0x238] sm:$0xf0] }
 0x3ed   : > { %v4150_v34 = vor.u32 %v4531_v20, %v4147_v21  ;;  %3136 = vmatpush.bf16.msrb.mxu1 %v4022_v62  ;;  %v6290_v62 = vld [vmem:[#allocation2 + $0x70] sm:$0xff] }
 0x3ee   : > { %v2808_v44 = vpop.f32.mrf.mxu2  ;;  %v2713_v54 = vpop.f32.mrf.mxu0 }
 0x3ef   : > { %v2809_v49 = vadd.f32 %v2808_v44, %v2760_v7  ;;  %v2714_v4 = vadd.f32 %v2713_v54, %v6043_v3  ;;  %v4275_v7 = vld [vmem:[%s6438_s4 + $0x338] sm:$0xf0]  ;;  %3185 = vmatpush.bf16.msrb.mxu2 %v4150_v34 }
 0x3f1   : > { %v2857_v46 = vpop.f32.mrf.mxu3  ;;  %v2762_v55 = vpop.f32.mrf.mxu1  ;;  %2908 = vmatmul.bf16.gmra.mxu0 %v6166_v17 }
 0x3f2   : > { %v2858_v13 = vadd.f32 %v2857_v46, %v2809_v49  ;;  %v2763_v18 = vadd.f32 %v2762_v55, %v2714_v4  ;;  %v3894_v49 = vor.u32 %v4467_v60, %v3891_v40  ;;  %v4278_v46 = vor.u32 %v4563_v6, %v4275_v7  ;;  %v4495_v6 = vld [vmem:[%s6438_s4 + $0x10c] sm:$0xf]  ;;  %v4003_v7 = vld [vmem:[%s6438_s4 + $0x118] sm:$0xf0] }
 0x3f3   : > { %3006 = vmatmul.bf16.gmra.mxu2 %v6173_v22 }
 0x3f4   : > { %3298 = vst [vmem:[%s4892_s17 + $0xa8] sm:$0xff] %v2858_v13  ;;  %2957 = vmatmul.bf16.gmra.mxu1 %v6170_v9  ;;  %3087 = vmatpush.bf16.msrb.mxu0 %v3894_v49 }
 0x3f5   : > { %3234 = vmatpush.bf16.msrb.mxu3 %v4278_v46 }
 0x3f6   : > { %3055 = vmatmul.bf16.gmra.mxu3 %v6176_v59  ;;  %v2811_v47 = vpop.f32.mrf.mxu2  ;;  %v2715_v0 = vpop.f32.mrf.mxu0 }
 0x3f7   : > { %v2812_v31 = vadd.f32 %v2811_v47, %v2763_v18  ;;  %v2716_v30 = vadd.f32 %v2715_v0, %v6043_v3  ;;  %v6246_v0 = vld [vmem:[#allocation2 + $0x28] sm:$0xff] }
 0x3f9   : > { %v2860_v19 = vpop.f32.mrf.mxu3  ;;  %v2764_v35 = vpop.f32.mrf.mxu1 }
 0x3fa   : > { %v2861_v43 = vadd.f32 %v2860_v19, %v2812_v31  ;;  %v2765_v42 = vadd.f32 %v2764_v35, %v2716_v30  ;;  %v6253_v30 = vld [vmem:[#allocation2 + $0xa8] sm:$0xff] }
 0x3fc   : > { %3302 = vst [vmem:[%s4892_s17 + $0xc8] sm:$0xff] %v2861_v43  ;;  %v6250_v43 = vld [vmem:[#allocation2 + $0x68] sm:$0xff] }
 0x3fe   : > { %v2813_v12 = vpop.f32.mrf.mxu2  ;;  %v2718_v10 = vpop.f32.mrf.mxu0 }
 0x3ff   : > { %v2814_v5 = vadd.f32 %v2813_v12, %v2765_v42  ;;  %v2719_v16 = vadd.f32 %v2718_v10, %v6043_v3  ;;  %v4463_v42 = vld [vmem:[%s6438_s4 + $0xc] sm:$0xf]  ;;  %v4134_v12 = vor.u32 %v4527_v37, %v4131_v28  ;;  %v4259_v10 = vld [vmem:[%s6438_s4 + $0x318] sm:$0xf0] }
 0x401   : > { %v2862_v50 = vpop.f32.mrf.mxu3  ;;  %v2767_v32 = vpop.f32.mrf.mxu1  ;;  %2913 = vmatmul.bf16.gmra.mxu0 %v6206_v45  ;;  %3186 = vmatpush.bf16.msrb.mxu2 %v4134_v12 }
 0x402   : > { %v2863_v38 = vadd.f32 %v2862_v50, %v2814_v5  ;;  %v2768_v39 = vadd.f32 %v2767_v32, %v2719_v16  ;;  %v3875_v5 = vld [vmem:[%s6438_s4 + $0x18] sm:$0xf0]  ;;  %v4559_v50 = vld [vmem:[%s6438_s4 + $0x30c] sm:$0xf] }
 0x403   : > { %3011 = vmatmul.bf16.gmra.mxu2 %v6213_v41  ;;  %v3878_v32 = vor.u32 %v4463_v42, %v3875_v5 }
 0x404   : > { %3306 = vst [vmem:[%s4892_s17 + $0xe8] sm:$0xff] %v2863_v38  ;;  %2962 = vmatmul.bf16.gmra.mxu1 %v6210_v56  ;;  %v4262_v38 = vor.u32 %v4559_v50, %v4259_v10 }
 0x405   : > { %3088 = vmatpush.bf16.msrb.mxu0 %v3878_v32  ;;  %v6302_v32 = vld [vmem:[#allocation2 + $0x38] sm:$0xff] }
 0x406   : > { %3060 = vmatmul.bf16.gmra.mxu3 %v6216_v33  ;;  %v2816_v44 = vpop.f32.mrf.mxu2  ;;  %v2720_v55 = vpop.f32.mrf.mxu0 }
 0x407   : > { %v2817_v54 = vadd.f32 %v2816_v44, %v2768_v39  ;;  %v2721_v52 = vadd.f32 %v2720_v55, %v6043_v3  ;;  %3235 = vmatpush.bf16.msrb.mxu3 %v4262_v38  ;;  %v4006_v44 = vor.u32 %v4495_v6, %v4003_v7 }
 0x409   : > { %v2865_v4 = vpop.f32.mrf.mxu3  ;;  %v2769_v13 = vpop.f32.mrf.mxu1  ;;  %3137 = vmatpush.bf16.msrb.mxu1 %v4006_v44 }
 0x40a   : > { %v2866_v18 = vadd.f32 %v2865_v4, %v2817_v54  ;;  %v2770_v51 = vadd.f32 %v2769_v13, %v2721_v52 }
 0x40c   : > { %3310 = vst [vmem:[%s4892_s17 + $0x108] sm:$0xff] %v2866_v18 }
 0x40e   : > { %v2818_v63 = vpop.f32.mrf.mxu2  ;;  %v2723_v1 = vpop.f32.mrf.mxu0 }
 0x40f   : > { %v2819_v58 = vadd.f32 %v2818_v63, %v2770_v51  ;;  %v2724_v14 = vadd.f32 %v2723_v1, %v6043_v3  ;;  %v6293_v51 = vld [vmem:[#allocation2 + $0xb0] sm:$0xff] }
 0x410   : > { %v6296_v63 = vld [vmem:[#allocation2 + $0xf0] sm:$0xff] }
 0x411   : > { %v2867_v47 = vpop.f32.mrf.mxu3  ;;  %v2772_v31 = vpop.f32.mrf.mxu1  ;;  %2918 = vmatmul.bf16.gmra.mxu0 %v6246_v0 }
 0x412   : > { %v2868_v19 = vadd.f32 %v2867_v47, %v2819_v58  ;;  %v2773_v35 = vadd.f32 %v2772_v31, %v2724_v14 }
 0x413   : > { %3016 = vmatmul.bf16.gmra.mxu2 %v6253_v30 }
 0x414   : > { %3314 = vst [vmem:[%s4892_s17 + $0x128] sm:$0xff] %v2868_v19  ;;  %2967 = vmatmul.bf16.gmra.mxu1 %v6250_v43 }
 0x416   : > { %3065 = vmatmul.bf16.gmra.mxu3 %v6256_v29  ;;  %v2821_v16 = vpop.f32.mrf.mxu2  ;;  %v2725_v21 = vpop.f32.mrf.mxu0 }
 0x417   : > { %v2822_v39 = vadd.f32 %v2821_v16, %v2773_v35  ;;  %v2726_v40 = vadd.f32 %v2725_v21, %v6043_v3  ;;  %v6312_v21 = vld [vmem:[#allocation2 + $0xf8] sm:$0xff] }
 0x419   : > { %v2870_v20 = vpop.f32.mrf.mxu3  ;;  %v2774_v60 = vpop.f32.mrf.mxu1 }
 0x41a   : > { %v2871_v34 = vadd.f32 %v2870_v20, %v2822_v39  ;;  %v2775_v49 = vadd.f32 %v2774_v60, %v2726_v40  ;;  %v6306_v39 = vld [vmem:[#allocation2 + $0x78] sm:$0xff] }
 0x41b   : > { %v6309_v20 = vld [vmem:[#allocation2 + $0xb8] sm:$0xff] }
 0x41c   : > { %3318 = vst [vmem:[%s4892_s17 + $0x148] sm:$0xff] %v2871_v34 }
 0x41e   : > { %v2823_v46 = vpop.f32.mrf.mxu2  ;;  %v2728_v55 = vpop.f32.mrf.mxu0 }
 0x41f   : > { %v2824_v54 = vadd.f32 %v2823_v46, %v2775_v49  ;;  %v2729_v13 = vadd.f32 %v2728_v55, %v6043_v3  ;;  %v6320_v46 = vld [vmem:[%s6439_s5] sm:$0xf] }
 0x421   : > { %v2872_v4 = vpop.f32.mrf.mxu3  ;;  %v2777_v18 = vpop.f32.mrf.mxu1  ;;  %2923 = vmatmul.bf16.gmra.mxu0 %v6286_v53 }
 0x422   : > { %v2873_v52 = vadd.f32 %v2872_v4, %v2824_v54  ;;  %v2778_v2 = vadd.f32 %v2777_v18, %v2729_v13  ;;  %v6323_v54 = vperm.slane %v6320_v46, 2 }
 0x423   : > { %3021 = vmatmul.bf16.gmra.mxu2 %v6293_v51 }
 0x424   : > { %3322 = vst [vmem:[%s4892_s17 + $0x168] sm:$0xff] %v2873_v52  ;;  %2972 = vmatmul.bf16.gmra.mxu1 %v6290_v62 }
 0x426   : > { %3070 = vmatmul.bf16.gmra.mxu3 %v6296_v63  ;;  %v2826_v58 = vpop.f32.mrf.mxu2  ;;  %v2730_v14 = vpop.f32.mrf.mxu0 }
 0x427   : > { %v2827_v47 = vadd.f32 %v2826_v58, %v2778_v2  ;;  %v2731_v35 = vadd.f32 %v2730_v14, %v6043_v3 }
 0x429   : > { %v2875_v1 = vpop.f32.mrf.mxu3  ;;  %v2779_v31 = vpop.f32.mrf.mxu1 }
 0x42a   : > { %v2876_v19 = vadd.f32 %v2875_v1, %v2827_v47  ;;  %v2780_v37 = vadd.f32 %v2779_v31, %v2731_v35 }
 0x42c   : > { %3326 = vst [vmem:[%s4892_s17 + $0x188] sm:$0xff] %v2876_v19 }
 0x42e   : > { %v2828_v28 = vpop.f32.mrf.mxu2  ;;  %v2733_v5 = vpop.f32.mrf.mxu0 }
 0x42f   : > { %v2829_v42 = vadd.f32 %v2828_v28, %v2780_v37  ;;  %v2734_v50 = vadd.f32 %v2733_v5, %v6043_v3 }
 0x431   : > { %v2877_v12 = vpop.f32.mrf.mxu3  ;;  %v2782_v10 = vpop.f32.mrf.mxu1  ;;  %2928 = vmatmul.bf16.gmra.mxu0 %v6302_v32 }
 0x432   : > { %v2878_v16 = vadd.f32 %v2877_v12, %v2829_v42  ;;  %v2783_v38 = vadd.f32 %v2782_v10, %v2734_v50 }
 0x433   : > { %3026 = vmatmul.bf16.gmra.mxu2 %v6309_v20 }
 0x434   : > { %3330 = vst [vmem:[%s4892_s17 + $0x1a8] sm:$0xff] %v2878_v16  ;;  %2977 = vmatmul.bf16.gmra.mxu1 %v6306_v39 }
 0x436   : > { %3075 = vmatmul.bf16.gmra.mxu3 %v6312_v21  ;;  %v2831_v60 = vpop.f32.mrf.mxu2  ;;  %v2735_v6 = vpop.f32.mrf.mxu0 }
 0x437   : > { %v2832_v34 = vadd.f32 %v2831_v60, %v2783_v38  ;;  %v2736_v49 = vadd.f32 %v2735_v6, %v6043_v3 }
 0x439   : > { %v2880_v40 = vpop.f32.mrf.mxu3  ;;  %v2784_v7 = vpop.f32.mrf.mxu1 }
 0x43a   : > { %v2881_v44 = vadd.f32 %v2880_v40, %v2832_v34  ;;  %v2785_v4 = vadd.f32 %v2784_v7, %v2736_v49 }
 0x43c   : > { %3334 = vst [vmem:[%s4892_s17 + $0x1c8] sm:$0xff] %v2881_v44 }
 0x43e   : > { %v2833_v55 = vpop.f32.mrf.mxu2  ;;  %v2894_v52 = vpop.f32.mrf.mxu0 }
 0x43f   : > { %v2834_v13 = vadd.f32 %v2833_v55, %v2785_v4  ;;  %v2895_v2 = vadd.f32 %v2894_v52, %v6323_v54 }
 0x441   : > { %v2882_v18 = vpop.f32.mrf.mxu3  ;;  %v2943_v58 = vpop.f32.mrf.mxu1  ;;  %3089 = vmatmul.bf16.vlgmr.msrb.gmra.mxu0 %v6046_v61 }
 0x442   : > { %v2883_v47 = vadd.f32 %v2882_v18, %v2834_v13  ;;  %v2944_v3 = vadd.f32 %v2943_v58, %v2895_v2 }
 0x443   : > { %3187 = vmatmul.bf16.vlgmr.msrb.gmra.mxu2 %v6053_v27 }
 0x444   : > { %3338 = vst [vmem:[%s4892_s17 + $0x1e8] sm:$0xff] %v2883_v47  ;;  %3138 = vmatmul.bf16.vlgmr.msrb.gmra.mxu1 %v6050_v26 }
 0x446   : > { %3236 = vmatmul.bf16.vlgmr.msrb.gmra.mxu3 %v6056_v57  ;;  %v2992_v1 = vpop.f32.mrf.mxu2  ;;  %v2896_v19 = vpop.f32.mrf.mxu0 }
 0x447   : > { %v2993_v14 = vadd.f32 %v2992_v1, %v2944_v3  ;;  %v2897_v28 = vadd.f32 %v2896_v19, %v6323_v54 }
 0x449   : > { %v3041_v31 = vpop.f32.mrf.mxu3  ;;  %v2945_v35 = vpop.f32.mrf.mxu1 }
 0x44a   : > { %v3042_v37 = vadd.f32 %v3041_v31, %v2993_v14  ;;  %v2946_v42 = vadd.f32 %v2945_v35, %v2897_v28 }
 0x44c   : > { %3279 = vst [vmem:[%s4892_s17 + $0x10] sm:$0xff] %v3042_v37 }
 0x44e   : > { %v2994_v61 = vpop.f32.mrf.mxu2  ;;  %v2899_v50 = vpop.f32.mrf.mxu0 }
 0x44f   : > { %v2995_v12 = vadd.f32 %v2994_v61, %v2946_v42  ;;  %v2900_v26 = vadd.f32 %v2899_v50, %v6323_v54 }
 0x451   : > { %v3043_v5 = vpop.f32.mrf.mxu3  ;;  %v2948_v27 = vpop.f32.mrf.mxu1  ;;  %3094 = vmatmul.bf16.gmra.mxu0 %v6086_v48 }
 0x452   : > { %v3044_v57 = vadd.f32 %v3043_v5, %v2995_v12  ;;  %v2949_v10 = vadd.f32 %v2948_v27, %v2900_v26 }
 0x453   : > { %3192 = vmatmul.bf16.gmra.mxu2 %v6093_v8 }
 0x454   : > { %3283 = vst [vmem:[%s4892_s17 + $0x30] sm:$0xff] %v3044_v57  ;;  %3143 = vmatmul.bf16.gmra.mxu1 %v6090_v11 }
 0x456   : > { %3241 = vmatmul.bf16.gmra.mxu3 %v6096_v23  ;;  %v2997_v16 = vpop.f32.mrf.mxu2  ;;  %v2901_v34 = vpop.f32.mrf.mxu0 }
 0x457   : > { %v2998_v38 = vadd.f32 %v2997_v16, %v2949_v10  ;;  %v2902_v7 = vadd.f32 %v2901_v34, %v6323_v54 }
 0x459   : > { %v3046_v60 = vpop.f32.mrf.mxu3  ;;  %v2950_v40 = vpop.f32.mrf.mxu1 }
 0x45a   : > { %v3047_v6 = vadd.f32 %v3046_v60, %v2998_v38  ;;  %v2951_v44 = vadd.f32 %v2950_v40, %v2902_v7 }
 0x45c   : > { %3287 = vst [vmem:[%s4892_s17 + $0x50] sm:$0xff] %v3047_v6 }
 0x45e   : > { %v2999_v48 = vpop.f32.mrf.mxu2  ;;  %v2904_v55 = vpop.f32.mrf.mxu0 }
 0x45f   : > { %v3000_v49 = vadd.f32 %v2999_v48, %v2951_v44  ;;  %v2905_v11 = vadd.f32 %v2904_v55, %v6323_v54 }
 0x461   : > { %v3048_v4 = vpop.f32.mrf.mxu3  ;;  %v2953_v8 = vpop.f32.mrf.mxu1  ;;  %3099 = vmatmul.bf16.gmra.mxu0 %v6126_v24 }
 0x462   : > { %v3049_v23 = vadd.f32 %v3048_v4, %v3000_v49  ;;  %v2954_v13 = vadd.f32 %v2953_v8, %v2905_v11 }
 0x463   : > { %3197 = vmatmul.bf16.gmra.mxu2 %v6133_v15 }
 0x464   : > { %3291 = vst [vmem:[%s4892_s17 + $0x70] sm:$0xff] %v3049_v23  ;;  %3148 = vmatmul.bf16.gmra.mxu1 %v6130_v36 }
 0x466   : > { %3246 = vmatmul.bf16.gmra.mxu3 %v6136_v25  ;;  %v3002_v18 = vpop.f32.mrf.mxu2  ;;  %v2906_v58 = vpop.f32.mrf.mxu0 }
 0x467   : > { %v3003_v52 = vadd.f32 %v3002_v18, %v2954_v13  ;;  %v2907_v1 = vadd.f32 %v2906_v58, %v6323_v54 }
 0x469   : > { %v3051_v2 = vpop.f32.mrf.mxu3  ;;  %v2955_v47 = vpop.f32.mrf.mxu1 }
 0x46a   : > { %v3052_v3 = vadd.f32 %v3051_v2, %v3003_v52  ;;  %v2956_v14 = vadd.f32 %v2955_v47, %v2907_v1 }
 0x46c   : > { %3295 = vst [vmem:[%s4892_s17 + $0x90] sm:$0xff] %v3052_v3 }
 0x46e   : > { %v3004_v24 = vpop.f32.mrf.mxu2  ;;  %v2909_v35 = vpop.f32.mrf.mxu0 }
 0x46f   : > { %v3005_v31 = vadd.f32 %v3004_v24, %v2956_v14  ;;  %v2910_v36 = vadd.f32 %v2909_v35, %v6323_v54 }
 0x471   : > { %v3053_v19 = vpop.f32.mrf.mxu3  ;;  %v2958_v15 = vpop.f32.mrf.mxu1  ;;  %3104 = vmatmul.bf16.gmra.mxu0 %v6166_v17 }
 0x472   : > { %v3054_v25 = vadd.f32 %v3053_v19, %v3005_v31  ;;  %v2959_v37 = vadd.f32 %v2958_v15, %v2910_v36 }
 0x473   : > { %3202 = vmatmul.bf16.gmra.mxu2 %v6173_v22 }
 0x474   : > { %3299 = vst [vmem:[%s4892_s17 + $0xb0] sm:$0xff] %v3054_v25  ;;  %3153 = vmatmul.bf16.gmra.mxu1 %v6170_v9 }
 0x476   : > { %3251 = vmatmul.bf16.gmra.mxu3 %v6176_v59  ;;  %v3007_v28 = vpop.f32.mrf.mxu2  ;;  %v2911_v12 = vpop.f32.mrf.mxu0 }
 0x477   : > { %v3008_v42 = vadd.f32 %v3007_v28, %v2959_v37  ;;  %v2912_v26 = vadd.f32 %v2911_v12, %v6323_v54 }
 0x479   : > { %v3056_v61 = vpop.f32.mrf.mxu3  ;;  %v2960_v5 = vpop.f32.mrf.mxu1 }
 0x47a   : > { %v3057_v50 = vadd.f32 %v3056_v61, %v3008_v42  ;;  %v2961_v27 = vadd.f32 %v2960_v5, %v2912_v26 }
 0x47c   : > { %3303 = vst [vmem:[%s4892_s17 + $0xd0] sm:$0xff] %v3057_v50 }
 0x47e   : > { %v3009_v17 = vpop.f32.mrf.mxu2  ;;  %v2914_v16 = vpop.f32.mrf.mxu0 }
 0x47f   : > { %v3010_v57 = vadd.f32 %v3009_v17, %v2961_v27  ;;  %v2915_v9 = vadd.f32 %v2914_v16, %v6323_v54 }
 0x481   : > { %v3058_v10 = vpop.f32.mrf.mxu3  ;;  %v2963_v22 = vpop.f32.mrf.mxu1  ;;  %3109 = vmatmul.bf16.gmra.mxu0 %v6206_v45 }
 0x482   : > { %v3059_v59 = vadd.f32 %v3058_v10, %v3010_v57  ;;  %v2964_v38 = vadd.f32 %v2963_v22, %v2915_v9 }
 0x483   : > { %3207 = vmatmul.bf16.gmra.mxu2 %v6213_v41 }
 0x484   : > { %3307 = vst [vmem:[%s4892_s17 + $0xf0] sm:$0xff] %v3059_v59  ;;  %3158 = vmatmul.bf16.gmra.mxu1 %v6210_v56 }
 0x486   : > { %3256 = vmatmul.bf16.gmra.mxu3 %v6216_v33  ;;  %v3012_v60 = vpop.f32.mrf.mxu2  ;;  %v2916_v6 = vpop.f32.mrf.mxu0 }
 0x487   : > { %v3013_v34 = vadd.f32 %v3012_v60, %v2964_v38  ;;  %v2917_v48 = vadd.f32 %v2916_v6, %v6323_v54 }
 0x489   : > { %v3061_v40 = vpop.f32.mrf.mxu3  ;;  %v2965_v7 = vpop.f32.mrf.mxu1 }
 0x48a   : > { %v3062_v44 = vadd.f32 %v3061_v40, %v3013_v34  ;;  %v2966_v49 = vadd.f32 %v2965_v7, %v2917_v48 }
 0x48c   : > { %3311 = vst [vmem:[%s4892_s17 + $0x110] sm:$0xff] %v3062_v44 }
 0x48e   : > { %v3014_v45 = vpop.f32.mrf.mxu2  ;;  %v2919_v11 = vpop.f32.mrf.mxu0 }
 0x48f   : > { %v3015_v4 = vadd.f32 %v3014_v45, %v2966_v49  ;;  %v2920_v56 = vadd.f32 %v2919_v11, %v6323_v54 }
 0x491   : > { %v3063_v55 = vpop.f32.mrf.mxu3  ;;  %v2968_v41 = vpop.f32.mrf.mxu1  ;;  %3114 = vmatmul.bf16.gmra.mxu0 %v6246_v0 }
 0x492   : > { %v3064_v33 = vadd.f32 %v3063_v55, %v3015_v4  ;;  %v2969_v8 = vadd.f32 %v2968_v41, %v2920_v56 }
 0x493   : > { %3212 = vmatmul.bf16.gmra.mxu2 %v6253_v30 }
 0x494   : > { %3315 = vst [vmem:[%s4892_s17 + $0x130] sm:$0xff] %v3064_v33  ;;  %3163 = vmatmul.bf16.gmra.mxu1 %v6250_v43 }
 0x496   : > { %3261 = vmatmul.bf16.gmra.mxu3 %v6256_v29  ;;  %v3017_v23 = vpop.f32.mrf.mxu2  ;;  %v2921_v52 = vpop.f32.mrf.mxu0 }
 0x497   : > { %v3018_v13 = vadd.f32 %v3017_v23, %v2969_v8  ;;  %v2922_v47 = vadd.f32 %v2921_v52, %v6323_v54 }
 0x499   : > { %v3066_v18 = vpop.f32.mrf.mxu3  ;;  %v2970_v2 = vpop.f32.mrf.mxu1 }
 0x49a   : > { %v3067_v58 = vadd.f32 %v3066_v18, %v3018_v13  ;;  %v2971_v3 = vadd.f32 %v2970_v2, %v2922_v47 }
 0x49c   : > { %3319 = vst [vmem:[%s4892_s17 + $0x150] sm:$0xff] %v3067_v58 }
 0x49e   : > { %v3019_v0 = vpop.f32.mrf.mxu2  ;;  %v2924_v24 = vpop.f32.mrf.mxu0 }
 0x49f   : > { %v3020_v1 = vadd.f32 %v3019_v0, %v2971_v3  ;;  %v2925_v43 = vadd.f32 %v2924_v24, %v6323_v54 }
 0x4a1   : > { %v3068_v14 = vpop.f32.mrf.mxu3  ;;  %v2973_v30 = vpop.f32.mrf.mxu1  ;;  %3119 = vmatmul.bf16.gmra.mxu0 %v6286_v53 }
 0x4a2   : > { %v3069_v29 = vadd.f32 %v3068_v14, %v3020_v1  ;;  %v2974_v31 = vadd.f32 %v2973_v30, %v2925_v43 }
 0x4a3   : > { %3217 = vmatmul.bf16.gmra.mxu2 %v6293_v51 }
 0x4a4   : > { %3323 = vst [vmem:[%s4892_s17 + $0x170] sm:$0xff] %v3069_v29  ;;  %3168 = vmatmul.bf16.gmra.mxu1 %v6290_v62 }
 0x4a6   : > { %3266 = vmatmul.bf16.gmra.mxu3 %v6296_v63  ;;  %v3022_v19 = vpop.f32.mrf.mxu2  ;;  %v2926_v15 = vpop.f32.mrf.mxu0 }
 0x4a7   : > { %v3023_v35 = vadd.f32 %v3022_v19, %v2974_v31  ;;  %v2927_v28 = vadd.f32 %v2926_v15, %v6323_v54 }
 0x4a9   : > { %v3071_v36 = vpop.f32.mrf.mxu3  ;;  %v2975_v25 = vpop.f32.mrf.mxu1 }
 0x4aa   : > { %v3072_v37 = vadd.f32 %v3071_v36, %v3023_v35  ;;  %v2976_v42 = vadd.f32 %v2975_v25, %v2927_v28 }
 0x4ac   : > { %3327 = vst [vmem:[%s4892_s17 + $0x190] sm:$0xff] %v3072_v37 }
 0x4ae   : > { %v3024_v53 = vpop.f32.mrf.mxu2  ;;  %v2929_v5 = vpop.f32.mrf.mxu0 }
 0x4af   : > { %v3025_v61 = vadd.f32 %v3024_v53, %v2976_v42  ;;  %v2930_v62 = vadd.f32 %v2929_v5, %v6323_v54 }
 0x4b1   : > { %v3073_v12 = vpop.f32.mrf.mxu3  ;;  %v2978_v51 = vpop.f32.mrf.mxu1  ;;  %3124 = vmatmul.bf16.gmra.mxu0 %v6302_v32  ;;  %v6390_v32 = vperm.slane %v6320_v46, 3 }
 0x4b2   : > { %v3074_v63 = vadd.f32 %v3073_v12, %v3025_v61  ;;  %v2979_v50 = vadd.f32 %v2978_v51, %v2930_v62 }
 0x4b3   : > { %3222 = vmatmul.bf16.gmra.mxu2 %v6309_v20 }
 0x4b4   : > { %3331 = vst [vmem:[%s4892_s17 + $0x1b0] sm:$0xff] %v3074_v63  ;;  %3173 = vmatmul.bf16.gmra.mxu1 %v6306_v39 }
 0x4b6   : > { %3271 = vmatmul.bf16.gmra.mxu3 %v6312_v21  ;;  %v3027_v26 = vpop.f32.mrf.mxu2  ;;  %v2931_v57 = vpop.f32.mrf.mxu0 }
 0x4b7   : > { %v3028_v27 = vadd.f32 %v3027_v26, %v2979_v50  ;;  %v2932_v9 = vadd.f32 %v2931_v57, %v6323_v54 }
 0x4b9   : > { %v3076_v17 = vpop.f32.mrf.mxu3  ;;  %v2980_v10 = vpop.f32.mrf.mxu1 }
 0x4ba   : > { %v3077_v16 = vadd.f32 %v3076_v17, %v3028_v27  ;;  %v2981_v22 = vadd.f32 %v2980_v10, %v2932_v9 }
 0x4bc   : > { %3335 = vst [vmem:[%s4892_s17 + $0x1d0] sm:$0xff] %v3077_v16 }
 0x4be   : > { %v3029_v59 = vpop.f32.mrf.mxu2  ;;  %v3090_v38 = vpop.f32.mrf.mxu0 }
 0x4bf   : > { %v3030_v39 = vadd.f32 %v3029_v59, %v2981_v22  ;;  %v3091_v21 = vadd.f32 %v3090_v38, %v6390_v32 }
 0x4c1   : > { %v3078_v20 = vpop.f32.mrf.mxu3  ;;  %v3139_v60 = vpop.f32.mrf.mxu1 }
 0x4c2   : > { %v3079_v34 = vadd.f32 %v3078_v20, %v3030_v39  ;;  %v3140_v40 = vadd.f32 %v3139_v60, %v3091_v21 }
 0x4c4   : > { %3339 = vst [vmem:[%s4892_s17 + $0x1f0] sm:$0xff] %v3079_v34 }
 0x4c6   : > { %v3188_v6 = vpop.f32.mrf.mxu2  ;;  %v3092_v44 = vpop.f32.mrf.mxu0 }
 0x4c7   : > { %v3189_v7 = vadd.f32 %v3188_v6, %v3140_v40  ;;  %v3093_v49 = vadd.f32 %v3092_v44, %v6390_v32 }
 0x4c9   : > { %v3237_v54 = vpop.f32.mrf.mxu3  ;;  %v3141_v48 = vpop.f32.mrf.mxu1 }
 0x4ca   : > { %v3238_v46 = vadd.f32 %v3237_v54, %v3189_v7  ;;  %v3142_v45 = vadd.f32 %v3141_v48, %v3093_v49 }
 0x4cc   : > { %3280 = vst [vmem:[%s4892_s17 + $0x18] sm:$0xff] %v3238_v46 }
 0x4ce   : > { %v3190_v4 = vpop.f32.mrf.mxu2  ;;  %v3095_v56 = vpop.f32.mrf.mxu0 }
 0x4cf   : > { %v3191_v55 = vadd.f32 %v3190_v4, %v3142_v45  ;;  %v3096_v41 = vadd.f32 %v3095_v56, %v6390_v32 }
 0x4d1   : > { %v3239_v11 = vpop.f32.mrf.mxu3  ;;  %v3144_v33 = vpop.f32.mrf.mxu1 }
 0x4d2   : > { %v3240_v8 = vadd.f32 %v3239_v11, %v3191_v55  ;;  %v3145_v23 = vadd.f32 %v3144_v33, %v3096_v41 }
 0x4d4   : > { %3284 = vst [vmem:[%s4892_s17 + $0x38] sm:$0xff] %v3240_v8 }
 0x4d6   : > { %v3193_v13 = vpop.f32.mrf.mxu2  ;;  %v3097_v2 = vpop.f32.mrf.mxu0 }
 0x4d7   : > { %v3194_v18 = vadd.f32 %v3193_v13, %v3145_v23  ;;  %v3098_v3 = vadd.f32 %v3097_v2, %v6390_v32 }
 0x4d9   : > { %v3242_v52 = vpop.f32.mrf.mxu3  ;;  %v3146_v58 = vpop.f32.mrf.mxu1 }
 0x4da   : > { %v3243_v47 = vadd.f32 %v3242_v52, %v3194_v18  ;;  %v3147_v0 = vadd.f32 %v3146_v58, %v3098_v3 }
 0x4dc   : > { %3288 = vst [vmem:[%s4892_s17 + $0x58] sm:$0xff] %v3243_v47 }
 0x4de   : > { %v3195_v1 = vpop.f32.mrf.mxu2  ;;  %v3100_v43 = vpop.f32.mrf.mxu0 }
 0x4df   : > { %v3196_v14 = vadd.f32 %v3195_v1, %v3147_v0  ;;  %v3101_v30 = vadd.f32 %v3100_v43, %v6390_v32 }
 0x4e1   : > { %v3244_v24 = vpop.f32.mrf.mxu3  ;;  %v3149_v29 = vpop.f32.mrf.mxu1 }
 0x4e2   : > { %v3245_v31 = vadd.f32 %v3244_v24, %v3196_v14  ;;  %v3150_v19 = vadd.f32 %v3149_v29, %v3101_v30 }
 0x4e4   : > { %3292 = vst [vmem:[%s4892_s17 + $0x78] sm:$0xff] %v3245_v31 }
 0x4e6   : > { %v3198_v35 = vpop.f32.mrf.mxu2  ;;  %v3102_v25 = vpop.f32.mrf.mxu0 }
 0x4e7   : > { %v3199_v36 = vadd.f32 %v3198_v35, %v3150_v19  ;;  %v3103_v42 = vadd.f32 %v3102_v25, %v6390_v32 }
 0x4e9   : > { %v3247_v15 = vpop.f32.mrf.mxu3  ;;  %v3151_v37 = vpop.f32.mrf.mxu1 }
 0x4ea   : > { %v3248_v28 = vadd.f32 %v3247_v15, %v3199_v36  ;;  %v3152_v53 = vadd.f32 %v3151_v37, %v3103_v42 }
 0x4ec   : > { %3296 = vst [vmem:[%s4892_s17 + $0x98] sm:$0xff] %v3248_v28 }
 0x4ee   : > { %v3200_v61 = vpop.f32.mrf.mxu2  ;;  %v3105_v62 = vpop.f32.mrf.mxu0 }
 0x4ef   : > { %v3201_v12 = vadd.f32 %v3200_v61, %v3152_v53  ;;  %v3106_v51 = vadd.f32 %v3105_v62, %v6390_v32 }
 0x4f1   : > { %v3249_v5 = vpop.f32.mrf.mxu3  ;;  %v3154_v63 = vpop.f32.mrf.mxu1 }
 0x4f2   : > { %v3250_v50 = vadd.f32 %v3249_v5, %v3201_v12  ;;  %v3155_v26 = vadd.f32 %v3154_v63, %v3106_v51 }
 0x4f4   : > { %3300 = vst [vmem:[%s4892_s17 + $0xb8] sm:$0xff] %v3250_v50 }
 0x4f6   : > { %v3203_v27 = vpop.f32.mrf.mxu2  ;;  %v3107_v10 = vpop.f32.mrf.mxu0 }
 0x4f7   : > { %v3204_v17 = vadd.f32 %v3203_v27, %v3155_v26  ;;  %v3108_v22 = vadd.f32 %v3107_v10, %v6390_v32 }
 0x4f9   : > { %v3252_v57 = vpop.f32.mrf.mxu3  ;;  %v3156_v16 = vpop.f32.mrf.mxu1 }
 0x4fa   : > { %v3253_v9 = vadd.f32 %v3252_v57, %v3204_v17  ;;  %v3157_v59 = vadd.f32 %v3156_v16, %v3108_v22 }
 0x4fc   : > { %3304 = vst [vmem:[%s4892_s17 + $0xd8] sm:$0xff] %v3253_v9 }
 0x4fe   : > { %v3205_v39 = vpop.f32.mrf.mxu2  ;;  %v3110_v21 = vpop.f32.mrf.mxu0 }
 0x4ff   : > { %v3206_v20 = vadd.f32 %v3205_v39, %v3157_v59  ;;  %v3111_v60 = vadd.f32 %v3110_v21, %v6390_v32 }
 0x501   : > { %v3254_v38 = vpop.f32.mrf.mxu3  ;;  %v3159_v34 = vpop.f32.mrf.mxu1 }
 0x502   : > { %v3255_v40 = vadd.f32 %v3254_v38, %v3206_v20  ;;  %v3160_v6 = vadd.f32 %v3159_v34, %v3111_v60 }
 0x504   : > { %3308 = vst [vmem:[%s4892_s17 + $0xf8] sm:$0xff] %v3255_v40 }
 0x506   : > { %v3208_v7 = vpop.f32.mrf.mxu2  ;;  %v3112_v48 = vpop.f32.mrf.mxu0 }
 0x507   : > { %v3209_v54 = vadd.f32 %v3208_v7, %v3160_v6  ;;  %v3113_v45 = vadd.f32 %v3112_v48, %v6390_v32 }
 0x509   : > { %v3257_v44 = vpop.f32.mrf.mxu3  ;;  %v3161_v46 = vpop.f32.mrf.mxu1 }
 0x50a   : > { %v3258_v49 = vadd.f32 %v3257_v44, %v3209_v54  ;;  %v3162_v4 = vadd.f32 %v3161_v46, %v3113_v45 }
 0x50c   : > { %3312 = vst [vmem:[%s4892_s17 + $0x118] sm:$0xff] %v3258_v49 }
 0x50e   : > { %v3210_v55 = vpop.f32.mrf.mxu2  ;;  %v3115_v41 = vpop.f32.mrf.mxu0 }
 0x50f   : > { %v3211_v11 = vadd.f32 %v3210_v55, %v3162_v4  ;;  %v3116_v33 = vadd.f32 %v3115_v41, %v6390_v32 }
 0x511   : > { %v3259_v56 = vpop.f32.mrf.mxu3  ;;  %v3164_v8 = vpop.f32.mrf.mxu1 }
 0x512   : > { %v3260_v23 = vadd.f32 %v3259_v56, %v3211_v11  ;;  %v3165_v13 = vadd.f32 %v3164_v8, %v3116_v33 }
 0x514   : > { %3316 = vst [vmem:[%s4892_s17 + $0x138] sm:$0xff] %v3260_v23 }
 0x516   : > { %v3213_v18 = vpop.f32.mrf.mxu2  ;;  %v3117_v58 = vpop.f32.mrf.mxu0 }
 0x517   : > { %v3214_v52 = vadd.f32 %v3213_v18, %v3165_v13  ;;  %v3118_v0 = vadd.f32 %v3117_v58, %v6390_v32 }
 0x519   : > { %v3262_v2 = vpop.f32.mrf.mxu3  ;;  %v3166_v47 = vpop.f32.mrf.mxu1 }
 0x51a   : > { %v3263_v3 = vadd.f32 %v3262_v2, %v3214_v52  ;;  %v3167_v1 = vadd.f32 %v3166_v47, %v3118_v0 }
 0x51c   : > { %3320 = vst [vmem:[%s4892_s17 + $0x158] sm:$0xff] %v3263_v3 }
 0x51e   : > { %v3215_v14 = vpop.f32.mrf.mxu2  ;;  %v3120_v30 = vpop.f32.mrf.mxu0 }
 0x51f   : > { %v3216_v24 = vadd.f32 %v3215_v14, %v3167_v1  ;;  %v3121_v29 = vadd.f32 %v3120_v30, %v6390_v32 }
 0x521   : > { %v3264_v43 = vpop.f32.mrf.mxu3  ;;  %v3169_v31 = vpop.f32.mrf.mxu1 }
 0x522   : > { %v3265_v19 = vadd.f32 %v3264_v43, %v3216_v24  ;;  %v3170_v35 = vadd.f32 %v3169_v31, %v3121_v29 }
 0x524   : > { %3324 = vst [vmem:[%s4892_s17 + $0x178] sm:$0xff] %v3265_v19 }
 0x526   : > { %v3218_v36 = vpop.f32.mrf.mxu2  ;;  %v3122_v37 = vpop.f32.mrf.mxu0 }
 0x527   : > { %v3219_v15 = vadd.f32 %v3218_v36, %v3170_v35  ;;  %v3123_v53 = vadd.f32 %v3122_v37, %v6390_v32 }
 0x529   : > { %v3267_v25 = vpop.f32.mrf.mxu3  ;;  %v3171_v28 = vpop.f32.mrf.mxu1 }
 0x52a   : > { %v3268_v42 = vadd.f32 %v3267_v25, %v3219_v15  ;;  %v3172_v61 = vadd.f32 %v3171_v28, %v3123_v53 }
 0x52c   : > { %3328 = vst [vmem:[%s4892_s17 + $0x198] sm:$0xff] %v3268_v42 }
 0x52e   : > { %v3220_v12 = vpop.f32.mrf.mxu2  ;;  %v3125_v51 = vpop.f32.mrf.mxu0 }
 0x52f   : > { %v3221_v5 = vadd.f32 %v3220_v12, %v3172_v61  ;;  %v3126_v63 = vadd.f32 %v3125_v51, %v6390_v32 }
 0x531   : > { %v3269_v62 = vpop.f32.mrf.mxu3  ;;  %v3174_v26 = vpop.f32.mrf.mxu1 }
 0x532   : > { %v3270_v50 = vadd.f32 %v3269_v62, %v3221_v5  ;;  %v3175_v27 = vadd.f32 %v3174_v26, %v3126_v63 }
 0x534   : > { %3332 = vst [vmem:[%s4892_s17 + $0x1b8] sm:$0xff] %v3270_v50 }
 0x536   : > { %v3223_v17 = vpop.f32.mrf.mxu2  ;;  %v3127_v16 = vpop.f32.mrf.mxu0 }
 0x537   : > { %v3224_v57 = vadd.f32 %v3223_v17, %v3175_v27  ;;  %v3128_v22 = vadd.f32 %v3127_v16, %v6390_v32 }
 0x539   : > { %v3272_v10 = vpop.f32.mrf.mxu3  ;;  %v3176_v59 = vpop.f32.mrf.mxu1 }
 0x53a   : > { %v3273_v9 = vadd.f32 %v3272_v10, %v3224_v57  ;;  %v3177_v39 = vadd.f32 %v3176_v59, %v3128_v22 }
 0x53c   : > { %3336 = vst [vmem:[%s4892_s17 + $0x1d8] sm:$0xff] %v3273_v9 }
 0x53e   : > { %v3225_v20 = vpop.f32.mrf.mxu2 }
 0x53f   : > { %v3226_v38 = vadd.f32 %v3225_v20, %v3177_v39 }
 0x541   : > { %v3274_v21 = vpop.f32.mrf.mxu3 }
 0x542   : > { %v3275_v60 = vadd.f32 %v3274_v21, %v3226_v38 }
 0x544   : > { %3340 = vst [vmem:[%s4892_s17 + $0x1f8] sm:$0xff] %v3275_v60 }
 0x545 PF: > { %s16_s23 = sadd.s32 1, %s4810_s23   ;;  %s6441_s21 = smov %s4806_s22 }
 0x546   : > { %p13_p6 = scmp.ge.s32.totalorder %s16_s23, 4   ;;  %s6442_s22 = smov %s6444_s24 }
 0x548   :  { %15 = sbr.rel (!%p13_p6) target bundleno = 2 (0x2), region = 111 }

</bundles_post_ra>
